<compile_context>
chip_gen: v6e
topology: v6e:2x2x1
jax: 0.10.0
libtpu: 0.0.40
codegen_flags: <defaults>
</compile_context>

<pallas_src>
import jax
import jax.numpy as jnp
from jax.experimental import pallas as pl
from jax.experimental.pallas import tpu as pltpu


def _round_up(n, m):
    return ((n + m - 1) // m) * m


def _vmem_specs(n):
    return [pl.BlockSpec(memory_space=pltpu.MemorySpace.VMEM) for _ in range(n)]


# --------------------------------------------------------------------------
# Kernel 1a: per-layer precompute of per-source projections (done once per
# layer, tiled over rows) ->  rhs = [dinv * (X @ W_gcn) | X]  (bf16),
#                             xp  = X @ W_gat             (bf16)
# --------------------------------------------------------------------------
def precompute_kernel(x_ref, dinv_ref, w_gcn_ref, w_gat_ref, rhs_ref, xp_ref):
    x = x_ref[...]                                                    # (TM, C) f32
    xw = jnp.dot(x, w_gcn_ref[...], preferred_element_type=jnp.float32)
    xp = jnp.dot(x, w_gat_ref[...], preferred_element_type=jnp.float32)
    rhs_ref[...] = jnp.concatenate([dinv_ref[...] * xw, x], axis=-1).astype(jnp.bfloat16)
    xp_ref[...] = xp.astype(jnp.bfloat16)


# --------------------------------------------------------------------------
# Kernel 1b: one NeoGNNLayer  (GCNConv + SAGEConv + GINConv + GATConv, ReLU)
# tiled over target-node rows; one bf16 A^T tile drives all four branches.
# --------------------------------------------------------------------------
def neognn_layer_kernel(
    adjT_ref, rhs_ref, xp_ref, x_ref, dinv_ref, iideg_ref,
    w_gcn_ref, b_gcn_ref,
    w_sage_l_ref, b_sage_l_ref, w_sage_r_ref,
    w_gin1_ref, b_gin1_ref, w_gin2_ref, b_gin2_ref,
    att_src_ref, att_dst_ref, b_gat_ref,
    out_ref,
):
    tm, npad = adjT_ref.shape
    hp = out_ref.shape[-1]

    adjT = adjT_ref[...]                                              # bf16 (TM, N)
    x_t = x_ref[...]                                                  # f32 (TM, C)
    dinv = dinv_ref[...]                                              # f32 (TM, 1)

    # single MXU pass aggregates [dinv*XW_gcn | X] over in-neighbors
    agg = jnp.dot(adjT, rhs_ref[...], preferred_element_type=jnp.float32)
    agg_gcn = agg[:, :hp]                                             # sum_j A^T dinv_j (XW)_j
    agg_x = agg[:, hp:]                                               # sum_j A^T x_j

    # --- GCNConv: dinv_i * (agg_gcn + dinv_i * (x_i W)) + b -------------------
    xw_t = jnp.dot(x_t, w_gcn_ref[...], preferred_element_type=jnp.float32)
    x1 = dinv * (agg_gcn + dinv * xw_t) + b_gcn_ref[...]

    # --- SAGEConv (mean aggr): W_l * mean_N(x) + b_l + W_r * x ----------------
    x_mean = agg_x * iideg_ref[...]
    x2 = (jnp.dot(x_mean, w_sage_l_ref[...], preferred_element_type=jnp.float32)
          + b_sage_l_ref[...]
          + jnp.dot(x_t, w_sage_r_ref[...], preferred_element_type=jnp.float32))

    # --- GINConv (eps=0): MLP(x + sum_N(x)), MLP = Lin -> ReLU -> Lin ---------
    g = x_t + agg_x
    hmid = jnp.maximum(
        jnp.dot(g, w_gin1_ref[...], preferred_element_type=jnp.float32)
        + b_gin1_ref[...], 0.0)
    x3 = jnp.dot(hmid, w_gin2_ref[...], preferred_element_type=jnp.float32) + b_gin2_ref[...]

    # --- GATConv (heads=1, concat=False, self loops, leaky_relu 0.2) ----------
    xp = xp_ref[...]                                                  # bf16 (N, Hp)
    row0 = pl.multiple_of(pl.program_id(0) * tm, tm)
    xp_t = xp_ref[pl.ds(row0, tm), :].astype(jnp.float32)             # (TM, Hp)
    a_dst = jnp.sum(xp_t * att_dst_ref[...], axis=-1, keepdims=True)  # (TM, 1)
    a_src_row = jax.lax.dot_general(                                  # (1, N)
        att_src_ref[...].astype(jnp.bfloat16), xp,
        (((1,), (1,)), ((), ())), preferred_element_type=jnp.float32)
    e = a_dst + a_src_row                                             # e[i,j] = a_dst[i]+a_src[j]
    e = jnp.where(e > 0, e, 0.2 * e)                                  # leaky relu
    col = jax.lax.broadcasted_iota(jnp.int32, (tm, npad), 1)
    row = row0 + jax.lax.broadcasted_iota(jnp.int32, (tm, npad), 0)
    mask = jnp.logical_or(adjT > 0, col == row)                       # in-neighbors + self
    e = jnp.where(mask, e, -1e30)
    e = e - jnp.max(e, axis=-1, keepdims=True)
    p = jnp.exp(e)                                                    # masked entries underflow to 0
    alpha = p * pl.reciprocal(jnp.sum(p, axis=-1, keepdims=True), approx=True)
    x4 = (jnp.dot(alpha.astype(jnp.bfloat16), xp, preferred_element_type=jnp.float32)
          + b_gat_ref[...])

    out_ref[...] = jnp.maximum(x1 + x2 + x3 + x4, 0.0)


def neognn_layer(x, adjT_bf, dinv, iideg, p, *, tile_rows):
    npad, c = x.shape
    hp = p["w_gcn"].shape[1]
    ch = hp + c
    tm = tile_rows
    grid = (npad // tm,)

    def resident(shape):
        return pl.BlockSpec(shape, lambda i: (0,) * len(shape))

    def row_tile(cols):
        return pl.BlockSpec((tm, cols), lambda i: (i, 0))

    # per-source projections computed once per layer (avoids per-tile full-N matmuls)
    rhs, xp = pl.pallas_call(
        precompute_kernel,
        grid=grid,
        in_specs=[row_tile(c), row_tile(1), resident((c, hp)), resident((c, hp))],
        out_specs=(row_tile(ch), row_tile(hp)),
        out_shape=(jax.ShapeDtypeStruct((npad, ch), jnp.bfloat16),
                   jax.ShapeDtypeStruct((npad, hp), jnp.bfloat16)),
        compiler_params=pltpu.CompilerParams(dimension_semantics=("parallel",)),
    )(x, dinv, p["w_gcn"], p["w_gat"])

    cost = pl.CostEstimate(
        flops=int(2 * npad * npad * (ch + hp) + 2 * npad * hp * (4 * c + 2 * hp)),
        transcendentals=int(npad * npad),
        bytes_accessed=int(2 * npad * npad + 2 * npad * (ch + hp) + 4 * npad * (c + hp + 2)),
    )

    in_specs = [
        pl.BlockSpec((tm, npad), lambda i: (i, 0)),      # A^T tile (bf16)
        resident((npad, ch)),                            # rhs  (bf16, resident)
        resident((npad, hp)),                            # xp   (bf16, resident)
        row_tile(c),                                     # x tile (f32)
        row_tile(1),                                     # dinv tile
        row_tile(1),                                     # 1/in_deg tile
        resident((c, hp)), resident((1, hp)),            # gcn
        resident((c, hp)), resident((1, hp)), resident((c, hp)),                   # sage
        resident((c, hp)), resident((1, hp)), resident((hp, hp)), resident((1, hp)),  # gin
        resident((1, hp)), resident((1, hp)), resident((1, hp)),                   # gat
    ]
    inputs = [
        adjT_bf, rhs, xp, x, dinv, iideg,
        p["w_gcn"], p["b_gcn"],
        p["w_sage_l"], p["b_sage_l"], p["w_sage_r"],
        p["w_gin1"], p["b_gin1"], p["w_gin2"], p["b_gin2"],
        p["att_src"], p["att_dst"], p["b_gat"],
    ]
    return pl.pallas_call(
        neognn_layer_kernel,
        grid=grid,
        in_specs=in_specs,
        out_specs=row_tile(hp),
        out_shape=jax.ShapeDtypeStruct((npad, hp), jnp.float32),
        compiler_params=pltpu.CompilerParams(
            dimension_semantics=("parallel",),
            vmem_limit_bytes=48 * 1024 * 1024),
        cost_estimate=cost,
    )(*inputs)


# --------------------------------------------------------------------------
# Kernel 2: neighbor-mean embeddings for all nodes (out_mean @ z), row-tiled.
# --------------------------------------------------------------------------
def nmean_kernel(op_ref, z_ref, out_ref):
    out_ref[...] = jnp.dot(op_ref[...], z_ref[...], preferred_element_type=jnp.float32)


def neighbor_mean(out_mean_bf, z, *, tile_rows):
    npad, hp = z.shape
    tm = tile_rows
    return pl.pallas_call(
        nmean_kernel,
        grid=(npad // tm,),
        in_specs=[pl.BlockSpec((tm, npad), lambda i: (i, 0)),
                  pl.BlockSpec((npad, hp), lambda i: (0, 0))],
        out_specs=pl.BlockSpec((tm, hp), lambda i: (i, 0)),
        out_shape=jax.ShapeDtypeStruct((npad, hp), jnp.float32),
        compiler_params=pltpu.CompilerParams(dimension_semantics=("parallel",)),
    )(out_mean_bf, z.astype(jnp.bfloat16))


# --------------------------------------------------------------------------
# Kernel 3: decode (NEO score + MLP decoder) on gathered pair rows; the logits
# are written lane-dense into a [P, 128] slab (zero-padded weights), sliced
# back to [P, 2] outside the kernel.
# --------------------------------------------------------------------------
def decode_kernel(hu_ref, hv_ref, hnu_ref, hnv_ref,
                  w_neo_ref, b_neo_ref,
                  wd1_u_ref, wd1_v_ref, wd1_s_ref, bd1_ref,
                  wd2_ref, bd2_ref, out_ref):
    overlap = hnu_ref[...] * hnv_ref[...]
    neo = jax.nn.sigmoid(
        jnp.dot(overlap, w_neo_ref[...], preferred_element_type=jnp.float32)
        + b_neo_ref[...])                                             # (P, 1)
    h = (jnp.dot(hu_ref[...], wd1_u_ref[...], preferred_element_type=jnp.float32)
         + jnp.dot(hv_ref[...], wd1_v_ref[...], preferred_element_type=jnp.float32)
         + neo * wd1_s_ref[...]
         + bd1_ref[...])
    h = jnp.maximum(h, 0.0)
    out_ref[...] = (jnp.dot(h, wd2_ref[...], preferred_element_type=jnp.float32)
                    + bd2_ref[...])


def decode_call(h_u, h_v, h_nu, h_nv, params):
    ppad, hp = h_u.shape
    lp = params["wd2"].shape[1]
    inputs = [h_u, h_v, h_nu, h_nv,
              params["w_neo"], params["b_neo"],
              params["wd1_u"], params["wd1_v"], params["wd1_s"], params["bd1"],
              params["wd2"], params["bd2"]]
    cost = pl.CostEstimate(
        flops=int(2 * ppad * hp * (2 * hp + lp + 1)),
        transcendentals=int(ppad),
        bytes_accessed=int(4 * ppad * (4 * hp + lp) + 4 * hp * (2 * hp + 1 + lp)))
    return pl.pallas_call(
        decode_kernel,
        out_shape=jax.ShapeDtypeStruct((ppad, lp), jnp.float32),
        in_specs=_vmem_specs(len(inputs)),
        out_specs=pl.BlockSpec(memory_space=pltpu.MemorySpace.VMEM),
        cost_estimate=cost,
    )(*inputs)


# --------------------------------------------------------------------------
# JAX glue: dense graph operators + deterministic parameter init (zero-padded
# to 128-lane hidden width; padding is exact since padded columns stay zero).
# --------------------------------------------------------------------------
def init_params(key, c_in, h, hp, logits_pad=128):
    keys = iter(jax.random.split(key, 64))

    def w(shape, scale=0.1):
        return jax.random.normal(next(keys), shape, jnp.float32) * scale

    def pad2(a, r, c):
        return jnp.pad(a, ((0, r - a.shape[0]), (0, c - a.shape[1])))

    def layer(cin, cin_p):
        return dict(
            w_gcn=pad2(w((cin, h)), cin_p, hp), b_gcn=pad2(w((1, h)), 1, hp),
            w_sage_l=pad2(w((cin, h)), cin_p, hp), b_sage_l=pad2(w((1, h)), 1, hp),
            w_sage_r=pad2(w((cin, h)), cin_p, hp),
            w_gin1=pad2(w((cin, h)), cin_p, hp), b_gin1=pad2(w((1, h)), 1, hp),
            w_gin2=pad2(w((h, h)), hp, hp), b_gin2=pad2(w((1, h)), 1, hp),
            w_gat=pad2(w((cin, h)), cin_p, hp),
            att_src=pad2(w((1, h)), 1, hp), att_dst=pad2(w((1, h)), 1, hp),
            b_gat=pad2(w((1, h)), 1, hp),
        )

    wd1 = w((2 * h + 1, h))
    return dict(
        layer1=layer(c_in, c_in),
        layer2=layer(h, hp),
        layer3=layer(h, hp),
        w_neo=pad2(w((h, 1)), hp, 1), b_neo=w((1, 1)),
        wd1_u=pad2(wd1[:h], hp, hp), wd1_v=pad2(wd1[h:2 * h], hp, hp),
        wd1_s=pad2(wd1[2 * h:], 1, hp), bd1=pad2(w((1, h)), 1, hp),
        wd2=pad2(w((h, 2)), hp, logits_pad), bd2=pad2(w((1, 2)), 1, logits_pad),
    )


def neognn_forward(params, x, edge_index, edge_label_index, *, tile_rows=16):
    n_real = x.shape[0]
    tm = tile_rows
    npad = _round_up(max(n_real, tm), tm)
    x = jnp.pad(x, ((0, npad - n_real), (0, 0)))

    # dense graph operators (exact for simple graphs: no duplicate edges / self loops)
    src, dst = edge_index
    A = jnp.zeros((npad, npad), jnp.float32).at[src, dst].add(1.0)
    A = jnp.minimum(A, 1.0)   # TODO(synk): multi-edge weighting of PyG convs is dedup'd here
    AT = A.T
    in_deg = jnp.sum(AT, axis=1)
    dinv = (1.0 / jnp.sqrt(in_deg + 1.0))[:, None]                        # GCN self-loop norm
    iideg = jnp.where(in_deg > 0, 1.0 / jnp.maximum(in_deg, 1.0), 0.0)[:, None]
    out_deg = jnp.sum(A, axis=1)
    out_mean = jnp.where(out_deg[:, None] > 0,
                         A / jnp.maximum(out_deg, 1.0)[:, None], 0.0)
    adjT_bf = AT.astype(jnp.bfloat16)
    out_mean_bf = out_mean.astype(jnp.bfloat16)

    # encode: 3 NeoGNN layers
    z = neognn_layer(x, adjT_bf, dinv, iideg, params["layer1"], tile_rows=tm)
    z = neognn_layer(z, adjT_bf, dinv, iideg, params["layer2"], tile_rows=tm)
    z = neognn_layer(z, adjT_bf, dinv, iideg, params["layer3"], tile_rows=tm)

    # neighbor-mean embeddings once for all nodes, then gather rows per pair
    h_nbr = neighbor_mean(out_mean_bf, z, tile_rows=tm)

    lsrc, ldst = edge_label_index
    p_real = lsrc.shape[0]
    ppad = _round_up(max(p_real, 8), 8)
    pad_idx = jnp.zeros((ppad - p_real,), lsrc.dtype)
    lsrc_p = jnp.concatenate([lsrc, pad_idx])
    ldst_p = jnp.concatenate([ldst, pad_idx])

    h_u, h_v = z[lsrc_p], z[ldst_p]            # row gathers stay in XLA
    h_nu, h_nv = h_nbr[lsrc_p], h_nbr[ldst_p]

    logits_pad = decode_call(h_u, h_v, h_nu, h_nv, params)
    return logits_pad[:p_real, :2]


if __name__ == "__main__":
    key = jax.random.PRNGKey(0)
    N, C_IN, HIDDEN, P = 64, 8, 32, 16
    HP = 128        # hidden padded to one full 128-lane vreg width (exact zero-padding)
    TM = 16         # row tile (multiple of 16 for bf16 sublane packing) -> grid of 4

    k_x, k_p = jax.random.split(key)
    x = jax.random.normal(k_x, (N, C_IN), jnp.float32)

    # deterministic graph: ring + skip-3 edges (no self loops, no duplicates)
    base = jnp.arange(N, dtype=jnp.int32)
    edge_index = jnp.stack([
        jnp.concatenate([base, base]),
        jnp.concatenate([(base + 1) % N, (base + 3) % N]),
    ])                                                   # [2, 2N]

    lbl_src = jnp.arange(P, dtype=jnp.int32) % N
    lbl_dst = (jnp.arange(P, dtype=jnp.int32) * 5 + 2) % N
    edge_label_index = jnp.stack([lbl_src, lbl_dst])     # [2, P]

    params = init_params(k_p, C_IN, HIDDEN, HP)

    fwd = jax.jit(neognn_forward, static_argnames=("tile_rows",))
    logits = fwd(params, x, edge_index, edge_label_index, tile_rows=TM)
    logits = jax.block_until_ready(logits)
    assert logits.shape == (P, 2) and logits.dtype == jnp.float32
    assert bool(jnp.all(jnp.isfinite(logits)))
    print("KERNEL_OK")
</pallas_src>

<mosaic_0001>
module attributes {stable_mosaic.version = 11 : i64} {
  func.func private @main(%arg0: i32) attributes {dimension_semantics = [#tpu.dimension_semantics<core_parallel>], iteration_bounds = array<i64: 2>, tpu.core_type = #tpu.core_type<sc_scalar_subcore>, window_params = []} {
    return
  }
}

module attributes {stable_mosaic.version = 11 : i64} {
  func.func private @main(%arg0: i32) attributes {dimension_semantics = [#tpu.dimension_semantics<core_parallel>], iteration_bounds = array<i64: 2>, tpu.core_type = #tpu.core_type<sc_scalar_subcore>, window_params = []} {
    return
  }
}

module attributes {stable_mosaic.version = 11 : i64} {
  func.func @precompute_kernel(%arg0: i32, %arg1: memref<16x8xf32, #tpu.memory_space<vmem>>, %arg2: memref<16x1xf32, #tpu.memory_space<vmem>>, %arg3: memref<8x128xf32, #tpu.memory_space<vmem>>, %arg4: memref<8x128xf32, #tpu.memory_space<vmem>>, %arg5: memref<16x136xbf16, #tpu.memory_space<vmem>>, %arg6: memref<16x128xbf16, #tpu.memory_space<vmem>>) attributes {dimension_semantics = [#tpu.dimension_semantics<parallel>], iteration_bounds = array<i64: 4>, scalar_prefetch = 0 : i64, scratch_operands = 0 : i64, tpu.core_type = #tpu.core_type<tc>, window_params = [{transform_indices = @transform_0, window_bounds = array<i64: 16, 8>}, {transform_indices = @transform_1, window_bounds = array<i64: 16, 1>}, {pipeline_mode = #tpu.pipeline_mode<synchronous>, transform_indices = @transform_2, window_bounds = array<i64: 8, 128>}, {pipeline_mode = #tpu.pipeline_mode<synchronous>, transform_indices = @transform_3, window_bounds = array<i64: 8, 128>}, {transform_indices = @transform_4, window_bounds = array<i64: 16, 136>}, {transform_indices = @transform_5, window_bounds = array<i64: 16, 128>}]} {
    %c0 = arith.constant 0 : index
    %c0_0 = arith.constant 0 : index
    %0 = vector.load %arg1[%c0, %c0_0] : memref<16x8xf32, #tpu.memory_space<vmem>>, vector<16x8xf32>
    %c0_1 = arith.constant 0 : index
    %c0_2 = arith.constant 0 : index
    %1 = vector.load %arg3[%c0_1, %c0_2] : memref<8x128xf32, #tpu.memory_space<vmem>>, vector<8x128xf32>
    %cst = arith.constant dense<0.000000e+00> : vector<16x128xf32>
    %2 = tpu.matmul %0, %1, %cst {dimension_numbers = #tpu.dot_dimension_numbers<[1], [0], [0], [1], [0, 0, 1, 1], [], []>} : vector<16x8xf32>, vector<8x128xf32>, vector<16x128xf32> -> vector<16x128xf32>
    %c0_3 = arith.constant 0 : index
    %c0_4 = arith.constant 0 : index
    %3 = vector.load %arg4[%c0_3, %c0_4] : memref<8x128xf32, #tpu.memory_space<vmem>>, vector<8x128xf32>
    %cst_5 = arith.constant dense<0.000000e+00> : vector<16x128xf32>
    %4 = tpu.matmul %0, %3, %cst_5 {dimension_numbers = #tpu.dot_dimension_numbers<[1], [0], [0], [1], [0, 0, 1, 1], [], []>} : vector<16x8xf32>, vector<8x128xf32>, vector<16x128xf32> -> vector<16x128xf32>
    %c0_6 = arith.constant 0 : index
    %c0_7 = arith.constant 0 : index
    %5 = vector.load %arg2[%c0_6, %c0_7] : memref<16x1xf32, #tpu.memory_space<vmem>>, vector<16x1xf32>
    %6 = vector.broadcast %5 : vector<16x1xf32> to vector<16x128xf32>
    %7 = arith.mulf %6, %2 : vector<16x128xf32>
    %8 = tpu.concatenate %7, %0 in 1 : vector<16x128xf32>, vector<16x8xf32> -> vector<16x136xf32>
    %9 = arith.truncf %8 : vector<16x136xf32> to vector<16x136xbf16>
    %c0_8 = arith.constant 0 : index
    %c0_9 = arith.constant 0 : index
    %10 = vector.load %arg5[%c0_8, %c0_9] : memref<16x136xbf16, #tpu.memory_space<vmem>>, vector<16x136xbf16>
    tpu.vector_store %arg5[%c0_8, %c0_9], %9 {strides = array<i32>} : memref<16x136xbf16, #tpu.memory_space<vmem>>, vector<16x136xbf16>,
    %11 = arith.truncf %4 : vector<16x128xf32> to vector<16x128xbf16>
    %c0_10 = arith.constant 0 : index
    %c0_11 = arith.constant 0 : index
    %12 = vector.load %arg6[%c0_10, %c0_11] : memref<16x128xbf16, #tpu.memory_space<vmem>>, vector<16x128xbf16>
    tpu.vector_store %arg6[%c0_10, %c0_11], %11 {strides = array<i32>} : memref<16x128xbf16, #tpu.memory_space<vmem>>, vector<16x128xbf16>,
    return
  }
  func.func @transform_0(%arg0: i32) -> (i32, i32) {
    %c0_i32 = arith.constant 0 : i32
    %c0_i32_0 = arith.constant 0 : i32
    return %arg0, %c0_i32 : i32, i32
  }
  func.func @transform_1(%arg0: i32) -> (i32, i32) {
    %c0_i32 = arith.constant 0 : i32
    %c0_i32_0 = arith.constant 0 : i32
    return %arg0, %c0_i32 : i32, i32
  }
  func.func @transform_2(%arg0: i32) -> (i32, i32) {
    %c0_i32 = arith.constant 0 : i32
    %c0_i32_0 = arith.constant 0 : i32
    %c0_i32_1 = arith.constant 0 : i32
    return %c0_i32, %c0_i32_0 : i32, i32
  }
  func.func @transform_3(%arg0: i32) -> (i32, i32) {
    %c0_i32 = arith.constant 0 : i32
    %c0_i32_0 = arith.constant 0 : i32
    %c0_i32_1 = arith.constant 0 : i32
    return %c0_i32, %c0_i32_0 : i32, i32
  }
  func.func @transform_4(%arg0: i32) -> (i32, i32) {
    %c0_i32 = arith.constant 0 : i32
    %c0_i32_0 = arith.constant 0 : i32
    return %arg0, %c0_i32 : i32, i32
  }
  func.func @transform_5(%arg0: i32) -> (i32, i32) {
    %c0_i32 = arith.constant 0 : i32
    %c0_i32_0 = arith.constant 0 : i32
    return %arg0, %c0_i32 : i32, i32
  }
}

module attributes {stable_mosaic.version = 11 : i64} {
  func.func @precompute_kernel(%arg0: i32, %arg1: memref<16x128xf32, #tpu.memory_space<vmem>>, %arg2: memref<16x1xf32, #tpu.memory_space<vmem>>, %arg3: memref<128x128xf32, #tpu.memory_space<vmem>>, %arg4: memref<128x128xf32, #tpu.memory_space<vmem>>, %arg5: memref<16x256xbf16, #tpu.memory_space<vmem>>, %arg6: memref<16x128xbf16, #tpu.memory_space<vmem>>) attributes {dimension_semantics = [#tpu.dimension_semantics<parallel>], iteration_bounds = array<i64: 4>, scalar_prefetch = 0 : i64, scratch_operands = 0 : i64, tpu.core_type = #tpu.core_type<tc>, window_params = [{transform_indices = @transform_0, window_bounds = array<i64: 16, 128>}, {transform_indices = @transform_1, window_bounds = array<i64: 16, 1>}, {pipeline_mode = #tpu.pipeline_mode<synchronous>, transform_indices = @transform_2, window_bounds = array<i64: 128, 128>}, {pipeline_mode = #tpu.pipeline_mode<synchronous>, transform_indices = @transform_3, window_bounds = array<i64: 128, 128>}, {transform_indices = @transform_4, window_bounds = array<i64: 16, 256>}, {transform_indices = @transform_5, window_bounds = array<i64: 16, 128>}]} {
    %c0 = arith.constant 0 : index
    %c0_0 = arith.constant 0 : index
    %0 = vector.load %arg1[%c0, %c0_0] : memref<16x128xf32, #tpu.memory_space<vmem>>, vector<16x128xf32>
    %c0_1 = arith.constant 0 : index
    %c0_2 = arith.constant 0 : index
    %1 = vector.load %arg3[%c0_1, %c0_2] : memref<128x128xf32, #tpu.memory_space<vmem>>, vector<128x128xf32>
    %cst = arith.constant dense<0.000000e+00> : vector<16x128xf32>
    %2 = tpu.matmul %0, %1, %cst {dimension_numbers = #tpu.dot_dimension_numbers<[1], [0], [0], [1], [0, 0, 1, 1], [], []>} : vector<16x128xf32>, vector<128x128xf32>, vector<16x128xf32> -> vector<16x128xf32>
    %c0_3 = arith.constant 0 : index
    %c0_4 = arith.constant 0 : index
    %3 = vector.load %arg4[%c0_3, %c0_4] : memref<128x128xf32, #tpu.memory_space<vmem>>, vector<128x128xf32>
    %cst_5 = arith.constant dense<0.000000e+00> : vector<16x128xf32>
    %4 = tpu.matmul %0, %3, %cst_5 {dimension_numbers = #tpu.dot_dimension_numbers<[1], [0], [0], [1], [0, 0, 1, 1], [], []>} : vector<16x128xf32>, vector<128x128xf32>, vector<16x128xf32> -> vector<16x128xf32>
    %c0_6 = arith.constant 0 : index
    %c0_7 = arith.constant 0 : index
    %5 = vector.load %arg2[%c0_6, %c0_7] : memref<16x1xf32, #tpu.memory_space<vmem>>, vector<16x1xf32>
    %6 = vector.broadcast %5 : vector<16x1xf32> to vector<16x128xf32>
    %7 = arith.mulf %6, %2 : vector<16x128xf32>
    %8 = tpu.concatenate %7, %0 in 1 : vector<16x128xf32>, vector<16x128xf32> -> vector<16x256xf32>
    %9 = arith.truncf %8 : vector<16x256xf32> to vector<16x256xbf16>
    %c0_8 = arith.constant 0 : index
    %c0_9 = arith.constant 0 : index
    %10 = vector.load %arg5[%c0_8, %c0_9] : memref<16x256xbf16, #tpu.memory_space<vmem>>, vector<16x256xbf16>
    tpu.vector_store %arg5[%c0_8, %c0_9], %9 {strides = array<i32>} : memref<16x256xbf16, #tpu.memory_space<vmem>>, vector<16x256xbf16>,
    %11 = arith.truncf %4 : vector<16x128xf32> to vector<16x128xbf16>
    %c0_10 = arith.constant 0 : index
    %c0_11 = arith.constant 0 : index
    %12 = vector.load %arg6[%c0_10, %c0_11] : memref<16x128xbf16, #tpu.memory_space<vmem>>, vector<16x128xbf16>
    tpu.vector_store %arg6[%c0_10, %c0_11], %11 {strides = array<i32>} : memref<16x128xbf16, #tpu.memory_space<vmem>>, vector<16x128xbf16>,
    return
  }
  func.func @transform_0(%arg0: i32) -> (i32, i32) {
    %c0_i32 = arith.constant 0 : i32
    %c0_i32_0 = arith.constant 0 : i32
    return %arg0, %c0_i32 : i32, i32
  }
  func.func @transform_1(%arg0: i32) -> (i32, i32) {
    %c0_i32 = arith.constant 0 : i32
    %c0_i32_0 = arith.constant 0 : i32
    return %arg0, %c0_i32 : i32, i32
  }
  func.func @transform_2(%arg0: i32) -> (i32, i32) {
    %c0_i32 = arith.constant 0 : i32
    %c0_i32_0 = arith.constant 0 : i32
    %c0_i32_1 = arith.constant 0 : i32
    return %c0_i32, %c0_i32_0 : i32, i32
  }
  func.func @transform_3(%arg0: i32) -> (i32, i32) {
    %c0_i32 = arith.constant 0 : i32
    %c0_i32_0 = arith.constant 0 : i32
    %c0_i32_1 = arith.constant 0 : i32
    return %c0_i32, %c0_i32_0 : i32, i32
  }
  func.func @transform_4(%arg0: i32) -> (i32, i32) {
    %c0_i32 = arith.constant 0 : i32
    %c0_i32_0 = arith.constant 0 : i32
    return %arg0, %c0_i32 : i32, i32
  }
  func.func @transform_5(%arg0: i32) -> (i32, i32) {
    %c0_i32 = arith.constant 0 : i32
    %c0_i32_0 = arith.constant 0 : i32
    return %arg0, %c0_i32 : i32, i32
  }
}

module attributes {stable_mosaic.version = 11 : i64} {
  func.func @neognn_layer_kernel(%arg0: i32, %arg1: memref<16x64xbf16, #tpu.memory_space<vmem>>, %arg2: memref<64x136xbf16, #tpu.memory_space<vmem>>, %arg3: memref<64x128xbf16, #tpu.memory_space<vmem>>, %arg4: memref<16x8xf32, #tpu.memory_space<vmem>>, %arg5: memref<16x1xf32, #tpu.memory_space<vmem>>, %arg6: memref<16x1xf32, #tpu.memory_space<vmem>>, %arg7: memref<8x128xf32, #tpu.memory_space<vmem>>, %arg8: memref<1x128xf32, #tpu.memory_space<vmem>>, %arg9: memref<8x128xf32, #tpu.memory_space<vmem>>, %arg10: memref<1x128xf32, #tpu.memory_space<vmem>>, %arg11: memref<8x128xf32, #tpu.memory_space<vmem>>, %arg12: memref<8x128xf32, #tpu.memory_space<vmem>>, %arg13: memref<1x128xf32, #tpu.memory_space<vmem>>, %arg14: memref<128x128xf32, #tpu.memory_space<vmem>>, %arg15: memref<1x128xf32, #tpu.memory_space<vmem>>, %arg16: memref<1x128xf32, #tpu.memory_space<vmem>>, %arg17: memref<1x128xf32, #tpu.memory_space<vmem>>, %arg18: memref<1x128xf32, #tpu.memory_space<vmem>>, %arg19: memref<16x128xf32, #tpu.memory_space<vmem>>) attributes {dimension_semantics = [#tpu.dimension_semantics<parallel>], iteration_bounds = array<i64: 4>, scalar_prefetch = 0 : i64, scratch_operands = 0 : i64, tpu.core_type = #tpu.core_type<tc>, window_params = [{transform_indices = @transform_0, window_bounds = array<i64: 16, 64>}, {pipeline_mode = #tpu.pipeline_mode<synchronous>, transform_indices = @transform_1, window_bounds = array<i64: 64, 136>}, {pipeline_mode = #tpu.pipeline_mode<synchronous>, transform_indices = @transform_2, window_bounds = array<i64: 64, 128>}, {transform_indices = @transform_3, window_bounds = array<i64: 16, 8>}, {transform_indices = @transform_4, window_bounds = array<i64: 16, 1>}, {transform_indices = @transform_5, window_bounds = array<i64: 16, 1>}, {pipeline_mode = #tpu.pipeline_mode<synchronous>, transform_indices = @transform_6, window_bounds = array<i64: 8, 128>}, {pipeline_mode = #tpu.pipeline_mode<synchronous>, transform_indices = @transform_7, window_bounds = array<i64: 1, 128>}, {pipeline_mode = #tpu.pipeline_mode<synchronous>, transform_indices = @transform_8, window_bounds = array<i64: 8, 128>}, {pipeline_mode = #tpu.pipeline_mode<synchronous>, transform_indices = @transform_9, window_bounds = array<i64: 1, 128>}, {pipeline_mode = #tpu.pipeline_mode<synchronous>, transform_indices = @transform_10, window_bounds = array<i64: 8, 128>}, {pipeline_mode = #tpu.pipeline_mode<synchronous>, transform_indices = @transform_11, window_bounds = array<i64: 8, 128>}, {pipeline_mode = #tpu.pipeline_mode<synchronous>, transform_indices = @transform_12, window_bounds = array<i64: 1, 128>}, {pipeline_mode = #tpu.pipeline_mode<synchronous>, transform_indices = @transform_13, window_bounds = array<i64: 128, 128>}, {pipeline_mode = #tpu.pipeline_mode<synchronous>, transform_indices = @transform_14, window_bounds = array<i64: 1, 128>}, {pipeline_mode = #tpu.pipeline_mode<synchronous>, transform_indices = @transform_15, window_bounds = array<i64: 1, 128>}, {pipeline_mode = #tpu.pipeline_mode<synchronous>, transform_indices = @transform_16, window_bounds = array<i64: 1, 128>}, {pipeline_mode = #tpu.pipeline_mode<synchronous>, transform_indices = @transform_17, window_bounds = array<i64: 1, 128>}, {transform_indices = @transform_18, window_bounds = array<i64: 16, 128>}]} {
    %c0 = arith.constant 0 : index
    %c0_0 = arith.constant 0 : index
    %0 = vector.load %arg1[%c0, %c0_0] : memref<16x64xbf16, #tpu.memory_space<vmem>>, vector<16x64xbf16>
    %c0_1 = arith.constant 0 : index
    %c0_2 = arith.constant 0 : index
    %1 = vector.load %arg4[%c0_1, %c0_2] : memref<16x8xf32, #tpu.memory_space<vmem>>, vector<16x8xf32>
    %c0_3 = arith.constant 0 : index
    %c0_4 = arith.constant 0 : index
    %2 = vector.load %arg5[%c0_3, %c0_4] : memref<16x1xf32, #tpu.memory_space<vmem>>, vector<16x1xf32>
    %c0_5 = arith.constant 0 : index
    %c0_6 = arith.constant 0 : index
    %3 = vector.load %arg2[%c0_5, %c0_6] : memref<64x136xbf16, #tpu.memory_space<vmem>>, vector<64x136xbf16>
    %cst = arith.constant dense<0.000000e+00> : vector<16x136xf32>
    %4 = tpu.matmul %0, %3, %cst {dimension_numbers = #tpu.dot_dimension_numbers<[1], [0], [0], [1], [0, 0, 1, 1], [], []>} : vector<16x64xbf16>, vector<64x136xbf16>, vector<16x136xf32> -> vector<16x136xf32>
    %5 = vector.extract_strided_slice %4 {offsets = [0, 0], sizes = [16, 128], strides = [1, 1]} : vector<16x136xf32> to vector<16x128xf32>
    %6 = vector.extract_strided_slice %4 {offsets = [0, 128], sizes = [16, 8], strides = [1, 1]} : vector<16x136xf32> to vector<16x8xf32>
    %c0_7 = arith.constant 0 : index
    %c0_8 = arith.constant 0 : index
    %7 = vector.load %arg7[%c0_7, %c0_8] : memref<8x128xf32, #tpu.memory_space<vmem>>, vector<8x128xf32>
    %cst_9 = arith.constant dense<0.000000e+00> : vector<16x128xf32>
    %8 = tpu.matmul %1, %7, %cst_9 {dimension_numbers = #tpu.dot_dimension_numbers<[1], [0], [0], [1], [0, 0, 1, 1], [], []>} : vector<16x8xf32>, vector<8x128xf32>, vector<16x128xf32> -> vector<16x128xf32>
    %9 = vector.broadcast %2 : vector<16x1xf32> to vector<16x128xf32>
    %10 = arith.mulf %9, %8 : vector<16x128xf32>
    %11 = arith.addf %5, %10 : vector<16x128xf32>
    %12 = vector.broadcast %2 : vector<16x1xf32> to vector<16x128xf32>
    %13 = arith.mulf %12, %11 : vector<16x128xf32>
    %c0_10 = arith.constant 0 : index
    %c0_11 = arith.constant 0 : index
    %14 = vector.load %arg8[%c0_10, %c0_11] : memref<1x128xf32, #tpu.memory_space<vmem>>, vector<1x128xf32>
    %15 = vector.broadcast %14 : vector<1x128xf32> to vector<16x128xf32>
    %16 = arith.addf %13, %15 : vector<16x128xf32>
    %c0_12 = arith.constant 0 : index
    %c0_13 = arith.constant 0 : index
    %17 = vector.load %arg6[%c0_12, %c0_13] : memref<16x1xf32, #tpu.memory_space<vmem>>, vector<16x1xf32>
    %18 = vector.broadcast %17 : vector<16x1xf32> to vector<16x8xf32>
    %19 = arith.mulf %6, %18 : vector<16x8xf32>
    %c0_14 = arith.constant 0 : index
    %c0_15 = arith.constant 0 : index
    %20 = vector.load %arg9[%c0_14, %c0_15] : memref<8x128xf32, #tpu.memory_space<vmem>>, vector<8x128xf32>
    %cst_16 = arith.constant dense<0.000000e+00> : vector<16x128xf32>
    %21 = tpu.matmul %19, %20, %cst_16 {dimension_numbers = #tpu.dot_dimension_numbers<[1], [0], [0], [1], [0, 0, 1, 1], [], []>} : vector<16x8xf32>, vector<8x128xf32>, vector<16x128xf32> -> vector<16x128xf32>
    %c0_17 = arith.constant 0 : index
    %c0_18 = arith.constant 0 : index
    %22 = vector.load %arg10[%c0_17, %c0_18] : memref<1x128xf32, #tpu.memory_space<vmem>>, vector<1x128xf32>
    %23 = vector.broadcast %22 : vector<1x128xf32> to vector<16x128xf32>
    %24 = arith.addf %21, %23 : vector<16x128xf32>
    %c0_19 = arith.constant 0 : index
    %c0_20 = arith.constant 0 : index
    %25 = vector.load %arg11[%c0_19, %c0_20] : memref<8x128xf32, #tpu.memory_space<vmem>>, vector<8x128xf32>
    %cst_21 = arith.constant dense<0.000000e+00> : vector<16x128xf32>
    %26 = tpu.matmul %1, %25, %cst_21 {dimension_numbers = #tpu.dot_dimension_numbers<[1], [0], [0], [1], [0, 0, 1, 1], [], []>} : vector<16x8xf32>, vector<8x128xf32>, vector<16x128xf32> -> vector<16x128xf32>
    %27 = arith.addf %24, %26 : vector<16x128xf32>
    %28 = arith.addf %1, %6 : vector<16x8xf32>
    %c0_22 = arith.constant 0 : index
    %c0_23 = arith.constant 0 : index
    %29 = vector.load %arg12[%c0_22, %c0_23] : memref<8x128xf32, #tpu.memory_space<vmem>>, vector<8x128xf32>
    %cst_24 = arith.constant dense<0.000000e+00> : vector<16x128xf32>
    %30 = tpu.matmul %28, %29, %cst_24 {dimension_numbers = #tpu.dot_dimension_numbers<[1], [0], [0], [1], [0, 0, 1, 1], [], []>} : vector<16x8xf32>, vector<8x128xf32>, vector<16x128xf32> -> vector<16x128xf32>
    %c0_25 = arith.constant 0 : index
    %c0_26 = arith.constant 0 : index
    %31 = vector.load %arg13[%c0_25, %c0_26] : memref<1x128xf32, #tpu.memory_space<vmem>>, vector<1x128xf32>
    %32 = vector.broadcast %31 : vector<1x128xf32> to vector<16x128xf32>
    %33 = arith.addf %30, %32 : vector<16x128xf32>
    %cst_27 = arith.constant 0.000000e+00 : f32
    %34 = vector.broadcast %cst_27 : f32 to vector<16x128xf32>
    %35 = arith.maximumf %33, %34 : vector<16x128xf32>
    %c0_28 = arith.constant 0 : index
    %c0_29 = arith.constant 0 : index
    %36 = vector.load %arg14[%c0_28, %c0_29] : memref<128x128xf32, #tpu.memory_space<vmem>>, vector<128x128xf32>
    %cst_30 = arith.constant dense<0.000000e+00> : vector<16x128xf32>
    %37 = tpu.matmul %35, %36, %cst_30 {dimension_numbers = #tpu.dot_dimension_numbers<[1], [0], [0], [1], [0, 0, 1, 1], [], []>} : vector<16x128xf32>, vector<128x128xf32>, vector<16x128xf32> -> vector<16x128xf32>
    %c0_31 = arith.constant 0 : index
    %c0_32 = arith.constant 0 : index
    %38 = vector.load %arg15[%c0_31, %c0_32] : memref<1x128xf32, #tpu.memory_space<vmem>>, vector<1x128xf32>
    %39 = vector.broadcast %38 : vector<1x128xf32> to vector<16x128xf32>
    %40 = arith.addf %37, %39 : vector<16x128xf32>
    %c0_33 = arith.constant 0 : index
    %c0_34 = arith.constant 0 : index
    %41 = vector.load %arg3[%c0_33, %c0_34] : memref<64x128xbf16, #tpu.memory_space<vmem>>, vector<64x128xbf16>
    %c16_i32 = arith.constant 16 : i32
    %42 = arith.muli %arg0, %c16_i32 : i32
    %43 = tpu.assume_multiple %42, 16 : i32
    %44 = arith.index_cast %43 : i32 to index
    %c0_35 = arith.constant 0 : index
    %45 = vector.load %arg3[%44, %c0_35] : memref<64x128xbf16, #tpu.memory_space<vmem>>, vector<16x128xbf16>
    %46 = arith.extf %45 : vector<16x128xbf16> to vector<16x128xf32>
    %c0_36 = arith.constant 0 : index
    %c0_37 = arith.constant 0 : index
    %47 = vector.load %arg17[%c0_36, %c0_37] : memref<1x128xf32, #tpu.memory_space<vmem>>, vector<1x128xf32>
    %48 = vector.broadcast %47 : vector<1x128xf32> to vector<16x128xf32>
    %49 = arith.mulf %46, %48 : vector<16x128xf32>
    %cst_38 = arith.constant dense<0.000000e+00> : vector<16xf32>
    %50 = vector.multi_reduction <add>, %49, %cst_38 [1] : vector<16x128xf32> to vector<16xf32>
    %51 = vector.shape_cast %50 : vector<16xf32> to vector<16x1xf32>
    %c0_39 = arith.constant 0 : index
    %c0_40 = arith.constant 0 : index
    %52 = vector.load %arg16[%c0_39, %c0_40] : memref<1x128xf32, #tpu.memory_space<vmem>>, vector<1x128xf32>
    %53 = arith.truncf %52 : vector<1x128xf32> to vector<1x128xbf16>
    %cst_41 = arith.constant dense<0.000000e+00> : vector<1x64xf32>
    %54 = tpu.matmul %53, %41, %cst_41 {dimension_numbers = #tpu.dot_dimension_numbers<[1], [1], [0], [0], [0, 0, 1, 0], [], []>} : vector<1x128xbf16>, vector<64x128xbf16>, vector<1x64xf32> -> vector<1x64xf32>
    %55 = vector.broadcast %51 : vector<16x1xf32> to vector<16x64xf32>
    %56 = vector.broadcast %54 : vector<1x64xf32> to vector<16x64xf32>
    %57 = arith.addf %55, %56 : vector<16x64xf32>
    %cst_42 = arith.constant 0.000000e+00 : f32
    %58 = vector.broadcast %cst_42 : f32 to vector<16x64xf32>
    %59 = arith.cmpf ogt, %57, %58 : vector<16x64xf32>
    %cst_43 = arith.constant 2.000000e-01 : f32
    %60 = vector.broadcast %cst_43 : f32 to vector<16x64xf32>
    %61 = arith.mulf %60, %57 : vector<16x64xf32>
    %62 = arith.select %59, %57, %61 : vector<16x64xi1>, vector<16x64xf32>
    %63 = tpu.iota {dimensions = array<i32: 1>} : vector<16x64xi32>
    %64 = tpu.iota {dimensions = array<i32: 0>} : vector<16x64xi32>
    %65 = vector.broadcast %43 : i32 to vector<16x64xi32>
    %66 = arith.addi %65, %64 : vector<16x64xi32>
    %cst_44 = arith.constant 0.000000e+00 : bf16
    %67 = vector.broadcast %cst_44 : bf16 to vector<16x64xbf16>
    %68 = arith.cmpf ogt, %0, %67 : vector<16x64xbf16>
    %69 = arith.cmpi eq, %63, %66 : vector<16x64xi32>
    %70 = arith.ori %68, %69 : vector<16x64xi1>
    %cst_45 = arith.constant -1.000000e+30 : f32
    %71 = vector.broadcast %cst_45 : f32 to vector<16x64xf32>
    %72 = arith.select %70, %62, %71 : vector<16x64xi1>, vector<16x64xf32>
    %cst_46 = arith.constant dense<0xFF800000> : vector<16xf32>
    %73 = vector.multi_reduction <maximumf>, %72, %cst_46 [1] : vector<16x64xf32> to vector<16xf32>
    %74 = vector.shape_cast %73 : vector<16xf32> to vector<16x1xf32>
    %75 = vector.broadcast %74 : vector<16x1xf32> to vector<16x64xf32>
    %76 = arith.subf %72, %75 : vector<16x64xf32>
    %77 = math.exp %76 : vector<16x64xf32>
    %cst_47 = arith.constant dense<0.000000e+00> : vector<16xf32>
    %78 = vector.multi_reduction <add>, %77, %cst_47 [1] : vector<16x64xf32> to vector<16xf32>
    %79 = vector.shape_cast %78 : vector<16xf32> to vector<16x1xf32>
    %80 = tpu.reciprocal %79 {approx = true} : vector<16x1xf32> -> vector<16x1xf32>
    %81 = vector.broadcast %80 : vector<16x1xf32> to vector<16x64xf32>
    %82 = arith.mulf %77, %81 : vector<16x64xf32>
    %83 = arith.truncf %82 : vector<16x64xf32> to vector<16x64xbf16>
    %cst_48 = arith.constant dense<0.000000e+00> : vector<16x128xf32>
    %84 = tpu.matmul %83, %41, %cst_48 {dimension_numbers = #tpu.dot_dimension_numbers<[1], [0], [0], [1], [0, 0, 1, 1], [], []>} : vector<16x64xbf16>, vector<64x128xbf16>, vector<16x128xf32> -> vector<16x128xf32>
    %c0_49 = arith.constant 0 : index
    %c0_50 = arith.constant 0 : index
    %85 = vector.load %arg18[%c0_49, %c0_50] : memref<1x128xf32, #tpu.memory_space<vmem>>, vector<1x128xf32>
    %86 = vector.broadcast %85 : vector<1x128xf32> to vector<16x128xf32>
    %87 = arith.addf %84, %86 : vector<16x128xf32>
    %88 = arith.addf %16, %27 : vector<16x128xf32>
    %89 = arith.addf %88, %40 : vector<16x128xf32>
    %90 = arith.addf %89, %87 : vector<16x128xf32>
    %cst_51 = arith.constant 0.000000e+00 : f32
    %91 = vector.broadcast %cst_51 : f32 to vector<16x128xf32>
    %92 = arith.maximumf %90, %91 : vector<16x128xf32>
    %c0_52 = arith.constant 0 : index
    %c0_53 = arith.constant 0 : index
    %93 = vector.load %arg19[%c0_52, %c0_53] : memref<16x128xf32, #tpu.memory_space<vmem>>, vector<16x128xf32>
    tpu.vector_store %arg19[%c0_52, %c0_53], %92 {strides = array<i32>} : memref<16x128xf32, #tpu.memory_space<vmem>>, vector<16x128xf32>,
    return
  }
  func.func @transform_0(%arg0: i32) -> (i32, i32) {
    %c0_i32 = arith.constant 0 : i32
    %c0_i32_0 = arith.constant 0 : i32
    return %arg0, %c0_i32 : i32, i32
  }
  func.func @transform_1(%arg0: i32) -> (i32, i32) {
    %c0_i32 = arith.constant 0 : i32
    %c0_i32_0 = arith.constant 0 : i32
    %c0_i32_1 = arith.constant 0 : i32
    return %c0_i32, %c0_i32_0 : i32, i32
  }
  func.func @transform_2(%arg0: i32) -> (i32, i32) {
    %c0_i32 = arith.constant 0 : i32
    %c0_i32_0 = arith.constant 0 : i32
    %c0_i32_1 = arith.constant 0 : i32
    return %c0_i32, %c0_i32_0 : i32, i32
  }
  func.func @transform_3(%arg0: i32) -> (i32, i32) {
    %c0_i32 = arith.constant 0 : i32
    %c0_i32_0 = arith.constant 0 : i32
    return %arg0, %c0_i32 : i32, i32
  }
  func.func @transform_4(%arg0: i32) -> (i32, i32) {
    %c0_i32 = arith.constant 0 : i32
    %c0_i32_0 = arith.constant 0 : i32
    return %arg0, %c0_i32 : i32, i32
  }
  func.func @transform_5(%arg0: i32) -> (i32, i32) {
    %c0_i32 = arith.constant 0 : i32
    %c0_i32_0 = arith.constant 0 : i32
    return %arg0, %c0_i32 : i32, i32
  }
  func.func @transform_6(%arg0: i32) -> (i32, i32) {
    %c0_i32 = arith.constant 0 : i32
    %c0_i32_0 = arith.constant 0 : i32
    %c0_i32_1 = arith.constant 0 : i32
    return %c0_i32, %c0_i32_0 : i32, i32
  }
  func.func @transform_7(%arg0: i32) -> (i32, i32) {
    %c0_i32 = arith.constant 0 : i32
    %c0_i32_0 = arith.constant 0 : i32
    %c0_i32_1 = arith.constant 0 : i32
    return %c0_i32, %c0_i32_0 : i32, i32
  }
  func.func @transform_8(%arg0: i32) -> (i32, i32) {
    %c0_i32 = arith.constant 0 : i32
    %c0_i32_0 = arith.constant 0 : i32
    %c0_i32_1 = arith.constant 0 : i32
    return %c0_i32, %c0_i32_0 : i32, i32
  }
  func.func @transform_9(%arg0: i32) -> (i32, i32) {
    %c0_i32 = arith.constant 0 : i32
    %c0_i32_0 = arith.constant 0 : i32
    %c0_i32_1 = arith.constant 0 : i32
    return %c0_i32, %c0_i32_0 : i32, i32
  }
  func.func @transform_10(%arg0: i32) -> (i32, i32) {
    %c0_i32 = arith.constant 0 : i32
    %c0_i32_0 = arith.constant 0 : i32
    %c0_i32_1 = arith.constant 0 : i32
    return %c0_i32, %c0_i32_0 : i32, i32
  }
  func.func @transform_11(%arg0: i32) -> (i32, i32) {
    %c0_i32 = arith.constant 0 : i32
    %c0_i32_0 = arith.constant 0 : i32
    %c0_i32_1 = arith.constant 0 : i32
    return %c0_i32, %c0_i32_0 : i32, i32
  }
  func.func @transform_12(%arg0: i32) -> (i32, i32) {
    %c0_i32 = arith.constant 0 : i32
    %c0_i32_0 = arith.constant 0 : i32
    %c0_i32_1 = arith.constant 0 : i32
    return %c0_i32, %c0_i32_0 : i32, i32
  }
  func.func @transform_13(%arg0: i32) -> (i32, i32) {
    %c0_i32 = arith.constant 0 : i32
    %c0_i32_0 = arith.constant 0 : i32
    %c0_i32_1 = arith.constant 0 : i32
    return %c0_i32, %c0_i32_0 : i32, i32
  }
  func.func @transform_14(%arg0: i32) -> (i32, i32) {
    %c0_i32 = arith.constant 0 : i32
    %c0_i32_0 = arith.constant 0 : i32
    %c0_i32_1 = arith.constant 0 : i32
    return %c0_i32, %c0_i32_0 : i32, i32
  }
  func.func @transform_15(%arg0: i32) -> (i32, i32) {
    %c0_i32 = arith.constant 0 : i32
    %c0_i32_0 = arith.constant 0 : i32
    %c0_i32_1 = arith.constant 0 : i32
    return %c0_i32, %c0_i32_0 : i32, i32
  }
  func.func @transform_16(%arg0: i32) -> (i32, i32) {
    %c0_i32 = arith.constant 0 : i32
    %c0_i32_0 = arith.constant 0 : i32
    %c0_i32_1 = arith.constant 0 : i32
    return %c0_i32, %c0_i32_0 : i32, i32
  }
  func.func @transform_17(%arg0: i32) -> (i32, i32) {
    %c0_i32 = arith.constant 0 : i32
    %c0_i32_0 = arith.constant 0 : i32
    %c0_i32_1 = arith.constant 0 : i32
    return %c0_i32, %c0_i32_0 : i32, i32
  }
  func.func @transform_18(%arg0: i32) -> (i32, i32) {
    %c0_i32 = arith.constant 0 : i32
    %c0_i32_0 = arith.constant 0 : i32
    return %arg0, %c0_i32 : i32, i32
  }
}

module attributes {stable_mosaic.version = 11 : i64} {
  func.func @neognn_layer_kernel(%arg0: i32, %arg1: memref<16x64xbf16, #tpu.memory_space<vmem>>, %arg2: memref<64x256xbf16, #tpu.memory_space<vmem>>, %arg3: memref<64x128xbf16, #tpu.memory_space<vmem>>, %arg4: memref<16x128xf32, #tpu.memory_space<vmem>>, %arg5: memref<16x1xf32, #tpu.memory_space<vmem>>, %arg6: memref<16x1xf32, #tpu.memory_space<vmem>>, %arg7: memref<128x128xf32, #tpu.memory_space<vmem>>, %arg8: memref<1x128xf32, #tpu.memory_space<vmem>>, %arg9: memref<128x128xf32, #tpu.memory_space<vmem>>, %arg10: memref<1x128xf32, #tpu.memory_space<vmem>>, %arg11: memref<128x128xf32, #tpu.memory_space<vmem>>, %arg12: memref<128x128xf32, #tpu.memory_space<vmem>>, %arg13: memref<1x128xf32, #tpu.memory_space<vmem>>, %arg14: memref<128x128xf32, #tpu.memory_space<vmem>>, %arg15: memref<1x128xf32, #tpu.memory_space<vmem>>, %arg16: memref<1x128xf32, #tpu.memory_space<vmem>>, %arg17: memref<1x128xf32, #tpu.memory_space<vmem>>, %arg18: memref<1x128xf32, #tpu.memory_space<vmem>>, %arg19: memref<16x128xf32, #tpu.memory_space<vmem>>) attributes {dimension_semantics = [#tpu.dimension_semantics<parallel>], iteration_bounds = array<i64: 4>, scalar_prefetch = 0 : i64, scratch_operands = 0 : i64, tpu.core_type = #tpu.core_type<tc>, window_params = [{transform_indices = @transform_0, window_bounds = array<i64: 16, 64>}, {pipeline_mode = #tpu.pipeline_mode<synchronous>, transform_indices = @transform_1, window_bounds = array<i64: 64, 256>}, {pipeline_mode = #tpu.pipeline_mode<synchronous>, transform_indices = @transform_2, window_bounds = array<i64: 64, 128>}, {transform_indices = @transform_3, window_bounds = array<i64: 16, 128>}, {transform_indices = @transform_4, window_bounds = array<i64: 16, 1>}, {transform_indices = @transform_5, window_bounds = array<i64: 16, 1>}, {pipeline_mode = #tpu.pipeline_mode<synchronous>, transform_indices = @transform_6, window_bounds = array<i64: 128, 128>}, {pipeline_mode = #tpu.pipeline_mode<synchronous>, transform_indices = @transform_7, window_bounds = array<i64: 1, 128>}, {pipeline_mode = #tpu.pipeline_mode<synchronous>, transform_indices = @transform_8, window_bounds = array<i64: 128, 128>}, {pipeline_mode = #tpu.pipeline_mode<synchronous>, transform_indices = @transform_9, window_bounds = array<i64: 1, 128>}, {pipeline_mode = #tpu.pipeline_mode<synchronous>, transform_indices = @transform_10, window_bounds = array<i64: 128, 128>}, {pipeline_mode = #tpu.pipeline_mode<synchronous>, transform_indices = @transform_11, window_bounds = array<i64: 128, 128>}, {pipeline_mode = #tpu.pipeline_mode<synchronous>, transform_indices = @transform_12, window_bounds = array<i64: 1, 128>}, {pipeline_mode = #tpu.pipeline_mode<synchronous>, transform_indices = @transform_13, window_bounds = array<i64: 128, 128>}, {pipeline_mode = #tpu.pipeline_mode<synchronous>, transform_indices = @transform_14, window_bounds = array<i64: 1, 128>}, {pipeline_mode = #tpu.pipeline_mode<synchronous>, transform_indices = @transform_15, window_bounds = array<i64: 1, 128>}, {pipeline_mode = #tpu.pipeline_mode<synchronous>, transform_indices = @transform_16, window_bounds = array<i64: 1, 128>}, {pipeline_mode = #tpu.pipeline_mode<synchronous>, transform_indices = @transform_17, window_bounds = array<i64: 1, 128>}, {transform_indices = @transform_18, window_bounds = array<i64: 16, 128>}]} {
    %c0 = arith.constant 0 : index
    %c0_0 = arith.constant 0 : index
    %0 = vector.load %arg1[%c0, %c0_0] : memref<16x64xbf16, #tpu.memory_space<vmem>>, vector<16x64xbf16>
    %c0_1 = arith.constant 0 : index
    %c0_2 = arith.constant 0 : index
    %1 = vector.load %arg4[%c0_1, %c0_2] : memref<16x128xf32, #tpu.memory_space<vmem>>, vector<16x128xf32>
    %c0_3 = arith.constant 0 : index
    %c0_4 = arith.constant 0 : index
    %2 = vector.load %arg5[%c0_3, %c0_4] : memref<16x1xf32, #tpu.memory_space<vmem>>, vector<16x1xf32>
    %c0_5 = arith.constant 0 : index
    %c0_6 = arith.constant 0 : index
    %3 = vector.load %arg2[%c0_5, %c0_6] : memref<64x256xbf16, #tpu.memory_space<vmem>>, vector<64x256xbf16>
    %cst = arith.constant dense<0.000000e+00> : vector<16x256xf32>
    %4 = tpu.matmul %0, %3, %cst {dimension_numbers = #tpu.dot_dimension_numbers<[1], [0], [0], [1], [0, 0, 1, 1], [], []>} : vector<16x64xbf16>, vector<64x256xbf16>, vector<16x256xf32> -> vector<16x256xf32>
    %5 = vector.extract_strided_slice %4 {offsets = [0, 0], sizes = [16, 128], strides = [1, 1]} : vector<16x256xf32> to vector<16x128xf32>
    %6 = vector.extract_strided_slice %4 {offsets = [0, 128], sizes = [16, 128], strides = [1, 1]} : vector<16x256xf32> to vector<16x128xf32>
    %c0_7 = arith.constant 0 : index
    %c0_8 = arith.constant 0 : index
    %7 = vector.load %arg7[%c0_7, %c0_8] : memref<128x128xf32, #tpu.memory_space<vmem>>, vector<128x128xf32>
    %cst_9 = arith.constant dense<0.000000e+00> : vector<16x128xf32>
    %8 = tpu.matmul %1, %7, %cst_9 {dimension_numbers = #tpu.dot_dimension_numbers<[1], [0], [0], [1], [0, 0, 1, 1], [], []>} : vector<16x128xf32>, vector<128x128xf32>, vector<16x128xf32> -> vector<16x128xf32>
    %9 = vector.broadcast %2 : vector<16x1xf32> to vector<16x128xf32>
    %10 = arith.mulf %9, %8 : vector<16x128xf32>
    %11 = arith.addf %5, %10 : vector<16x128xf32>
    %12 = vector.broadcast %2 : vector<16x1xf32> to vector<16x128xf32>
    %13 = arith.mulf %12, %11 : vector<16x128xf32>
    %c0_10 = arith.constant 0 : index
    %c0_11 = arith.constant 0 : index
    %14 = vector.load %arg8[%c0_10, %c0_11] : memref<1x128xf32, #tpu.memory_space<vmem>>, vector<1x128xf32>
    %15 = vector.broadcast %14 : vector<1x128xf32> to vector<16x128xf32>
    %16 = arith.addf %13, %15 : vector<16x128xf32>
    %c0_12 = arith.constant 0 : index
    %c0_13 = arith.constant 0 : index
    %17 = vector.load %arg6[%c0_12, %c0_13] : memref<16x1xf32, #tpu.memory_space<vmem>>, vector<16x1xf32>
    %18 = vector.broadcast %17 : vector<16x1xf32> to vector<16x128xf32>
    %19 = arith.mulf %6, %18 : vector<16x128xf32>
    %c0_14 = arith.constant 0 : index
    %c0_15 = arith.constant 0 : index
    %20 = vector.load %arg9[%c0_14, %c0_15] : memref<128x128xf32, #tpu.memory_space<vmem>>, vector<128x128xf32>
    %cst_16 = arith.constant dense<0.000000e+00> : vector<16x128xf32>
    %21 = tpu.matmul %19, %20, %cst_16 {dimension_numbers = #tpu.dot_dimension_numbers<[1], [0], [0], [1], [0, 0, 1, 1], [], []>} : vector<16x128xf32>, vector<128x128xf32>, vector<16x128xf32> -> vector<16x128xf32>
    %c0_17 = arith.constant 0 : index
    %c0_18 = arith.constant 0 : index
    %22 = vector.load %arg10[%c0_17, %c0_18] : memref<1x128xf32, #tpu.memory_space<vmem>>, vector<1x128xf32>
    %23 = vector.broadcast %22 : vector<1x128xf32> to vector<16x128xf32>
    %24 = arith.addf %21, %23 : vector<16x128xf32>
    %c0_19 = arith.constant 0 : index
    %c0_20 = arith.constant 0 : index
    %25 = vector.load %arg11[%c0_19, %c0_20] : memref<128x128xf32, #tpu.memory_space<vmem>>, vector<128x128xf32>
    %cst_21 = arith.constant dense<0.000000e+00> : vector<16x128xf32>
    %26 = tpu.matmul %1, %25, %cst_21 {dimension_numbers = #tpu.dot_dimension_numbers<[1], [0], [0], [1], [0, 0, 1, 1], [], []>} : vector<16x128xf32>, vector<128x128xf32>, vector<16x128xf32> -> vector<16x128xf32>
    %27 = arith.addf %24, %26 : vector<16x128xf32>
    %28 = arith.addf %1, %6 : vector<16x128xf32>
    %c0_22 = arith.constant 0 : index
    %c0_23 = arith.constant 0 : index
    %29 = vector.load %arg12[%c0_22, %c0_23] : memref<128x128xf32, #tpu.memory_space<vmem>>, vector<128x128xf32>
    %cst_24 = arith.constant dense<0.000000e+00> : vector<16x128xf32>
    %30 = tpu.matmul %28, %29, %cst_24 {dimension_numbers = #tpu.dot_dimension_numbers<[1], [0], [0], [1], [0, 0, 1, 1], [], []>} : vector<16x128xf32>, vector<128x128xf32>, vector<16x128xf32> -> vector<16x128xf32>
    %c0_25 = arith.constant 0 : index
    %c0_26 = arith.constant 0 : index
    %31 = vector.load %arg13[%c0_25, %c0_26] : memref<1x128xf32, #tpu.memory_space<vmem>>, vector<1x128xf32>
    %32 = vector.broadcast %31 : vector<1x128xf32> to vector<16x128xf32>
    %33 = arith.addf %30, %32 : vector<16x128xf32>
    %cst_27 = arith.constant 0.000000e+00 : f32
    %34 = vector.broadcast %cst_27 : f32 to vector<16x128xf32>
    %35 = arith.maximumf %33, %34 : vector<16x128xf32>
    %c0_28 = arith.constant 0 : index
    %c0_29 = arith.constant 0 : index
    %36 = vector.load %arg14[%c0_28, %c0_29] : memref<128x128xf32, #tpu.memory_space<vmem>>, vector<128x128xf32>
    %cst_30 = arith.constant dense<0.000000e+00> : vector<16x128xf32>
    %37 = tpu.matmul %35, %36, %cst_30 {dimension_numbers = #tpu.dot_dimension_numbers<[1], [0], [0], [1], [0, 0, 1, 1], [], []>} : vector<16x128xf32>, vector<128x128xf32>, vector<16x128xf32> -> vector<16x128xf32>
    %c0_31 = arith.constant 0 : index
    %c0_32 = arith.constant 0 : index
    %38 = vector.load %arg15[%c0_31, %c0_32] : memref<1x128xf32, #tpu.memory_space<vmem>>, vector<1x128xf32>
    %39 = vector.broadcast %38 : vector<1x128xf32> to vector<16x128xf32>
    %40 = arith.addf %37, %39 : vector<16x128xf32>
    %c0_33 = arith.constant 0 : index
    %c0_34 = arith.constant 0 : index
    %41 = vector.load %arg3[%c0_33, %c0_34] : memref<64x128xbf16, #tpu.memory_space<vmem>>, vector<64x128xbf16>
    %c16_i32 = arith.constant 16 : i32
    %42 = arith.muli %arg0, %c16_i32 : i32
    %43 = tpu.assume_multiple %42, 16 : i32
    %44 = arith.index_cast %43 : i32 to index
    %c0_35 = arith.constant 0 : index
    %45 = vector.load %arg3[%44, %c0_35] : memref<64x128xbf16, #tpu.memory_space<vmem>>, vector<16x128xbf16>
    %46 = arith.extf %45 : vector<16x128xbf16> to vector<16x128xf32>
    %c0_36 = arith.constant 0 : index
    %c0_37 = arith.constant 0 : index
    %47 = vector.load %arg17[%c0_36, %c0_37] : memref<1x128xf32, #tpu.memory_space<vmem>>, vector<1x128xf32>
    %48 = vector.broadcast %47 : vector<1x128xf32> to vector<16x128xf32>
    %49 = arith.mulf %46, %48 : vector<16x128xf32>
    %cst_38 = arith.constant dense<0.000000e+00> : vector<16xf32>
    %50 = vector.multi_reduction <add>, %49, %cst_38 [1] : vector<16x128xf32> to vector<16xf32>
    %51 = vector.shape_cast %50 : vector<16xf32> to vector<16x1xf32>
    %c0_39 = arith.constant 0 : index
    %c0_40 = arith.constant 0 : index
    %52 = vector.load %arg16[%c0_39, %c0_40] : memref<1x128xf32, #tpu.memory_space<vmem>>, vector<1x128xf32>
    %53 = arith.truncf %52 : vector<1x128xf32> to vector<1x128xbf16>
    %cst_41 = arith.constant dense<0.000000e+00> : vector<1x64xf32>
    %54 = tpu.matmul %53, %41, %cst_41 {dimension_numbers = #tpu.dot_dimension_numbers<[1], [1], [0], [0], [0, 0, 1, 0], [], []>} : vector<1x128xbf16>, vector<64x128xbf16>, vector<1x64xf32> -> vector<1x64xf32>
    %55 = vector.broadcast %51 : vector<16x1xf32> to vector<16x64xf32>
    %56 = vector.broadcast %54 : vector<1x64xf32> to vector<16x64xf32>
    %57 = arith.addf %55, %56 : vector<16x64xf32>
    %cst_42 = arith.constant 0.000000e+00 : f32
    %58 = vector.broadcast %cst_42 : f32 to vector<16x64xf32>
    %59 = arith.cmpf ogt, %57, %58 : vector<16x64xf32>
    %cst_43 = arith.constant 2.000000e-01 : f32
    %60 = vector.broadcast %cst_43 : f32 to vector<16x64xf32>
    %61 = arith.mulf %60, %57 : vector<16x64xf32>
    %62 = arith.select %59, %57, %61 : vector<16x64xi1>, vector<16x64xf32>
    %63 = tpu.iota {dimensions = array<i32: 1>} : vector<16x64xi32>
    %64 = tpu.iota {dimensions = array<i32: 0>} : vector<16x64xi32>
    %65 = vector.broadcast %43 : i32 to vector<16x64xi32>
    %66 = arith.addi %65, %64 : vector<16x64xi32>
    %cst_44 = arith.constant 0.000000e+00 : bf16
    %67 = vector.broadcast %cst_44 : bf16 to vector<16x64xbf16>
    %68 = arith.cmpf ogt, %0, %67 : vector<16x64xbf16>
    %69 = arith.cmpi eq, %63, %66 : vector<16x64xi32>
    %70 = arith.ori %68, %69 : vector<16x64xi1>
    %cst_45 = arith.constant -1.000000e+30 : f32
    %71 = vector.broadcast %cst_45 : f32 to vector<16x64xf32>
    %72 = arith.select %70, %62, %71 : vector<16x64xi1>, vector<16x64xf32>
    %cst_46 = arith.constant dense<0xFF800000> : vector<16xf32>
    %73 = vector.multi_reduction <maximumf>, %72, %cst_46 [1] : vector<16x64xf32> to vector<16xf32>
    %74 = vector.shape_cast %73 : vector<16xf32> to vector<16x1xf32>
    %75 = vector.broadcast %74 : vector<16x1xf32> to vector<16x64xf32>
    %76 = arith.subf %72, %75 : vector<16x64xf32>
    %77 = math.exp %76 : vector<16x64xf32>
    %cst_47 = arith.constant dense<0.000000e+00> : vector<16xf32>
    %78 = vector.multi_reduction <add>, %77, %cst_47 [1] : vector<16x64xf32> to vector<16xf32>
    %79 = vector.shape_cast %78 : vector<16xf32> to vector<16x1xf32>
    %80 = tpu.reciprocal %79 {approx = true} : vector<16x1xf32> -> vector<16x1xf32>
    %81 = vector.broadcast %80 : vector<16x1xf32> to vector<16x64xf32>
    %82 = arith.mulf %77, %81 : vector<16x64xf32>
    %83 = arith.truncf %82 : vector<16x64xf32> to vector<16x64xbf16>
    %cst_48 = arith.constant dense<0.000000e+00> : vector<16x128xf32>
    %84 = tpu.matmul %83, %41, %cst_48 {dimension_numbers = #tpu.dot_dimension_numbers<[1], [0], [0], [1], [0, 0, 1, 1], [], []>} : vector<16x64xbf16>, vector<64x128xbf16>, vector<16x128xf32> -> vector<16x128xf32>
    %c0_49 = arith.constant 0 : index
    %c0_50 = arith.constant 0 : index
    %85 = vector.load %arg18[%c0_49, %c0_50] : memref<1x128xf32, #tpu.memory_space<vmem>>, vector<1x128xf32>
    %86 = vector.broadcast %85 : vector<1x128xf32> to vector<16x128xf32>
    %87 = arith.addf %84, %86 : vector<16x128xf32>
    %88 = arith.addf %16, %27 : vector<16x128xf32>
    %89 = arith.addf %88, %40 : vector<16x128xf32>
    %90 = arith.addf %89, %87 : vector<16x128xf32>
    %cst_51 = arith.constant 0.000000e+00 : f32
    %91 = vector.broadcast %cst_51 : f32 to vector<16x128xf32>
    %92 = arith.maximumf %90, %91 : vector<16x128xf32>
    %c0_52 = arith.constant 0 : index
    %c0_53 = arith.constant 0 : index
    %93 = vector.load %arg19[%c0_52, %c0_53] : memref<16x128xf32, #tpu.memory_space<vmem>>, vector<16x128xf32>
    tpu.vector_store %arg19[%c0_52, %c0_53], %92 {strides = array<i32>} : memref<16x128xf32, #tpu.memory_space<vmem>>, vector<16x128xf32>,
    return
  }
  func.func @transform_0(%arg0: i32) -> (i32, i32) {
    %c0_i32 = arith.constant 0 : i32
    %c0_i32_0 = arith.constant 0 : i32
    return %arg0, %c0_i32 : i32, i32
  }
  func.func @transform_1(%arg0: i32) -> (i32, i32) {
    %c0_i32 = arith.constant 0 : i32
    %c0_i32_0 = arith.constant 0 : i32
    %c0_i32_1 = arith.constant 0 : i32
    return %c0_i32, %c0_i32_0 : i32, i32
  }
  func.func @transform_2(%arg0: i32) -> (i32, i32) {
    %c0_i32 = arith.constant 0 : i32
    %c0_i32_0 = arith.constant 0 : i32
    %c0_i32_1 = arith.constant 0 : i32
    return %c0_i32, %c0_i32_0 : i32, i32
  }
  func.func @transform_3(%arg0: i32) -> (i32, i32) {
    %c0_i32 = arith.constant 0 : i32
    %c0_i32_0 = arith.constant 0 : i32
    return %arg0, %c0_i32 : i32, i32
  }
  func.func @transform_4(%arg0: i32) -> (i32, i32) {
    %c0_i32 = arith.constant 0 : i32
    %c0_i32_0 = arith.constant 0 : i32
    return %arg0, %c0_i32 : i32, i32
  }
  func.func @transform_5(%arg0: i32) -> (i32, i32) {
    %c0_i32 = arith.constant 0 : i32
    %c0_i32_0 = arith.constant 0 : i32
    return %arg0, %c0_i32 : i32, i32
  }
  func.func @transform_6(%arg0: i32) -> (i32, i32) {
    %c0_i32 = arith.constant 0 : i32
    %c0_i32_0 = arith.constant 0 : i32
    %c0_i32_1 = arith.constant 0 : i32
    return %c0_i32, %c0_i32_0 : i32, i32
  }
  func.func @transform_7(%arg0: i32) -> (i32, i32) {
    %c0_i32 = arith.constant 0 : i32
    %c0_i32_0 = arith.constant 0 : i32
    %c0_i32_1 = arith.constant 0 : i32
    return %c0_i32, %c0_i32_0 : i32, i32
  }
  func.func @transform_8(%arg0: i32) -> (i32, i32) {
    %c0_i32 = arith.constant 0 : i32
    %c0_i32_0 = arith.constant 0 : i32
    %c0_i32_1 = arith.constant 0 : i32
    return %c0_i32, %c0_i32_0 : i32, i32
  }
  func.func @transform_9(%arg0: i32) -> (i32, i32) {
    %c0_i32 = arith.constant 0 : i32
    %c0_i32_0 = arith.constant 0 : i32
    %c0_i32_1 = arith.constant 0 : i32
    return %c0_i32, %c0_i32_0 : i32, i32
  }
  func.func @transform_10(%arg0: i32) -> (i32, i32) {
    %c0_i32 = arith.constant 0 : i32
    %c0_i32_0 = arith.constant 0 : i32
    %c0_i32_1 = arith.constant 0 : i32
    return %c0_i32, %c0_i32_0 : i32, i32
  }
  func.func @transform_11(%arg0: i32) -> (i32, i32) {
    %c0_i32 = arith.constant 0 : i32
    %c0_i32_0 = arith.constant 0 : i32
    %c0_i32_1 = arith.constant 0 : i32
    return %c0_i32, %c0_i32_0 : i32, i32
  }
  func.func @transform_12(%arg0: i32) -> (i32, i32) {
    %c0_i32 = arith.constant 0 : i32
    %c0_i32_0 = arith.constant 0 : i32
    %c0_i32_1 = arith.constant 0 : i32
    return %c0_i32, %c0_i32_0 : i32, i32
  }
  func.func @transform_13(%arg0: i32) -> (i32, i32) {
    %c0_i32 = arith.constant 0 : i32
    %c0_i32_0 = arith.constant 0 : i32
    %c0_i32_1 = arith.constant 0 : i32
    return %c0_i32, %c0_i32_0 : i32, i32
  }
  func.func @transform_14(%arg0: i32) -> (i32, i32) {
    %c0_i32 = arith.constant 0 : i32
    %c0_i32_0 = arith.constant 0 : i32
    %c0_i32_1 = arith.constant 0 : i32
    return %c0_i32, %c0_i32_0 : i32, i32
  }
  func.func @transform_15(%arg0: i32) -> (i32, i32) {
    %c0_i32 = arith.constant 0 : i32
    %c0_i32_0 = arith.constant 0 : i32
    %c0_i32_1 = arith.constant 0 : i32
    return %c0_i32, %c0_i32_0 : i32, i32
  }
  func.func @transform_16(%arg0: i32) -> (i32, i32) {
    %c0_i32 = arith.constant 0 : i32
    %c0_i32_0 = arith.constant 0 : i32
    %c0_i32_1 = arith.constant 0 : i32
    return %c0_i32, %c0_i32_0 : i32, i32
  }
  func.func @transform_17(%arg0: i32) -> (i32, i32) {
    %c0_i32 = arith.constant 0 : i32
    %c0_i32_0 = arith.constant 0 : i32
    %c0_i32_1 = arith.constant 0 : i32
    return %c0_i32, %c0_i32_0 : i32, i32
  }
  func.func @transform_18(%arg0: i32) -> (i32, i32) {
    %c0_i32 = arith.constant 0 : i32
    %c0_i32_0 = arith.constant 0 : i32
    return %arg0, %c0_i32 : i32, i32
  }
}

module attributes {stable_mosaic.version = 11 : i64} {
  func.func @nmean_kernel(%arg0: i32, %arg1: memref<16x64xbf16, #tpu.memory_space<vmem>>, %arg2: memref<64x128xbf16, #tpu.memory_space<vmem>>, %arg3: memref<16x128xf32, #tpu.memory_space<vmem>>) attributes {dimension_semantics = [#tpu.dimension_semantics<parallel>], iteration_bounds = array<i64: 4>, scalar_prefetch = 0 : i64, scratch_operands = 0 : i64, tpu.core_type = #tpu.core_type<tc>, window_params = [{transform_indices = @transform_0, window_bounds = array<i64: 16, 64>}, {pipeline_mode = #tpu.pipeline_mode<synchronous>, transform_indices = @transform_1, window_bounds = array<i64: 64, 128>}, {transform_indices = @transform_2, window_bounds = array<i64: 16, 128>}]} {
    %c0 = arith.constant 0 : index
    %c0_0 = arith.constant 0 : index
    %0 = vector.load %arg1[%c0, %c0_0] : memref<16x64xbf16, #tpu.memory_space<vmem>>, vector<16x64xbf16>
    %c0_1 = arith.constant 0 : index
    %c0_2 = arith.constant 0 : index
    %1 = vector.load %arg2[%c0_1, %c0_2] : memref<64x128xbf16, #tpu.memory_space<vmem>>, vector<64x128xbf16>
    %cst = arith.constant dense<0.000000e+00> : vector<16x128xf32>
    %2 = tpu.matmul %0, %1, %cst {dimension_numbers = #tpu.dot_dimension_numbers<[1], [0], [0], [1], [0, 0, 1, 1], [], []>} : vector<16x64xbf16>, vector<64x128xbf16>, vector<16x128xf32> -> vector<16x128xf32>
    %c0_3 = arith.constant 0 : index
    %c0_4 = arith.constant 0 : index
    %3 = vector.load %arg3[%c0_3, %c0_4] : memref<16x128xf32, #tpu.memory_space<vmem>>, vector<16x128xf32>
    tpu.vector_store %arg3[%c0_3, %c0_4], %2 {strides = array<i32>} : memref<16x128xf32, #tpu.memory_space<vmem>>, vector<16x128xf32>,
    return
  }
  func.func @transform_0(%arg0: i32) -> (i32, i32) {
    %c0_i32 = arith.constant 0 : i32
    %c0_i32_0 = arith.constant 0 : i32
    return %arg0, %c0_i32 : i32, i32
  }
  func.func @transform_1(%arg0: i32) -> (i32, i32) {
    %c0_i32 = arith.constant 0 : i32
    %c0_i32_0 = arith.constant 0 : i32
    %c0_i32_1 = arith.constant 0 : i32
    return %c0_i32, %c0_i32_0 : i32, i32
  }
  func.func @transform_2(%arg0: i32) -> (i32, i32) {
    %c0_i32 = arith.constant 0 : i32
    %c0_i32_0 = arith.constant 0 : i32
    return %arg0, %c0_i32 : i32, i32
  }
}

module attributes {stable_mosaic.version = 11 : i64} {
  func.func @decode_kernel(%arg0: memref<16x128xf32, #tpu.memory_space<vmem>>, %arg1: memref<16x128xf32, #tpu.memory_space<vmem>>, %arg2: memref<16x128xf32, #tpu.memory_space<vmem>>, %arg3: memref<16x128xf32, #tpu.memory_space<vmem>>, %arg4: memref<128x1xf32, #tpu.memory_space<vmem>>, %arg5: memref<1x1xf32, #tpu.memory_space<vmem>>, %arg6: memref<128x128xf32, #tpu.memory_space<vmem>>, %arg7: memref<128x128xf32, #tpu.memory_space<vmem>>, %arg8: memref<1x128xf32, #tpu.memory_space<vmem>>, %arg9: memref<1x128xf32, #tpu.memory_space<vmem>>, %arg10: memref<128x128xf32, #tpu.memory_space<vmem>>, %arg11: memref<1x128xf32, #tpu.memory_space<vmem>>, %arg12: memref<16x128xf32, #tpu.memory_space<vmem>>) attributes {dimension_semantics = [], scalar_prefetch = 0 : i64, scratch_operands = 0 : i64, tpu.core_type = #tpu.core_type<tc>} {
    %c0 = arith.constant 0 : index
    %c0_0 = arith.constant 0 : index
    %0 = vector.load %arg2[%c0, %c0_0] : memref<16x128xf32, #tpu.memory_space<vmem>>, vector<16x128xf32>
    %c0_1 = arith.constant 0 : index
    %c0_2 = arith.constant 0 : index
    %1 = vector.load %arg3[%c0_1, %c0_2] : memref<16x128xf32, #tpu.memory_space<vmem>>, vector<16x128xf32>
    %2 = arith.mulf %0, %1 : vector<16x128xf32>
    %c0_3 = arith.constant 0 : index
    %c0_4 = arith.constant 0 : index
    %3 = vector.load %arg4[%c0_3, %c0_4] : memref<128x1xf32, #tpu.memory_space<vmem>>, vector<128x1xf32>
    %cst = arith.constant dense<0.000000e+00> : vector<16x1xf32>
    %4 = tpu.matmul %2, %3, %cst {dimension_numbers = #tpu.dot_dimension_numbers<[1], [0], [0], [1], [0, 0, 1, 1], [], []>} : vector<16x128xf32>, vector<128x1xf32>, vector<16x1xf32> -> vector<16x1xf32>
    %c0_5 = arith.constant 0 : index
    %c0_6 = arith.constant 0 : index
    %5 = vector.load %arg5[%c0_5, %c0_6] : memref<1x1xf32, #tpu.memory_space<vmem>>, vector<1x1xf32>
    %6 = vector.broadcast %5 : vector<1x1xf32> to vector<16x1xf32>
    %7 = arith.addf %4, %6 : vector<16x1xf32>
    %8 = arith.negf %7 : vector<16x1xf32>
    %9 = math.exp %8 : vector<16x1xf32>
    %cst_7 = arith.constant 1.000000e+00 : f32
    %10 = vector.broadcast %cst_7 : f32 to vector<16x1xf32>
    %11 = arith.addf %10, %9 : vector<16x1xf32>
    %12 = arith.divf %10, %11 : vector<16x1xf32>
    %c0_8 = arith.constant 0 : index
    %c0_9 = arith.constant 0 : index
    %13 = vector.load %arg0[%c0_8, %c0_9] : memref<16x128xf32, #tpu.memory_space<vmem>>, vector<16x128xf32>
    %c0_10 = arith.constant 0 : index
    %c0_11 = arith.constant 0 : index
    %14 = vector.load %arg6[%c0_10, %c0_11] : memref<128x128xf32, #tpu.memory_space<vmem>>, vector<128x128xf32>
    %cst_12 = arith.constant dense<0.000000e+00> : vector<16x128xf32>
    %15 = tpu.matmul %13, %14, %cst_12 {dimension_numbers = #tpu.dot_dimension_numbers<[1], [0], [0], [1], [0, 0, 1, 1], [], []>} : vector<16x128xf32>, vector<128x128xf32>, vector<16x128xf32> -> vector<16x128xf32>
    %c0_13 = arith.constant 0 : index
    %c0_14 = arith.constant 0 : index
    %16 = vector.load %arg1[%c0_13, %c0_14] : memref<16x128xf32, #tpu.memory_space<vmem>>, vector<16x128xf32>
    %c0_15 = arith.constant 0 : index
    %c0_16 = arith.constant 0 : index
    %17 = vector.load %arg7[%c0_15, %c0_16] : memref<128x128xf32, #tpu.memory_space<vmem>>, vector<128x128xf32>
    %cst_17 = arith.constant dense<0.000000e+00> : vector<16x128xf32>
    %18 = tpu.matmul %16, %17, %cst_17 {dimension_numbers = #tpu.dot_dimension_numbers<[1], [0], [0], [1], [0, 0, 1, 1], [], []>} : vector<16x128xf32>, vector<128x128xf32>, vector<16x128xf32> -> vector<16x128xf32>
    %19 = arith.addf %15, %18 : vector<16x128xf32>
    %c0_18 = arith.constant 0 : index
    %c0_19 = arith.constant 0 : index
    %20 = vector.load %arg8[%c0_18, %c0_19] : memref<1x128xf32, #tpu.memory_space<vmem>>, vector<1x128xf32>
    %21 = vector.broadcast %12 : vector<16x1xf32> to vector<16x128xf32>
    %22 = vector.broadcast %20 : vector<1x128xf32> to vector<16x128xf32>
    %23 = arith.mulf %21, %22 : vector<16x128xf32>
    %24 = arith.addf %19, %23 : vector<16x128xf32>
    %c0_20 = arith.constant 0 : index
    %c0_21 = arith.constant 0 : index
    %25 = vector.load %arg9[%c0_20, %c0_21] : memref<1x128xf32, #tpu.memory_space<vmem>>, vector<1x128xf32>
    %26 = vector.broadcast %25 : vector<1x128xf32> to vector<16x128xf32>
    %27 = arith.addf %24, %26 : vector<16x128xf32>
    %cst_22 = arith.constant 0.000000e+00 : f32
    %28 = vector.broadcast %cst_22 : f32 to vector<16x128xf32>
    %29 = arith.maximumf %27, %28 : vector<16x128xf32>
    %c0_23 = arith.constant 0 : index
    %c0_24 = arith.constant 0 : index
    %30 = vector.load %arg10[%c0_23, %c0_24] : memref<128x128xf32, #tpu.memory_space<vmem>>, vector<128x128xf32>
    %cst_25 = arith.constant dense<0.000000e+00> : vector<16x128xf32>
    %31 = tpu.matmul %29, %30, %cst_25 {dimension_numbers = #tpu.dot_dimension_numbers<[1], [0], [0], [1], [0, 0, 1, 1], [], []>} : vector<16x128xf32>, vector<128x128xf32>, vector<16x128xf32> -> vector<16x128xf32>
    %c0_26 = arith.constant 0 : index
    %c0_27 = arith.constant 0 : index
    %32 = vector.load %arg11[%c0_26, %c0_27] : memref<1x128xf32, #tpu.memory_space<vmem>>, vector<1x128xf32>
    %33 = vector.broadcast %32 : vector<1x128xf32> to vector<16x128xf32>
    %34 = arith.addf %31, %33 : vector<16x128xf32>
    %c0_28 = arith.constant 0 : index
    %c0_29 = arith.constant 0 : index
    %35 = vector.load %arg12[%c0_28, %c0_29] : memref<16x128xf32, #tpu.memory_space<vmem>>, vector<16x128xf32>
    tpu.vector_store %arg12[%c0_28, %c0_29], %34 {strides = array<i32>} : memref<16x128xf32, #tpu.memory_space<vmem>>, vector<16x128xf32>,
    return
  }
}

</mosaic_0001>

<bundles_post_ra>
// kernel: neognn_forward.8
= control target key start
LH: loop header
LB: loop body
LE: loop exit
PB: predicated region body
PF: predicated region fallthrough
CT: control target
= control target key end

     0   :  { %s671_s18 = smov 0   ;;  %s700_s0 = inlined_call_operand.vmem [shape: f32[64,8], index: 0, kind: input, shape index: {}]   ;;  %s701_s1 = inlined_call_operand.vmem [shape: f32[64,1], index: 1, kind: input, shape index: {}]   ;;  %s702_s2 = inlined_call_operand.vmem [shape: f32[8,128], index: 2, kind: input, shape index: {}]   ;;  %s703_s3 = inlined_call_operand.vmem [shape: f32[8,128], index: 3, kind: input, shape index: {}]   ;;  %s704_s4 = inlined_call_operand.vmem [shape: bf16[64,136], index: 4, kind: output, shape index: {0}]   ;;  %s705_s5 = inlined_call_operand.vmem [shape: bf16[64,128], index: 5, kind: output, shape index: {1}]  }
   0x1 LB: > { %s572_s19 = sadd.s32 4294967295, %s638_s18   ;;  %p576_p0 = scmp.ge.s32.totalorder %s638_s18, 1  ;;  %s638_s18 = sphi %s671_s18, %s16_s18  }
   0x2   : > { %p202_p1 = scmp.lt.s32.totalorder %s638_s18, 5 }
   0x4   : > { %p203_p2 = pnand %p576_p0, %p202_p1 }
   0x5   : > { %s577_s22 = sshll.u32 (!%p203_p2), %s572_s19, 1 }
   0x6   : > { %206 = sbr.rel (%p203_p2) target bundleno = 216 (0xd8), region = 36  ;;  %p242_p3 = scmp.lt.s32.totalorder (!%p203_p2), %s577_s22, 7 }
   0xb   : > { %v268_v0 = vld [vmem:[%s702_s2] sm:$0xff]  ;;  %s707_s22 = smov (!%p242_p3, %s577_s22), 7  ;;  %v640_v2 = vmov 0   ;;  %vm269_vm0 = vcmask 64512   ;;  %vm453_vm1 = vcmask 1043456   ;;  %vm454_vm2 = vcmask 64516  }
   0xc   : > { %v351_v1 = vld [vmem:[%s703_s3] sm:$0xff]  ;;  %612 = vmatprep.subr.mxu0 %v268_v0  ;;  %631 = vset.pattern.permute.xlu0 %v640_v2  ;;  %s578_s25 = sshll.u32 %s707_s22, 3  ;;  %s585_s7 = sshll.u32 %s707_s22, 2  ;;  %vm455_vm3 = vmor %vm454_vm2, %vm453_vm1 }
   0xd   : > { %617 = vmatprep.subr.mxu1 %v351_v1  ;;  %613 = vmatpush3.msra.mxu0 %v268_v0  ;;  %s245_s28 = scalar_lea.vmem %s700_s0, %s578_s25  ;;  %s251_s6 = scalar_lea.vmem %s701_s1, %s578_s25 }
   0xe   : > { %618 = vmatpush3.msra.mxu1 %v351_v1  ;;  %v266_v3 = vld [vmem:[%s245_s28] sm:$0xff]  ;;  %v267_v4 = vld [vmem:[%s245_s28 + $0x8] sm:$0xff]  ;;  %s264_s10 = scalar_lea.vmem %s705_s5, %s585_s7  ;;  %s258_s13 = scalar_lea.vmem %s704_s4, %s578_s25 }
   0xf   : > { %614 = vmatprep.mubr.msk.f32.mxu0 %vm269_vm0, %v266_v3  ;;  %619 = vmatprep.mubr.msk.f32.mxu1 %vm269_vm0, %v266_v3  ;;  %v427_v5 = vld [vmem:[%s251_s6] sm:$0xff]  ;;  %v428_v6 = vld [vmem:[%s251_s6 + $0x8] sm:$0xff] }
  0x10   : > { %615 = vmatmul.mubr.msk.f32.vlgmr.msra.gmra.mxu0 %vm269_vm0, %v267_v4  ;;  %620 = vmatmul.mubr.msk.f32.vlgmr.msra.gmra.mxu1 %vm269_vm0, %v267_v4 }
  0x11   : > { %431 = vperm.xlu0 %631, %v427_v5  }
  0x15   : > { %436 = vperm.xlu0 %631, %v428_v6  }
  0x8c   : > { %v432_v7 = vpop.permute.xlu0 %431 }
  0x90   : > { %v437_v8 = vpop.permute.xlu0 %436 }
  0xd0   : > { %v616_v9 = vpop.f32.mrf.mxu0  ;;  %v621_v10 = vpop.f32.mrf.mxu1 }
  0xd1   : > { %v440_v11 = vmul.f32 %v616_v9, %v437_v8 }
  0xd2   : > { %v342_v12 = vpop.f32.mrf.mxu0  ;;  %v418_v13 = vpop.f32.mrf.mxu1 }
  0xd3   : > { %v439_v14 = vmul.f32 %v432_v7, %v342_v12  ;;  %v604_v15 = vpack.c.bf16 %v621_v10, %v418_v13  ;;  %v598_v17 = vpack.c.bf16 %v267_v4, %v440_v11 }
  0xd5   : > { %v597_v16 = vpack.c.bf16 %v266_v3, %v439_v14  ;;  %605 = vst [vmem:[%s264_s10] sm:$0xff] %v604_v15   ;;  %457 = vst.msk [vmem:[%s258_s13 + $0x8] sm:$0xff] %vm455_vm3, %v598_v17 }
  0xd7   : > { %456 = vst.msk [vmem:[%s258_s13] sm:$0xff] %vm455_vm3, %v597_v16 }
  0xd8 PF: > { %s16_s18 = sadd.s32 1, %s638_s18  }
  0xd9   : > { %p13_p4 = scmp.ge.s32.totalorder %s16_s18, 6  }
  0xdb   :  { %15 = sbr.rel (!%p13_p4) target bundleno = 1 (0x1), region = 81 }

// kernel: neognn_forward.10
= control target key start
LH: loop header
LB: loop body
LE: loop exit
PB: predicated region body
PF: predicated region fallthrough
CT: control target
= control target key end

     0   :  { %s777_s18 = smov 0   ;;  %s907_s0 = inlined_call_operand.vmem [shape: f32[64,128], index: 0, kind: input, shape index: {}]   ;;  %s908_s1 = inlined_call_operand.vmem [shape: f32[64,1], index: 1, kind: input, shape index: {}]   ;;  %s909_s2 = inlined_call_operand.vmem [shape: f32[128,128], index: 2, kind: input, shape index: {}]   ;;  %s910_s3 = inlined_call_operand.vmem [shape: f32[128,128], index: 3, kind: input, shape index: {}]   ;;  %s911_s4 = inlined_call_operand.vmem [shape: bf16[64,256], index: 4, kind: output, shape index: {0}]   ;;  %s912_s5 = inlined_call_operand.vmem [shape: bf16[64,128], index: 5, kind: output, shape index: {1}]  }
   0x1 LB: > { %s592_s19 = sadd.s32 4294967295, %s744_s18   ;;  %p596_p0 = scmp.ge.s32.totalorder %s744_s18, 1  ;;  %s744_s18 = sphi %s777_s18, %s16_s18  }
   0x2   : > { %p202_p1 = scmp.lt.s32.totalorder %s744_s18, 5 }
   0x4   : > { %p203_p2 = pnand %p596_p0, %p202_p1 }
   0x5   : > { %s597_s25 = sshll.u32 (!%p203_p2), %s592_s19, 1 }
   0x6   : > { %206 = sbr.rel (%p203_p2) target bundleno = 244 (0xf4), region = 36  ;;  %p242_p3 = scmp.lt.s32.totalorder (!%p203_p2), %s597_s25, 7 }
   0xb   : > { %v283_v0 = vld [vmem:[%s909_s2 + $0x78] sm:$0xff]  ;;  %v282_v2 = vld [vmem:[%s909_s2 + $0x70] sm:$0xff]  ;;  %v281_v4 = vld [vmem:[%s909_s2 + $0x68] sm:$0xff]  ;;  %s914_s25 = smov (!%p242_p3, %s597_s25), 7  ;;  %v746_v35 = vmov 0  }
   0xc   : > { %v374_v1 = vld [vmem:[%s910_s3 + $0x78] sm:$0xff]  ;;  %658 = vmatprep.subr.mxu0 %v283_v0  ;;  %v373_v3 = vld [vmem:[%s910_s3 + $0x70] sm:$0xff]  ;;  %v372_v5 = vld [vmem:[%s910_s3 + $0x68] sm:$0xff]  ;;  %s868_s27 = sshll.u32 %s914_s25, 3  ;;  %737 = vset.pattern.permute.xlu0 %v746_v35  ;;  %s605_s22 = sshll.u32 %s914_s25, 2 }
   0xd   : > { %693 = vmatprep.subr.mxu1 %v374_v1  ;;  %659 = vmatpush3.msra.mxu0 %v283_v0  ;;  %v280_v6 = vld [vmem:[%s909_s2 + $0x60] sm:$0xff]  ;;  %v279_v8 = vld [vmem:[%s909_s2 + $0x58] sm:$0xff]  ;;  %v278_v10 = vld [vmem:[%s909_s2 + $0x50] sm:$0xff]  ;;  %s245_s8 = scalar_lea.vmem %s907_s0, %s868_s27  ;;  %s251_s21 = scalar_lea.vmem %s908_s1, %s868_s27 }
   0xe   : > { %694 = vmatpush3.msra.mxu1 %v374_v1  ;;  %660 = vmatprep.subr.mxu0 %v282_v2  ;;  %v371_v7 = vld [vmem:[%s910_s3 + $0x60] sm:$0xff]  ;;  %v370_v9 = vld [vmem:[%s910_s3 + $0x58] sm:$0xff]  ;;  %v369_v11 = vld [vmem:[%s910_s3 + $0x50] sm:$0xff]  ;;  %s258_s26 = scalar_lea.vmem %s911_s4, %s868_s27  ;;  %s264_s30 = scalar_lea.vmem %s912_s5, %s605_s22 }
   0xf   : > { %695 = vmatprep.subr.mxu1 %v373_v3  ;;  %661 = vmatpush3.msra.mxu0 %v282_v2  ;;  %v277_v12 = vld [vmem:[%s909_s2 + $0x48] sm:$0xff]  ;;  %v276_v14 = vld [vmem:[%s909_s2 + $0x40] sm:$0xff]  ;;  %v275_v16 = vld [vmem:[%s909_s2 + $0x38] sm:$0xff] }
  0x10   : > { %696 = vmatpush3.msra.mxu1 %v373_v3  ;;  %662 = vmatprep.subr.mxu0 %v281_v4  ;;  %v368_v13 = vld [vmem:[%s910_s3 + $0x48] sm:$0xff]  ;;  %v367_v15 = vld [vmem:[%s910_s3 + $0x40] sm:$0xff]  ;;  %v366_v17 = vld [vmem:[%s910_s3 + $0x38] sm:$0xff] }
  0x11   : > { %697 = vmatprep.subr.mxu1 %v372_v5  ;;  %663 = vmatpush3.msra.mxu0 %v281_v4  ;;  %v274_v18 = vld [vmem:[%s909_s2 + $0x30] sm:$0xff]  ;;  %v273_v20 = vld [vmem:[%s909_s2 + $0x28] sm:$0xff]  ;;  %v272_v22 = vld [vmem:[%s909_s2 + $0x20] sm:$0xff] }
  0x12   : > { %698 = vmatpush3.msra.mxu1 %v372_v5  ;;  %664 = vmatprep.subr.mxu0 %v280_v6  ;;  %v365_v19 = vld [vmem:[%s910_s3 + $0x30] sm:$0xff]  ;;  %v364_v21 = vld [vmem:[%s910_s3 + $0x28] sm:$0xff]  ;;  %v363_v23 = vld [vmem:[%s910_s3 + $0x20] sm:$0xff] }
  0x13   : > { %699 = vmatprep.subr.mxu1 %v371_v7  ;;  %665 = vmatpush3.msra.mxu0 %v280_v6  ;;  %v271_v24 = vld [vmem:[%s909_s2 + $0x18] sm:$0xff]  ;;  %v270_v26 = vld [vmem:[%s909_s2 + $0x10] sm:$0xff]  ;;  %v269_v28 = vld [vmem:[%s909_s2 + $0x8] sm:$0xff] }
  0x14   : > { %700 = vmatpush3.msra.mxu1 %v371_v7  ;;  %666 = vmatprep.subr.mxu0 %v279_v8  ;;  %v362_v25 = vld [vmem:[%s910_s3 + $0x18] sm:$0xff]  ;;  %v361_v27 = vld [vmem:[%s910_s3 + $0x10] sm:$0xff]  ;;  %v360_v29 = vld [vmem:[%s910_s3 + $0x8] sm:$0xff] }
  0x15   : > { %701 = vmatprep.subr.mxu1 %v370_v9  ;;  %667 = vmatpush3.msra.mxu0 %v279_v8  ;;  %v268_v30 = vld [vmem:[%s909_s2] sm:$0xff]  ;;  %v267_v33 = vld [vmem:[%s245_s8 + $0x8] sm:$0xff] }
  0x16   : > { %702 = vmatpush3.msra.mxu1 %v370_v9  ;;  %668 = vmatprep.subr.mxu0 %v278_v10  ;;  %v266_v31 = vld [vmem:[%s245_s8] sm:$0xff]  ;;  %v451_v36 = vld [vmem:[%s251_s21 + $0x8] sm:$0xff] }
  0x17   : > { %703 = vmatprep.subr.mxu1 %v369_v11  ;;  %669 = vmatpush3.msra.mxu0 %v278_v10  ;;  %v359_v32 = vld [vmem:[%s910_s3] sm:$0xff] }
  0x18   : > { %704 = vmatpush3.msra.mxu1 %v369_v11  ;;  %670 = vmatprep.subr.mxu0 %v277_v12  ;;  %v450_v34 = vld [vmem:[%s251_s21] sm:$0xff] }
  0x19   : > { %705 = vmatprep.subr.mxu1 %v368_v13  ;;  %671 = vmatpush3.msra.mxu0 %v277_v12 }
  0x1a   : > { %706 = vmatpush3.msra.mxu1 %v368_v13  ;;  %672 = vmatprep.subr.mxu0 %v276_v14 }
  0x1b   : > { %707 = vmatprep.subr.mxu1 %v367_v15  ;;  %673 = vmatpush3.msra.mxu0 %v276_v14 }
  0x1c   : > { %708 = vmatpush3.msra.mxu1 %v367_v15  ;;  %674 = vmatprep.subr.mxu0 %v275_v16 }
  0x1d   : > { %709 = vmatprep.subr.mxu1 %v366_v17  ;;  %675 = vmatpush3.msra.mxu0 %v275_v16 }
  0x1e   : > { %710 = vmatpush3.msra.mxu1 %v366_v17  ;;  %676 = vmatprep.subr.mxu0 %v274_v18 }
  0x1f   : > { %711 = vmatprep.subr.mxu1 %v365_v19  ;;  %677 = vmatpush3.msra.mxu0 %v274_v18 }
  0x20   : > { %712 = vmatpush3.msra.mxu1 %v365_v19  ;;  %678 = vmatprep.subr.mxu0 %v273_v20 }
  0x21   : > { %713 = vmatprep.subr.mxu1 %v364_v21  ;;  %679 = vmatpush3.msra.mxu0 %v273_v20 }
  0x22   : > { %714 = vmatpush3.msra.mxu1 %v364_v21  ;;  %680 = vmatprep.subr.mxu0 %v272_v22 }
  0x23   : > { %715 = vmatprep.subr.mxu1 %v363_v23  ;;  %681 = vmatpush3.msra.mxu0 %v272_v22 }
  0x24   : > { %716 = vmatpush3.msra.mxu1 %v363_v23  ;;  %682 = vmatprep.subr.mxu0 %v271_v24 }
  0x25   : > { %717 = vmatprep.subr.mxu1 %v362_v25  ;;  %683 = vmatpush3.msra.mxu0 %v271_v24 }
  0x26   : > { %718 = vmatpush3.msra.mxu1 %v362_v25  ;;  %684 = vmatprep.subr.mxu0 %v270_v26 }
  0x27   : > { %719 = vmatprep.subr.mxu1 %v361_v27  ;;  %685 = vmatpush3.msra.mxu0 %v270_v26 }
  0x28   : > { %720 = vmatpush3.msra.mxu1 %v361_v27  ;;  %686 = vmatprep.subr.mxu0 %v269_v28 }
  0x29   : > { %721 = vmatprep.subr.mxu1 %v360_v29  ;;  %687 = vmatpush3.msra.mxu0 %v269_v28 }
  0x2a   : > { %722 = vmatpush3.msra.mxu1 %v360_v29  ;;  %688 = vmatprep.subr.mxu0 %v268_v30 }
  0x2b   : > { %690 = vmatprep.mubr.f32.mxu0 %v266_v31  ;;  %689 = vmatpush3.msra.mxu0 %v268_v30 }
  0x2c   : > { %723 = vmatprep.subr.mxu1 %v359_v32  ;;  %691 = vmatmul.mubr.f32.vlgmr.msra.gmra.mxu0 %v267_v33 }
  0x2d   : > { %724 = vmatpush3.msra.mxu1 %v359_v32  ;;  %725 = vmatprep.mubr.f32.mxu1 %v266_v31 }
  0x2e   : > { %726 = vmatmul.mubr.f32.vlgmr.msra.gmra.mxu1 %v267_v33  ;;  %454 = vperm.xlu0 %737, %v450_v34  }
  0x32   : > { %459 = vperm.xlu0 %737, %v451_v36  }
  0xa9   : > { %v455_v37 = vpop.permute.xlu0 %454 }
  0xad   : > { %v460_v38 = vpop.permute.xlu0 %459 }
  0xec   : > { %v692_v39 = vpop.f32.mrf.mxu0 }
  0xed   : > { %v463_v40 = vmul.f32 %v692_v39, %v460_v38 }
  0xee   : > { %v727_v41 = vpop.f32.mrf.mxu1  ;;  %v350_v42 = vpop.f32.mrf.mxu0 }
  0xef   : > { %v462_v43 = vmul.f32 %v455_v37, %v350_v42  ;;  %v614_v47 = vpack.c.bf16 %v267_v33, %v463_v40 }
  0xf0   : > { %v441_v44 = vpop.f32.mrf.mxu1 }
  0xf1   : > { %v613_v45 = vpack.c.bf16 %v266_v31, %v462_v43  ;;  %v620_v46 = vpack.c.bf16 %v727_v41, %v441_v44  ;;  %477 = vst [vmem:[%s258_s26 + $0x8] sm:$0xff] %v614_v47 }
  0xf3   : > { %476 = vst [vmem:[%s258_s26] sm:$0xff] %v613_v45  ;;  %621 = vst [vmem:[%s264_s30] sm:$0xff] %v620_v46  }
  0xf4 PF: > { %s16_s18 = sadd.s32 1, %s744_s18  }
  0xf5   : > { %p13_p4 = scmp.ge.s32.totalorder %s16_s18, 6  }
  0xf7   :  { %15 = sbr.rel (!%p13_p4) target bundleno = 1 (0x1), region = 81 }

// kernel: neognn_forward.9
= control target key start
LH: loop header
LB: loop body
LE: loop exit
PB: predicated region body
PF: predicated region fallthrough
CT: control target
= control target key end

     0   :  { %s1859_s27 = smov 0   ;;  %s2082_s0 = inlined_call_operand.vmem [shape: bf16[64,64], index: 0, kind: input, shape index: {}]   ;;  %s2083_s1 = inlined_call_operand.vmem [shape: bf16[64,136], index: 1, kind: input, shape index: {}]   ;;  %s2084_s2 = inlined_call_operand.vmem [shape: bf16[64,128], index: 2, kind: input, shape index: {}]   ;;  %s2085_s3 = inlined_call_operand.vmem [shape: f32[64,8], index: 3, kind: input, shape index: {}]   ;;  %s2086_s4 = inlined_call_operand.vmem [shape: f32[64,1], index: 4, kind: input, shape index: {}]   ;;  %s2087_s5 = inlined_call_operand.vmem [shape: f32[64,1], index: 5, kind: input, shape index: {}]   ;;  %s2088_s6 = inlined_call_operand.vmem [shape: f32[8,128], index: 6, kind: input, shape index: {}]   ;;  %s2089_s7 = inlined_call_operand.vmem [shape: f32[1,128], index: 7, kind: input, shape index: {}]   ;;  %s2090_s8 = inlined_call_operand.vmem [shape: f32[8,128], index: 8, kind: input, shape index: {}]   ;;  %s2091_s9 = inlined_call_operand.vmem [shape: f32[1,128], index: 9, kind: input, shape index: {}]   ;;  %s2092_s10 = inlined_call_operand.vmem [shape: f32[8,128], index: 10, kind: input, shape index: {}]   ;;  %s2093_s11 = inlined_call_operand.vmem [shape: f32[8,128], index: 11, kind: input, shape index: {}]   ;;  %s2094_s12 = inlined_call_operand.vmem [shape: f32[1,128], index: 12, kind: input, shape index: {}]   ;;  %s2095_s13 = inlined_call_operand.vmem [shape: f32[128,128], index: 13, kind: input, shape index: {}]   ;;  %s2096_s14 = inlined_call_operand.vmem [shape: f32[1,128], index: 14, kind: input, shape index: {}]   ;;  %s2097_s15 = inlined_call_operand.vmem [shape: f32[1,128], index: 15, kind: input, shape index: {}]   ;;  %s2098_s16 = inlined_call_operand.vmem [shape: f32[1,128], index: 16, kind: input, shape index: {}]   ;;  %s2099_s17 = inlined_call_operand.vmem [shape: f32[1,128], index: 17, kind: input, shape index: {}]   ;;  %s2100_s18 = inlined_call_operand.vmem [shape: f32[64,128], index: 18, kind: output, shape index: {}]  }
   0x1   :  { %2104 = sst [smem:[#allocation3_spill]] %s2082_s0 }
   0x2   :  { %2105 = sst [smem:[#allocation4_spill]] %s2083_s1 }
   0x3   :  { %2106 = sst [smem:[#allocation5_spill]] %s2084_s2 }
   0x4   :  { %2107 = sst [smem:[#allocation6_spill]] %s2096_s14 }
   0x5   :  { %2108 = sst [smem:[#allocation7_spill]] %s2099_s17 }
   0x6   :  { %2109 = sst [smem:[#allocation8_spill]] %s2100_s18 }
   0x7 LB: > { %2110 = sst [smem:[#allocation2_spill]] %s1759_s27  ;;  %s1544_s28 = sadd.s32 4294967295, %s1759_s27   ;;  %s1759_s27 = sphi %s1859_s27, %s28_s27  }
   0x8   : > { %p1548_p0 = scmp.ge.s32.totalorder %s1759_s27, 1  ;;  %p546_p1 = scmp.lt.s32.totalorder %s1759_s27, 5 }
   0xa   : > { %p547_p2 = pnand %p1548_p0, %p546_p1 }
   0xb   : > { %s2111_s0 = sld [smem:[#allocation4_spill]] (!%p547_p2)  ;;  %s1549_s19 = sshll.u32 (!%p547_p2), %s1544_s28, 1 }
   0xc   : > { %550 = sbr.rel (%p547_p2) target bundleno = 798 (0x31e), region = 92  ;;  %p616_p3 = scmp.lt.s32.totalorder (!%p547_p2), %s1549_s19, 7 }
   0xd   : > { %s2112_s22 = sld [smem:[#allocation3_spill]] (!%p547_p2)  ;;  %s1893_s23 = sshll.u32 (!%p547_p2), %s1544_s28, 4 }
   0xe   : > { %s1243_s17 = sshra.s32 (!%p547_p2), %s1893_s23, 3  ;;  %s2113_s20 = sld [smem:[#allocation5_spill]] (!%p547_p2) }
   0xf   : > { %s1582_s30 = sshll.u32 (!%p547_p2), %s1243_s17, 2  ;;  %s2115_s1 = sld [smem:[#allocation7_spill]] (!%p547_p2) }
  0x10   : > { %s2116_s28 = sld [smem:[#allocation8_spill]] (!%p547_p2) }
  0x11   : > { %v1728_v0 = vld [vmem:[%s2111_s0 + $0x34] ss:$8 sps:$4 sm:$0xff]   ;;  %v1730_v1 = vld [vmem:[%s2111_s0 + $0x30] ss:$8 sps:$4 sm:$0xff]   ;;  %v1761_v2 = vmov 0   ;;  %s2119_s19 = smov (!%p616_p3, %s1549_s19), 7  ;;  %v1330_v41 = vlaneseq  ;;  %v1347_v47 = vstv %s1893_s23 }
  0x12   : > { %743 = vmatprep.mubr.bf16.mxu0 %v1761_v2  ;;  %1726 = vset.pattern.permute.xlu0 %v1761_v2  ;;  %v1731_v3 = vld [vmem:[%s2111_s0 + $0x24] ss:$8 sps:$4 sm:$0xff]   ;;  %v1733_v4 = vld [vmem:[%s2111_s0 + $0x20] ss:$8 sps:$4 sm:$0xff]   ;;  %v1734_v5 = vld [vmem:[%s2111_s0 + $0x14] ss:$8 sps:$4 sm:$0xff]  }
  0x13   : > { %719 = vmatprep.subr.bf16.mxu0 %v1728_v0  ;;  %1727 = vset.pattern.permute.xlu1 %v1761_v2  ;;  %s1550_s26 = sshll.u32 %s2119_s19, 2  ;;  %s1885_s29 = sshll.u32 %s2119_s19, 3  ;;  %v1736_v6 = vld [vmem:[%s2111_s0 + $0x10] ss:$8 sps:$4 sm:$0xff]   ;;  %v1737_v7 = vld [vmem:[%s2111_s0 + $0x4] ss:$8 sps:$4 sm:$0xff]  }
  0x14   : > { %720 = vmatpush1.bf16.msra.mxu0 %v1730_v1  ;;  %s619_s2 = scalar_lea.vmem %s2112_s22, %s1550_s26  ;;  %s637_s18 = scalar_lea.vmem %s2087_s5, %s1885_s29  ;;  %v1739_v8 = vld [vmem:[%s2111_s0] ss:$8 sps:$4 sm:$0xff]   ;;  %vm707_vm0 = vcmask 523264   ;;  %vm755_vm1 = vcmask 64512   ;;  %v1762_v22 = vmov 0.0   ;;  %v1931_v24 = vld [vmem:[%s2113_s20 + $0x18] sm:$0xff]  }
  0x15   : > { %721 = vmatprep.subr.bf16.mxu0 %v1731_v3  ;;  %s1246_s21 = scalar_lea.vmem %s2113_s20, %s1582_s30  ;;  %v1909_v9 = vld [vmem:[%s619_s2] sm:$0xf]  ;;  %v1911_v10 = vld [vmem:[%s619_s2 + $0x4] sm:$0xf]  ;;  %s625_s25 = scalar_lea.vmem %s2085_s3, %s1885_s29  ;;  %v863_v15 = vld [vmem:[%s637_s18 + $0x8] sm:$0xff]  ;;  %vm1763_vm2 = vmmov 0  }
  0x16   : > { %v862_v11 = vld [vmem:[%s637_s18] sm:$0xff]  ;;  %v1559_v18 = vcombine.low %v1909_v9, %v1911_v10  ;;  %v651_v23 = vld [vmem:[%s625_s25 + $0x8] sm:$0xff]  ;;  %v1941_v25 = vld [vmem:[%s2113_s20 + $0x10] sm:$0xff]   ;;  %v1331_v44 = vshrl.u32 %v1330_v41, 7  ;;  %v1343_v49 = vand.u32 127, %v1330_v41  ;;  %vm1351_vm5 = vcmp.gt.bf16.partialorder %v1911_v10, 0  ;;  %s631_s17 = scalar_lea.vmem %s2086_s4, %s1885_s29 }
  0x17   : > { %866 = vperm.xlu0 %1726, %v862_v11   ;;  %v1593_v12 = vld [vmem:[%s1246_s21] sm:$0xff]   ;;  %v1948_v26 = vld [vmem:[%s2113_s20 + $0x8] sm:$0xff]   ;;  %v1151_v43 = vld [vmem:[%s2095_s13 + $0x78] sm:$0xff]  ;;  %vm1350_vm7 = vcmp.gt.bf16.partialorder %v1909_v9, 0  ;;  %s2114_s18 = sld [smem:[#allocation6_spill]]  ;;  %s643_s21 = scalar_lea.vmem %s2116_s28, %s1885_s29 }
  0x18   : > { %722 = vmatpush1.bf16.msra.mxu0 %v1733_v4  ;;  %v1583_v13 = vld [vmem:[%s2098_s16] ss:$0 sm:$0xff]  ;;  %v1594_v16 = vunpack.c.l.bf16 %v1593_v12  ;;  %v1595_v17 = vunpack.c.h.bf16 %v1593_v12  ;;  %v1346_v46 = vadd.s32 8, %v1331_v44  ;;  %v1348_v50 = vadd.s32 %v1347_v47, %v1331_v44  ;;  %v1150_v11 = vld [vmem:[%s2095_s13 + $0x70] sm:$0xff]  ;;  %v1149_v12 = vld [vmem:[%s2095_s13 + $0x68] sm:$0xff] }
  0x19   : > { %723 = vmatprep.subr.bf16.mxu0 %v1734_v5  ;;  %v754_v14 = vld [vmem:[%s2088_s6] sm:$0xff]  ;;  %v1332_v53 = vsub.s32 0, %v1331_v44 }
  0x1a   : > { %v1258_v19 = vmul.f32 %v1594_v16, %v1583_v13  ;;  %v650_v20 = vld [vmem:[%s625_s25] sm:$0xff]  ;;  %v1259_v21 = vmul.f32 %v1595_v17, %v1583_v13  ;;  %v1349_v48 = vadd.s32 %v1347_v47, %v1346_v46  ;;  %vm1352_vm4 = vcmp.eq.s32.totalorder %v1343_v49, %v1348_v50  ;;  %v1145_v16 = vld [vmem:[%s2095_s13 + $0x48] sm:$0xff] }
  0x1b   : > { %871 = vperm.xlu0 %1726, %v863_v15   ;;  %v1955_v27 = vld [vmem:[%s2113_s20] sm:$0xff]   ;;  %vm1354_vm8 = vmpackc.low %vm1352_vm4, %vm1352_vm4  ;;  %v1146_v15 = vld [vmem:[%s2095_s13 + $0x50] sm:$0xff] }
  0x1c   : > { %724 = vmatpush1.bf16.msra.mxu0 %v1736_v6  ;;  %1260 = vadd.xlane.f32.xlu1 %v1258_v19  ;;  %v1264_v28 = vld [vmem:[%s2097_s15] sm:$0x1]  ;;  %vm1353_vm3 = vcmp.eq.s32.totalorder %v1343_v49, %v1349_v48  ;;  %vm1356_vm10 = vmor %vm1350_vm7, %vm1354_vm8  ;;  %v1142_v19 = vld [vmem:[%s2095_s13 + $0x30] sm:$0xff] }
  0x1d   : > { %725 = vmatprep.subr.bf16.mxu0 %v1737_v7  ;;  %v1265_v29 = vpack.c.bf16 %v1264_v28, %v1264_v28  ;;  %v876_v30 = vld [vmem:[%s2090_s8] sm:$0xff]  ;;  %vm1355_vm6 = vmpackc.low %vm1353_vm3, %vm1353_vm3  ;;  %v1358_v55 = vsel %vm1356_vm10, 65537, %v1761_v2  ;;  %v1138_v28 = vld [vmem:[%s2095_s13 + $0x10] sm:$0xff] }
  0x1e   : > { %1641 = vmatprep.subr.mxu1 %v876_v30  ;;  %v965_v31 = vld [vmem:[%s2092_s10] sm:$0xff]  ;;  %vm1357_vm9 = vmor %vm1351_vm5, %vm1355_vm6  ;;  %v1360_v60 = vunpack.c.l.b16 %v1358_v55 }
  0x1f   : > { %1642 = vmatpush3.msra.mxu1 %v876_v30  ;;  %v1045_v40 = vld [vmem:[%s2093_s11] sm:$0xff]  ;;  %v1359_v54 = vsel %vm1357_vm9, 65537, %v1761_v2 }
  0x20   : > { %726 = vmatpush1.bf16.msra.mxu0 %v1739_v8  ;;  %1262 = vadd.xlane.f32.xlu1 %v1259_v21  ;;  %v1361_v59 = vunpack.c.l.b16 %v1359_v54  ;;  %vm1362_vm12 = vcmp.ne.s32.totalorder %v1360_v60, 0  ;;  %v1148_v13 = vld [vmem:[%s2095_s13 + $0x60] sm:$0xff] }
  0x21   : > { %1636 = vmatprep.subr.mxu0 %v754_v14  ;;  %1646 = vmatprep.subr.mxu1 %v965_v31  ;;  %v1144_v17 = vld [vmem:[%s2095_s13 + $0x40] sm:$0xff] }
  0x22   : > { %vm1363_vm11 = vcmp.ne.s32.totalorder %v1361_v59, 0  ;;  %v1140_v21 = vld [vmem:[%s2095_s13 + $0x20] sm:$0xff] }
  0x23   : > { %1568 = vmatmul.mubr.msk.bf16.vlgmr.msra.gmra.mxu0 %vm707_vm0, %v1559_v18  ;;  %v1143_v18 = vld [vmem:[%s2095_s13 + $0x38] sm:$0xff]  ;;  %v1136_v30 = vld [vmem:[%s2095_s13] sm:$0xff] }
  0x24   : > { %1637 = vmatpush3.msra.mxu0 %v754_v14  ;;  %1638 = vmatprep.mubr.msk.f32.mxu0 %vm755_vm1, %v650_v20  ;;  %v1147_v14 = vld [vmem:[%s2095_s13 + $0x58] sm:$0xff] }
  0x25   : > { %1691 = vmatprep.subr.bf16.mxu0 %v1762_v22 }
  0x2b   : > { %1639 = vmatmul.mubr.msk.f32.vlgmr.msra.gmra.mxu0 %vm755_vm1, %v651_v23 }
  0x2c   : > { %1692 = vmatpush3.bf16.xpose.msra.mxu0 %v1931_v24  ;;  %1699 = vmatprep.mubr.msk.bf16.mxu0 %vm1763_vm2, %v1762_v22 }
  0x2d   : > { %1693 = vmatprep.subr.bf16.mxu0 %v1762_v22 }
  0x34   : > { %1694 = vmatpush3.bf16.xpose.msra.mxu0 %v1941_v25 }
  0x35   : > { %1695 = vmatprep.subr.bf16.mxu0 %v1762_v22 }
  0x3c   : > { %1696 = vmatpush3.bf16.xpose.msra.mxu0 %v1948_v26 }
  0x3d   : > { %1697 = vmatprep.subr.bf16.mxu0 %v1762_v22 }
  0x44   : > { %1698 = vmatpush3.bf16.xpose.msra.mxu0 %v1955_v27 }
  0x4b   : > { %1700 = vmatmul.mubr.bf16.vlgmr.msra.gmra.mxu0 %v1265_v29  ;;  %v1137_v29 = vld [vmem:[%s2095_s13 + $0x8] sm:$0xff] }
  0x92   : > { %v867_v32 = vpop.permute.xlu0 %866 }
  0x96   : > { %v872_v37 = vpop.permute.xlu0 %871 }
  0xa5   : > { %v1261_v52 = vpop.xlane.xlu1 %1260 }
  0xa9   : > { %v1263_v58 = vpop.xlane.xlu1 %1262 }
  0xe3   : > { %v1967_v33 = vpop.f32.mrf.mxu0 }
  0xe5   : > { %v747_v34 = vpop.f32.mrf.mxu0 }
  0xe6   : > { %v874_v35 = vmul.f32 %v867_v32, %v747_v34  ;;  %v1043_v42 = vadd.f32 %v747_v34, %v650_v20 }
  0xe7   : > { %v1969_v36 = vpop.f32.mrf.mxu0 }
  0xe8   : > { %1643 = vmatprep.mubr.msk.f32.mxu1 %vm755_vm1, %v874_v35 }
  0xe9   : > { %v751_v38 = vpop.f32.mrf.mxu0 }
  0xea   : > { %v875_v39 = vmul.f32 %v872_v37, %v751_v38  ;;  %v1044_v45 = vadd.f32 %v751_v38, %v651_v23 }
  0xeb   : > { %v1986_v51 = vpop.f32.mrf.mxu0 }
  0xec   : > { %1644 = vmatmul.mubr.msk.f32.vlgmr.msra.gmra.mxu1 %vm755_vm1, %v875_v39 }
  0xed   : > { %1647 = vmatpush3.msra.mxu1 %v965_v31  ;;  %1648 = vmatprep.mubr.msk.f32.mxu1 %vm755_vm1, %v650_v20  ;;  %v1990_v56 = vpop.f32.mrf.mxu0  ;;  %v1141_v20 = vld [vmem:[%s2095_s13 + $0x28] sm:$0xff] }
  0xee   : > { %1651 = vmatprep.subr.mxu1 %v1045_v40 }
  0xf0   : > { %1649 = vmatmul.mubr.msk.f32.vlgmr.msra.gmra.mxu1 %vm755_vm1, %v651_v23  ;;  %v1139_v23 = vld [vmem:[%s2095_s13 + $0x18] sm:$0xff] }
  0xf1   : > { %1653 = vmatprep.mubr.msk.f32.mxu1 %vm755_vm1, %v1043_v42  ;;  %1652 = vmatpush3.msra.mxu1 %v1045_v40  ;;  %v1572_v40 = vld [vmem:[%s2091_s9] ss:$0 sm:$0xff] }
  0xf2   : > { %1656 = vmatprep.subr.mxu1 %v1151_v43 }
  0xf4   : > { %1654 = vmatmul.mubr.msk.f32.vlgmr.msra.gmra.mxu1 %vm755_vm1, %v1044_v45 }
  0xf5   : > { %1657 = vmatpush3.msra.mxu1 %v1151_v43 }
  0xf6   : > { %1658 = vmatprep.subr.mxu1 %v1150_v11 }
  0xf7   : > { %1659 = vmatpush3.msra.mxu1 %v1150_v11 }
  0xf8   : > { %1660 = vmatprep.subr.mxu1 %v1149_v12 }
  0xf9   : > { %1661 = vmatpush3.msra.mxu1 %v1149_v12 }
  0xfa   : > { %1662 = vmatprep.subr.mxu1 %v1148_v13 }
  0xfb   : > { %1663 = vmatpush3.msra.mxu1 %v1148_v13 }
  0xfc   : > { %1664 = vmatprep.subr.mxu1 %v1147_v14 }
  0xfd   : > { %1665 = vmatpush3.msra.mxu1 %v1147_v14 }
  0xfe   : > { %1666 = vmatprep.subr.mxu1 %v1146_v15 }
  0xff   : > { %1667 = vmatpush3.msra.mxu1 %v1146_v15 }
 0x100   : > { %1668 = vmatprep.subr.mxu1 %v1145_v16 }
 0x101   : > { %1669 = vmatpush3.msra.mxu1 %v1145_v16 }
 0x102   : > { %1670 = vmatprep.subr.mxu1 %v1144_v17 }
 0x103   : > { %1671 = vmatpush3.msra.mxu1 %v1144_v17 }
 0x104   : > { %1672 = vmatprep.subr.mxu1 %v1143_v18 }
 0x105   : > { %1673 = vmatpush3.msra.mxu1 %v1143_v18 }
 0x106   : > { %1674 = vmatprep.subr.mxu1 %v1142_v19 }
 0x107   : > { %1675 = vmatpush3.msra.mxu1 %v1142_v19 }
 0x108   : > { %1676 = vmatprep.subr.mxu1 %v1141_v20 }
 0x109   : > { %1677 = vmatpush3.msra.mxu1 %v1141_v20 }
 0x10a   : > { %1678 = vmatprep.subr.mxu1 %v1140_v21 }
 0x10b   : > { %v1324_v57 = vpop.f32.mrf.mxu0  ;;  %1679 = vmatpush3.msra.mxu1 %v1140_v21 }
 0x10c   : > { %v1333_v61 = vrot.slane %v1324_v57, %v1332_v53  ;;  %1680 = vmatprep.subr.mxu1 %v1139_v23 }
 0x10d   : > { %v1701_v62 = vpop.f32.mrf.mxu0  ;;  %1681 = vmatpush3.msra.mxu1 %v1139_v23 }
 0x10e   : > { %v1334_v63 = vadd.f32 %v1333_v61, %v1261_v52  ;;  %v1335_v0 = vadd.f32 %v1333_v61, %v1263_v58  ;;  %1682 = vmatprep.subr.mxu1 %v1138_v28  ;;  %v1577_v52 = vld [vmem:[%s2094_s12] ss:$0 sm:$0xff] }
 0x10f   : > { %v1327_v1 = vpop.f32.mrf.mxu0  ;;  %1683 = vmatpush3.msra.mxu1 %v1138_v28  ;;  %v652_v61 = vld [vmem:[%s631_s17] sm:$0xff] }
 0x110   : > { %v1339_v3 = vmul.f32 0.2, %v1335_v0  ;;  %vm1337_vm13 = vcmp.gt.f32.partialorder %v1335_v0, 0.0  ;;  %vm1336_vm14 = vcmp.gt.f32.partialorder %v1334_v63, 0.0  ;;  %v1338_v4 = vmul.f32 0.2, %v1334_v63  ;;  %1684 = vmatprep.subr.mxu1 %v1137_v29 }
 0x111   : > { %v1702_v5 = vpop.f32.mrf.mxu0  ;;  %1685 = vmatpush3.msra.mxu1 %v1137_v29 }
 0x112   : > { %v1341_v6 = vsel %vm1337_vm13, %v1335_v0, %v1339_v3  ;;  %v1340_v2 = vsel %vm1336_vm14, %v1334_v63, %v1338_v4  ;;  %1686 = vmatprep.subr.mxu1 %v1136_v30 }
 0x113   : > { %v1365_v7 = vsel %vm1363_vm11, %v1341_v6, -1e+30  ;;  %v1364_v8 = vsel %vm1362_vm12, %v1340_v2, -1e+30  ;;  %1687 = vmatpush3.msra.mxu1 %v1136_v30 }
 0x114   : > { %v1369_v9 = vsel %vm707_vm0, %v1365_v7, -inf  ;;  %v1366_v10 = vsel %vm707_vm0, %v1364_v8, -inf  ;;  %1703 = vmatprep.subr.bf16.mxu1 %v1762_v22 }
 0x115   : > { %1370 = vmax.xlane.f32.xlu1 %v1369_v9  ;;  %1367 = vmax.xlane.f32.xlu0 %v1366_v10  ;;  %v1571_v9 = vld [vmem:[%s2089_s7] ss:$0 sm:$0xff] }
 0x19e   : > { %v1371_v31 = vpop.xlane.xlu1 %1370  ;;  %v1368_v32 = vpop.xlane.xlu0 %1367 }
 0x19f   : > { %v1373_v34 = vsub.f32 %v1365_v7, %v1371_v31  ;;  %v1372_v35 = vsub.f32 %v1364_v8, %v1368_v32 }
 0x1a1   : > { %v1374_v37 = vmul.f32 1.442695, %v1372_v35  ;;  %v1376_v38 = vmul.f32 1.442695, %v1373_v34 }
 0x1a3   : > { %1745 = vpow2.f32 %v1374_v37 }
 0x1a4   : > { %1747 = vpow2.f32 %v1376_v38 }
 0x1ac   : > { %v1645_v39 = vpop.f32.mrf.mxu1 }
 0x1ad   : > { %v962_v42 = vadd.f32 %v1645_v39, %v1572_v40 }
 0x1ae   : > { %v956_v41 = vpop.f32.mrf.mxu1 }
 0x1af   : > { %v957_v45 = vadd.f32 %v1572_v40, %v956_v41 }
 0x1b0   : > { %v1650_v43 = vpop.f32.mrf.mxu1  ;;  %v1746_v44 = vpop.eup %1745 }
 0x1b1   : > { %v1042_v46 = vadd.f32 %v1650_v43, %v962_v42  ;;  %v1378_v47 = vsel %vm707_vm0, %v1746_v44, 0.0  ;;  %v1748_v49 = vpop.eup %1747 }
 0x1b2   : > { %v1032_v48 = vpop.f32.mrf.mxu1  ;;  %1379 = vadd.xlane.f32.xlu1 %v1378_v47  ;;  %v1381_v55 = vsel %vm707_vm0, %v1748_v49, 0.0 }
 0x1b3   : > { %v1041_v50 = vadd.f32 %v1032_v48, %v957_v45 }
 0x1b4   : > { %v1655_v53 = vpop.f32.mrf.mxu1 }
 0x1b5   : > { %v1131_v54 = vadd.f32 %v1655_v53, %v1577_v52 }
 0x1b6   : > { %v1125_v57 = vpop.f32.mrf.mxu1  ;;  %1382 = vadd.xlane.f32.xlu1 %v1381_v55 }
 0x1b7   : > { %v1126_v58 = vadd.f32 %v1577_v52, %v1125_v57  ;;  %v1135_v60 = vmax.f32 %v1131_v54, 0.0 }
 0x1b9   : > { %v1134_v59 = vmax.f32 %v1126_v58, 0.0 }
 0x1bb   : > { %1688 = vmatprep.mubr.f32.mxu1 %v1134_v59 }
 0x1bc   : > { %1689 = vmatmul.mubr.f32.vlgmr.msra.gmra.mxu1 %v1135_v60 }
 0x1bd   : > { %1704 = vmatpush3.bf16.msra.mxu1 %v1931_v24  ;;  %1711 = vmatprep.mubr.msk.bf16.mxu1 %vm1763_vm2, %v1762_v22  ;;  %v653_v24 = vld [vmem:[%s631_s17 + $0x8] sm:$0xff] }
 0x1be   : > { %1705 = vmatprep.subr.bf16.mxu1 %v1762_v22 }
 0x1c1   : > { %1706 = vmatpush3.bf16.msra.mxu1 %v1941_v25 }
 0x1c2   : > { %1707 = vmatprep.subr.bf16.mxu1 %v1762_v22 }
 0x1c5   : > { %1708 = vmatpush3.bf16.msra.mxu1 %v1948_v26 }
 0x1c6   : > { %1709 = vmatprep.subr.bf16.mxu1 %v1762_v22 }
 0x1c7   : > { %839 = vperm.xlu1 %1727, %v652_v61  }
 0x1c9   : > { %1710 = vmatpush3.bf16.msra.mxu1 %v1955_v27 }
 0x1cb   : > { %844 = vperm.xlu1 %1727, %v653_v24  }
 0x23b   : > { %v1380_v62 = vpop.xlane.xlu1 %1379 }
 0x23c   : > { %1749 = vrcp.f32 %v1380_v62 }
 0x23f   : > { %v1383_v63 = vpop.xlane.xlu1 %1382 }
 0x240   : > { %1751 = vrcp.f32 %v1383_v63 }
 0x243   : > { %v840_v5 = vpop.permute.xlu1 %839 }
 0x244   : > { %v847_v26 = vmul.f32 %v840_v5, %v1990_v56  ;;  %v1580_v56 = vld [vmem:[%s2114_s18] ss:$0 sm:$0xff] }
 0x246   : > { %v849_v6 = vadd.f32 %v847_v26, %v1967_v33  ;;  %v1588_v33 = vld [vmem:[%s2115_s1] ss:$0 sm:$0xff] }
 0x247   : > { %v845_v22 = vpop.permute.xlu1 %844 }
 0x248   : > { %v848_v27 = vmul.f32 %v1986_v51, %v845_v22  ;;  %v851_v7 = vmul.f32 %v849_v6, %v840_v5 }
 0x249   : > { %v1750_v25 = vpop.eup %1749 }
 0x24a   : > { %v1386_v1 = vmul.f32 %v1750_v25, %v1746_v44  ;;  %v850_v8 = vadd.f32 %v848_v27, %v1969_v36  ;;  %v860_v11 = vadd.f32 %v1571_v9, %v851_v7 }
 0x24c   : > { %v852_v12 = vmul.f32 %v850_v8, %v845_v22  ;;  %v1440_v14 = vadd.f32 %v1041_v50, %v860_v11 }
 0x24d   : > { %v1752_v0 = vpop.eup %1751 }
 0x24e   : > { %v1387_v3 = vmul.f32 %v1752_v0, %v1748_v49  ;;  %v861_v51 = vadd.f32 %v1571_v9, %v852_v12 }
 0x250   : > { %v1388_v4 = vpack.c.bf16 %v1387_v3, %v1386_v1  ;;  %v1441_v19 = vadd.f32 %v1042_v46, %v861_v51 }
 0x252   : > { %1712 = vmatmul.mubr.msk.bf16.vlgmr.msra.gmra.mxu1 %vm707_vm0, %v1388_v4 }
 0x27c   : > { %v1690_v2 = vpop.f32.mrf.mxu1 }
 0x27d   : > { %v1231_v15 = vadd.f32 %v1690_v2, %v1580_v56 }
 0x27e   : > { %v1225_v10 = vpop.f32.mrf.mxu1 }
 0x27f   : > { %v1226_v13 = vadd.f32 %v1580_v56, %v1225_v10  ;;  %v1443_v23 = vadd.f32 %v1441_v19, %v1231_v15 }
 0x281   : > { %v1442_v16 = vadd.f32 %v1440_v14, %v1226_v13 }
 0x312   : > { %v1433_v36 = vpop.f32.mrf.mxu1 }
 0x313   : > { %v1434_v17 = vadd.f32 %v1588_v33, %v1433_v36 }
 0x314   : > { %v1713_v18 = vpop.f32.mrf.mxu1 }
 0x315   : > { %v1444_v20 = vadd.f32 %v1442_v16, %v1434_v17 }
 0x316   : > { %v1436_v21 = vpop.f32.mrf.mxu1 }
 0x317   : > { %v1446_v28 = vmax.f32 %v1444_v20, 0.0  ;;  %v1437_v29 = vadd.f32 %v1588_v33, %v1436_v21 }
 0x318   : > { %v1714_v30 = vpop.f32.mrf.mxu1 }
 0x319   : > { %1448 = vst [vmem:[%s643_s21] sm:$0xff] %v1446_v28  ;;  %v1445_v31 = vadd.f32 %v1443_v23, %v1437_v29 }
 0x31b   : > { %v1447_v32 = vmax.f32 %v1445_v31, 0.0 }
 0x31d   : > { %1449 = vst [vmem:[%s643_s21 + $0x8] sm:$0xff] %v1447_v32 }
 0x31e PF: > { %s2117_s27 = sld [smem:[#allocation2_spill]] }
 0x324   : > { %s28_s27 = sadd.s32 1, %s2117_s27  }
 0x325   : > { %p25_p4 = scmp.ge.s32.totalorder %s28_s27, 6  }
 0x327   :  { %27 = sbr.rel (!%p25_p4) target bundleno = 7 (0x7), region = 132 }

// kernel: neognn_forward.11
= control target key start
LH: loop header
LB: loop body
LE: loop exit
PB: predicated region body
PF: predicated region fallthrough
CT: control target
= control target key end

     0   :  { %s2072_s27 = smov 0   ;;  %s2485_s0 = inlined_call_operand.vmem [shape: bf16[64,64], index: 0, kind: input, shape index: {}]   ;;  %s2486_s1 = inlined_call_operand.vmem [shape: bf16[64,256], index: 1, kind: input, shape index: {}]   ;;  %s2487_s2 = inlined_call_operand.vmem [shape: bf16[64,128], index: 2, kind: input, shape index: {}]   ;;  %s2488_s3 = inlined_call_operand.vmem [shape: f32[64,128], index: 3, kind: input, shape index: {}]   ;;  %s2489_s4 = inlined_call_operand.vmem [shape: f32[64,1], index: 4, kind: input, shape index: {}]   ;;  %s2490_s5 = inlined_call_operand.vmem [shape: f32[64,1], index: 5, kind: input, shape index: {}]   ;;  %s2491_s6 = inlined_call_operand.vmem [shape: f32[128,128], index: 6, kind: input, shape index: {}]   ;;  %s2492_s7 = inlined_call_operand.vmem [shape: f32[1,128], index: 7, kind: input, shape index: {}]   ;;  %s2493_s8 = inlined_call_operand.vmem [shape: f32[128,128], index: 8, kind: input, shape index: {}]   ;;  %s2494_s9 = inlined_call_operand.vmem [shape: f32[1,128], index: 9, kind: input, shape index: {}]   ;;  %s2495_s10 = inlined_call_operand.vmem [shape: f32[128,128], index: 10, kind: input, shape index: {}]   ;;  %s2496_s11 = inlined_call_operand.vmem [shape: f32[128,128], index: 11, kind: input, shape index: {}]   ;;  %s2497_s12 = inlined_call_operand.vmem [shape: f32[1,128], index: 12, kind: input, shape index: {}]   ;;  %s2498_s13 = inlined_call_operand.vmem [shape: f32[128,128], index: 13, kind: input, shape index: {}]   ;;  %s2499_s14 = inlined_call_operand.vmem [shape: f32[1,128], index: 14, kind: input, shape index: {}]   ;;  %s2500_s15 = inlined_call_operand.vmem [shape: f32[1,128], index: 15, kind: input, shape index: {}]   ;;  %s2501_s16 = inlined_call_operand.vmem [shape: f32[1,128], index: 16, kind: input, shape index: {}]   ;;  %s2502_s17 = inlined_call_operand.vmem [shape: f32[1,128], index: 17, kind: input, shape index: {}]   ;;  %s2503_s18 = inlined_call_operand.vmem [shape: f32[64,128], index: 18, kind: output, shape index: {}]  }
   0x1   :  { %2507 = sst [smem:[#allocation2_spill]] %s2485_s0 }
   0x2   :  { %2508 = sst [smem:[#allocation3_spill]] %s2486_s1 }
   0x3   :  { %2509 = sst [smem:[#allocation4_spill]] %s2487_s2 }
   0x4   :  { %2510 = sst [smem:[#allocation5_spill]] %s2490_s5 }
   0x5   :  { %2511 = sst [smem:[#allocation6_spill]] %s2502_s17 }
   0x6   :  { %2512 = sst [smem:[#allocation7_spill]] %s2503_s18 }
   0x7 LB: > { %s2506_s28 = sadd.s32 4294967295, %s1972_s27   ;;  %p1589_p0 = scmp.ge.s32.totalorder %s1972_s27, 1  ;;  %s1972_s27 = sphi %s2072_s27, %s28_s27  }
   0x8   : > { %p546_p1 = scmp.lt.s32.totalorder %s1972_s27, 5 }
   0xa   : > { %p547_p2 = pnand %p1589_p0, %p546_p1 }
   0xb   : > { %s2513_s0 = sld [smem:[#allocation3_spill]] (!%p547_p2)  ;;  %s1590_s19 = sshll.u32 (!%p547_p2), %s2506_s28, 1 }
   0xc   : > { %550 = sbr.rel (%p547_p2) target bundleno = 1023 (0x3ff), region = 92  ;;  %p616_p3 = scmp.lt.s32.totalorder (!%p547_p2), %s1590_s19, 7 }
   0xd   : > { %s2514_s5 = sld [smem:[#allocation5_spill]] (!%p547_p2) }
   0xe   : > { %s2515_s21 = sld [smem:[#allocation2_spill]] (!%p547_p2) }
   0xf   : > { %s2517_s2 = sld [smem:[#allocation4_spill]] (!%p547_p2) }
  0x11   : > { %v1941_v0 = vld [vmem:[%s2513_s0 + $0x34] ss:$8 sps:$4 sm:$0xff]   ;;  %v1943_v1 = vld [vmem:[%s2513_s0 + $0x30] ss:$8 sps:$4 sm:$0xff]   ;;  %v1974_v2 = vmov 0   ;;  %s2521_s19 = smov (!%p616_p3, %s1590_s19), 7 }
  0x12   : > { %743 = vmatprep.mubr.bf16.mxu0 %v1974_v2  ;;  %1939 = vset.pattern.permute.xlu0 %v1974_v2  ;;  %v1944_v3 = vld [vmem:[%s2513_s0 + $0x24] ss:$8 sps:$4 sm:$0xff]   ;;  %v1946_v4 = vld [vmem:[%s2513_s0 + $0x20] ss:$8 sps:$4 sm:$0xff]   ;;  %v1947_v5 = vld [vmem:[%s2513_s0 + $0x14] ss:$8 sps:$4 sm:$0xff]  }
  0x13   : > { %719 = vmatprep.subr.bf16.mxu0 %v1941_v0  ;;  %1940 = vset.pattern.permute.xlu1 %v1974_v2  ;;  %s1591_s26 = sshll.u32 %s2521_s19, 2  ;;  %s2100_s29 = sshll.u32 %s2521_s19, 3  ;;  %v769_v6 = vld [vmem:[%s2491_s6 + $0x78] sm:$0xff]  ;;  %v768_v7 = vld [vmem:[%s2491_s6 + $0x70] sm:$0xff]  ;;  %v1950_v10 = vld [vmem:[%s2513_s0 + $0x4] ss:$8 sps:$4 sm:$0xff]  }
  0x14   : > { %720 = vmatpush1.bf16.msra.mxu0 %v1943_v1  ;;  %s637_s22 = scalar_lea.vmem %s2514_s5, %s2100_s29  ;;  %1729 = vmatprep.subr.mxu1 %v769_v6  ;;  %v1949_v8 = vld [vmem:[%s2513_s0 + $0x10] ss:$8 sps:$4 sm:$0xff]   ;;  %s619_s28 = scalar_lea.vmem %s2515_s21, %s1591_s26  ;;  %v767_v11 = vld [vmem:[%s2491_s6 + $0x68] sm:$0xff]  ;;  %v766_v16 = vld [vmem:[%s2491_s6 + $0x60] sm:$0xff]  ;;  %vm707_vm0 = vcmask 523264   ;;  %vm1976_vm1 = vmmov 0  }
  0x15   : > { %721 = vmatprep.subr.bf16.mxu0 %v1944_v3  ;;  %v870_v9 = vld [vmem:[%s637_s22] sm:$0xff]  ;;  %1730 = vmatpush3.msra.mxu1 %v769_v6  ;;  %v871_v12 = vld [vmem:[%s637_s22 + $0x8] sm:$0xff]  ;;  %s2128_s25 = scalar_lea.vmem %s2488_s3, %s2100_s29  ;;  %v765_v18 = vld [vmem:[%s2491_s6 + $0x58] sm:$0xff]  ;;  %s2516_s19 = sadd.s32 4294967295, %s1972_s27  }
  0x16   : > { %874 = vperm.xlu0 %1939, %v870_v9   ;;  %1731 = vmatprep.subr.mxu1 %v768_v7  ;;  %v1952_v13 = vld [vmem:[%s2513_s0] ss:$8 sps:$4 sm:$0xff]   ;;  %v2135_v15 = vld [vmem:[%s619_s28 + $0x4] sm:$0xf]  ;;  %v899_v19 = vld [vmem:[%s2493_s8 + $0x78] sm:$0xff] }
  0x17   : > { %1732 = vmatpush3.msra.mxu1 %v768_v7  ;;  %v2133_v14 = vld [vmem:[%s619_s28] sm:$0xf]  ;;  %v764_v21 = vld [vmem:[%s2491_s6 + $0x50] sm:$0xff]  ;;  %v763_v22 = vld [vmem:[%s2491_s6 + $0x48] sm:$0xff]  ;;  %s2290_s28 = sshll.u32 %s2516_s19, 4  ;;  %vm1392_vm4 = vcmp.gt.bf16.partialorder %v2135_v15, 0 }
  0x18   : > { %722 = vmatpush1.bf16.msra.mxu0 %v1946_v4  ;;  %1733 = vmatprep.subr.mxu1 %v767_v11  ;;  %v2141_v17 = vld [vmem:[%s2128_s25] sm:$0xff]  ;;  %v1600_v20 = vcombine.low %v2133_v14, %v2135_v15  ;;  %v898_v23 = vld [vmem:[%s2493_s8 + $0x70] sm:$0xff]  ;;  %v761_v25 = vld [vmem:[%s2491_s6 + $0x38] sm:$0xff]  ;;  %s1284_s30 = sshra.s32 %s2290_s28, 3  ;;  %vm1391_vm6 = vcmp.gt.bf16.partialorder %v2133_v14, 0 }
  0x19   : > { %723 = vmatprep.subr.bf16.mxu0 %v1947_v5  ;;  %1734 = vmatpush3.msra.mxu1 %v767_v11  ;;  %v762_v24 = vld [vmem:[%s2491_s6 + $0x40] sm:$0xff]  ;;  %v897_v26 = vld [vmem:[%s2493_s8 + $0x68] sm:$0xff]  ;;  %v760_v28 = vld [vmem:[%s2491_s6 + $0x30] sm:$0xff]  ;;  %s1615_s1 = sshll.u32 %s1284_s30, 2  ;;  %s2518_s30 = sld [smem:[#allocation6_spill]] }
  0x1a   : > { %879 = vperm.xlu0 %1939, %v871_v12   ;;  %1761 = vmatprep.mubr.f32.mxu1 %v2141_v17  ;;  %v896_v27 = vld [vmem:[%s2493_s8 + $0x60] sm:$0xff]  ;;  %v895_v29 = vld [vmem:[%s2493_s8 + $0x58] sm:$0xff]  ;;  %v759_v30 = vld [vmem:[%s2491_s6 + $0x28] sm:$0xff]  ;;  %s1287_s23 = scalar_lea.vmem %s2517_s2, %s1615_s1 }
  0x1b   : > { %1735 = vmatprep.subr.mxu1 %v766_v16  ;;  %v894_v31 = vld [vmem:[%s2493_s8 + $0x50] sm:$0xff]  ;;  %v758_v32 = vld [vmem:[%s2491_s6 + $0x20] sm:$0xff]  ;;  %v893_v33 = vld [vmem:[%s2493_s8 + $0x48] sm:$0xff] }
  0x1c   : > { %724 = vmatpush1.bf16.msra.mxu0 %v1949_v8  ;;  %1736 = vmatpush3.msra.mxu1 %v766_v16  ;;  %v757_v34 = vld [vmem:[%s2491_s6 + $0x18] sm:$0xff]  ;;  %v892_v35 = vld [vmem:[%s2493_s8 + $0x40] sm:$0xff]  ;;  %v756_v36 = vld [vmem:[%s2491_s6 + $0x10] sm:$0xff] }
  0x1d   : > { %725 = vmatprep.subr.bf16.mxu0 %v1950_v10  ;;  %1737 = vmatprep.subr.mxu1 %v765_v18  ;;  %v891_v37 = vld [vmem:[%s2493_s8 + $0x38] sm:$0xff]  ;;  %v755_v38 = vld [vmem:[%s2491_s6 + $0x8] sm:$0xff]  ;;  %v890_v39 = vld [vmem:[%s2493_s8 + $0x30] sm:$0xff] }
  0x1e   : > { %1738 = vmatpush3.msra.mxu1 %v765_v18  ;;  %v754_v40 = vld [vmem:[%s2491_s6] sm:$0xff]  ;;  %v889_v41 = vld [vmem:[%s2493_s8 + $0x28] sm:$0xff]  ;;  %v997_v42 = vld [vmem:[%s2495_s10 + $0x78] sm:$0xff] }
  0x1f   : > { %1739 = vmatprep.subr.mxu1 %v764_v21  ;;  %v2220_v43 = vld [vmem:[%s2128_s25 + $0x8] sm:$0xff]  ;;  %v888_v44 = vld [vmem:[%s2493_s8 + $0x20] sm:$0xff]  ;;  %v996_v45 = vld [vmem:[%s2495_s10 + $0x70] sm:$0xff] }
  0x20   : > { %726 = vmatpush1.bf16.msra.mxu0 %v1952_v13  ;;  %1740 = vmatpush3.msra.mxu1 %v764_v21  ;;  %v995_v46 = vld [vmem:[%s2495_s10 + $0x68] sm:$0xff]  ;;  %v994_v47 = vld [vmem:[%s2495_s10 + $0x60] sm:$0xff]  ;;  %v993_v48 = vld [vmem:[%s2495_s10 + $0x58] sm:$0xff] }
  0x21   : > { %1764 = vmatprep.subr.mxu0 %v899_v19  ;;  %1741 = vmatprep.subr.mxu1 %v763_v22  ;;  %v992_v49 = vld [vmem:[%s2495_s10 + $0x50] sm:$0xff]  ;;  %v991_v50 = vld [vmem:[%s2495_s10 + $0x48] sm:$0xff]  ;;  %v990_v51 = vld [vmem:[%s2495_s10 + $0x40] sm:$0xff] }
  0x22   : > { %1742 = vmatpush3.msra.mxu1 %v763_v22  ;;  %v989_v52 = vld [vmem:[%s2495_s10 + $0x38] sm:$0xff]  ;;  %v988_v53 = vld [vmem:[%s2495_s10 + $0x30] sm:$0xff]  ;;  %v987_v54 = vld [vmem:[%s2495_s10 + $0x28] sm:$0xff] }
  0x23   : > { %1609 = vmatmul.mubr.msk.bf16.vlgmr.msra.gmra.mxu0 %vm707_vm0, %v1600_v20  ;;  %1743 = vmatprep.subr.mxu1 %v762_v24  ;;  %v887_v55 = vld [vmem:[%s2493_s8 + $0x18] sm:$0xff]  ;;  %v986_v56 = vld [vmem:[%s2495_s10 + $0x20] sm:$0xff]  ;;  %v886_v57 = vld [vmem:[%s2493_s8 + $0x10] sm:$0xff] }
  0x24   : > { %1765 = vmatpush3.msra.mxu0 %v899_v19  ;;  %1744 = vmatpush3.msra.mxu1 %v762_v24  ;;  %v985_v58 = vld [vmem:[%s2495_s10 + $0x18] sm:$0xff]  ;;  %v885_v59 = vld [vmem:[%s2493_s8 + $0x8] sm:$0xff]  ;;  %v984_v60 = vld [vmem:[%s2495_s10 + $0x10] sm:$0xff] }
  0x25   : > { %1766 = vmatprep.subr.mxu0 %v898_v23  ;;  %1745 = vmatprep.subr.mxu1 %v761_v25  ;;  %v884_v61 = vld [vmem:[%s2493_s8] sm:$0xff]  ;;  %v983_v62 = vld [vmem:[%s2495_s10 + $0x8] sm:$0xff]  ;;  %v1092_v63 = vld [vmem:[%s2496_s11 + $0x78] sm:$0xff] }
  0x26   : > { %1767 = vmatpush3.msra.mxu0 %v898_v23  ;;  %1746 = vmatpush3.msra.mxu1 %v761_v25  ;;  %v982_v0 = vld [vmem:[%s2495_s10] sm:$0xff]  ;;  %v1091_v20 = vld [vmem:[%s2496_s11 + $0x70] sm:$0xff]  ;;  %v1090_v21 = vld [vmem:[%s2496_s11 + $0x68] sm:$0xff] }
  0x27   : > { %1768 = vmatprep.subr.mxu0 %v897_v26  ;;  %1747 = vmatprep.subr.mxu1 %v760_v28  ;;  %v1626_v1 = vld [vmem:[%s1287_s23] sm:$0xff]   ;;  %v1087_v23 = vld [vmem:[%s2496_s11 + $0x50] sm:$0xff]  ;;  %v1086_v24 = vld [vmem:[%s2496_s11 + $0x48] sm:$0xff]  ;;  %s631_s23 = scalar_lea.vmem %s2489_s4, %s2100_s29 }
  0x28   : > { %1769 = vmatpush3.msra.mxu0 %v897_v26  ;;  %1748 = vmatpush3.msra.mxu1 %v760_v28  ;;  %v1616_v3 = vld [vmem:[%s2501_s16] ss:$0 sm:$0xff]  ;;  %v1627_v4 = vunpack.c.l.bf16 %v1626_v1  ;;  %v1628_v5 = vunpack.c.h.bf16 %v1626_v1  ;;  %v1084_v26 = vld [vmem:[%s2496_s11 + $0x38] sm:$0xff]  ;;  %v1082_v28 = vld [vmem:[%s2496_s11 + $0x28] sm:$0xff] }
  0x29   : > { %1770 = vmatprep.subr.mxu0 %v896_v27  ;;  %1749 = vmatprep.subr.mxu1 %v759_v30  ;;  %v1089_v22 = vld [vmem:[%s2496_s11 + $0x60] sm:$0xff] }
  0x2a   : > { %1771 = vmatpush3.msra.mxu0 %v896_v27  ;;  %1750 = vmatpush3.msra.mxu1 %v759_v30  ;;  %v1299_v6 = vmul.f32 %v1627_v4, %v1616_v3  ;;  %v1300_v7 = vmul.f32 %v1628_v5, %v1616_v3  ;;  %v1085_v25 = vld [vmem:[%s2496_s11 + $0x40] sm:$0xff]  ;;  %v1083_v27 = vld [vmem:[%s2496_s11 + $0x30] sm:$0xff]  ;;  %v1080_v30 = vld [vmem:[%s2496_s11 + $0x18] sm:$0xff] }
  0x2b   : > { %1772 = vmatprep.subr.mxu0 %v895_v29  ;;  %1751 = vmatprep.subr.mxu1 %v758_v32 }
  0x2c   : > { %1773 = vmatpush3.msra.mxu0 %v895_v29  ;;  %1752 = vmatpush3.msra.mxu1 %v758_v32  ;;  %v1081_v29 = vld [vmem:[%s2496_s11 + $0x20] sm:$0xff]  ;;  %v1078_v32 = vld [vmem:[%s2496_s11 + $0x8] sm:$0xff] }
  0x2d   : > { %1774 = vmatprep.subr.mxu0 %v894_v31  ;;  %1753 = vmatprep.subr.mxu1 %v757_v34 }
  0x2e   : > { %1775 = vmatpush3.msra.mxu0 %v894_v31  ;;  %1754 = vmatpush3.msra.mxu1 %v757_v34  ;;  %v1079_v31 = vld [vmem:[%s2496_s11 + $0x10] sm:$0xff]  ;;  %v2352_v34 = vld [vmem:[%s2517_s2 + $0x18] sm:$0xff]  }
  0x2f   : > { %1776 = vmatprep.subr.mxu0 %v893_v33  ;;  %1755 = vmatprep.subr.mxu1 %v756_v36 }
  0x30   : > { %1777 = vmatpush3.msra.mxu0 %v893_v33  ;;  %1756 = vmatpush3.msra.mxu1 %v756_v36  ;;  %v1077_v33 = vld [vmem:[%s2496_s11] sm:$0xff]  ;;  %v1975_v36 = vmov 0.0  }
  0x31   : > { %1778 = vmatprep.subr.mxu0 %v892_v35  ;;  %1757 = vmatprep.subr.mxu1 %v755_v38 }
  0x32   : > { %1779 = vmatpush3.msra.mxu0 %v892_v35  ;;  %1758 = vmatpush3.msra.mxu1 %v755_v38  ;;  %v2370_v38 = vld [vmem:[%s2517_s2 + $0x8] sm:$0xff]  }
  0x33   : > { %1780 = vmatprep.subr.mxu0 %v891_v37  ;;  %1759 = vmatprep.subr.mxu1 %v754_v40 }
  0x34   : > { %1781 = vmatpush3.msra.mxu0 %v891_v37  ;;  %1760 = vmatpush3.msra.mxu1 %v754_v40  ;;  %v2363_v37 = vld [vmem:[%s2517_s2 + $0x10] sm:$0xff]   ;;  %v1305_v40 = vld [vmem:[%s2500_s15] sm:$0x1] }
  0x35   : > { %1782 = vmatprep.subr.mxu0 %v890_v39  ;;  %1799 = vmatprep.subr.mxu1 %v997_v42 }
  0x36   : > { %1783 = vmatpush3.msra.mxu0 %v890_v39  ;;  %1762 = vmatmul.mubr.f32.vlgmr.msra.gmra.mxu1 %v2220_v43  ;;  %v2377_v39 = vld [vmem:[%s2517_s2] sm:$0xff]  }
  0x37   : > { %1784 = vmatprep.subr.mxu0 %v889_v41  ;;  %1800 = vmatpush3.msra.mxu1 %v997_v42  ;;  %v1192_v42 = vld [vmem:[%s2498_s13 + $0x78] sm:$0xff] }
  0x38   : > { %1785 = vmatpush3.msra.mxu0 %v889_v41  ;;  %1801 = vmatprep.subr.mxu1 %v996_v45  ;;  %v1306_v41 = vpack.c.bf16 %v1305_v40, %v1305_v40 }
  0x39   : > { %1786 = vmatprep.subr.mxu0 %v888_v44  ;;  %1802 = vmatpush3.msra.mxu1 %v996_v45  ;;  %v1189_v45 = vld [vmem:[%s2498_s13 + $0x60] sm:$0xff] }
  0x3a   : > { %1787 = vmatpush3.msra.mxu0 %v888_v44  ;;  %1831 = vmatprep.mubr.f32.mxu1 %v2141_v17  ;;  %v1190_v44 = vld [vmem:[%s2498_s13 + $0x68] sm:$0xff] }
  0x3b   : > { %1803 = vmatprep.subr.mxu1 %v995_v46  ;;  %1788 = vmatprep.subr.mxu0 %v887_v55 }
  0x3c   : > { %1804 = vmatpush3.msra.mxu1 %v995_v46  ;;  %1789 = vmatpush3.msra.mxu0 %v887_v55  ;;  %v1188_v46 = vld [vmem:[%s2498_s13 + $0x58] sm:$0xff]  ;;  %v1179_v55 = vld [vmem:[%s2498_s13 + $0x10] sm:$0xff] }
  0x3d   : > { %1805 = vmatprep.subr.mxu1 %v994_v47  ;;  %1790 = vmatprep.subr.mxu0 %v886_v57 }
  0x3e   : > { %1806 = vmatpush3.msra.mxu1 %v994_v47  ;;  %1791 = vmatpush3.msra.mxu0 %v886_v57  ;;  %v1187_v47 = vld [vmem:[%s2498_s13 + $0x50] sm:$0xff]  ;;  %v1177_v57 = vld [vmem:[%s2498_s13] sm:$0xff] }
  0x3f   : > { %1807 = vmatprep.subr.mxu1 %v993_v48  ;;  %1792 = vmatprep.subr.mxu0 %v885_v59 }
  0x40   : > { %1808 = vmatpush3.msra.mxu1 %v993_v48  ;;  %1793 = vmatpush3.msra.mxu0 %v885_v59  ;;  %v1186_v48 = vld [vmem:[%s2498_s13 + $0x48] sm:$0xff] }
  0x41   : > { %1809 = vmatprep.subr.mxu1 %v992_v49  ;;  %1794 = vmatprep.subr.mxu0 %v884_v61 }
  0x42   : > { %1810 = vmatpush3.msra.mxu1 %v992_v49  ;;  %1795 = vmatpush3.msra.mxu0 %v884_v61  ;;  %v1185_v49 = vld [vmem:[%s2498_s13 + $0x40] sm:$0xff] }
  0x43   : > { %1811 = vmatprep.subr.mxu1 %v991_v50  ;;  %1834 = vmatprep.subr.mxu0 %v1092_v63 }
  0x44   : > { %1812 = vmatpush3.msra.mxu1 %v991_v50  ;;  %1301 = vadd.xlane.f32.xlu1 %v1299_v6  ;;  %v1184_v50 = vld [vmem:[%s2498_s13 + $0x38] sm:$0xff] }
  0x45   : > { %1813 = vmatprep.subr.mxu1 %v990_v51 }
  0x46   : > { %1814 = vmatpush3.msra.mxu1 %v990_v51  ;;  %v1183_v51 = vld [vmem:[%s2498_s13 + $0x30] sm:$0xff] }
  0x47   : > { %1815 = vmatprep.subr.mxu1 %v989_v52 }
  0x48   : > { %1816 = vmatpush3.msra.mxu1 %v989_v52  ;;  %1303 = vadd.xlane.f32.xlu1 %v1300_v7  ;;  %v1182_v52 = vld [vmem:[%s2498_s13 + $0x28] sm:$0xff]  ;;  %v1388_v7 = vstv %s2290_s28  ;;  %s2519_s28 = sld [smem:[#allocation7_spill]] }
  0x49   : > { %1817 = vmatprep.subr.mxu1 %v988_v53 }
  0x4a   : > { %1818 = vmatpush3.msra.mxu1 %v988_v53  ;;  %v1181_v53 = vld [vmem:[%s2498_s13 + $0x20] sm:$0xff] }
  0x4b   : > { %1819 = vmatprep.subr.mxu1 %v987_v54 }
  0x4c   : > { %1820 = vmatpush3.msra.mxu1 %v987_v54  ;;  %v1180_v54 = vld [vmem:[%s2498_s13 + $0x18] sm:$0xff] }
  0x4d   : > { %1821 = vmatprep.subr.mxu1 %v986_v56 }
  0x4e   : > { %1822 = vmatpush3.msra.mxu1 %v986_v56  ;;  %v1178_v56 = vld [vmem:[%s2498_s13 + $0x8] sm:$0xff]  ;;  %s643_s21 = scalar_lea.vmem %s2519_s28, %s2100_s29 }
  0x4f   : > { %1823 = vmatprep.subr.mxu1 %v985_v58 }
  0x50   : > { %1824 = vmatpush3.msra.mxu1 %v985_v58 }
  0x51   : > { %1825 = vmatprep.subr.mxu1 %v984_v60 }
  0x52   : > { %1826 = vmatpush3.msra.mxu1 %v984_v60  ;;  %v1612_v60 = vld [vmem:[%s2497_s12] ss:$0 sm:$0xff] }
  0x53   : > { %1827 = vmatprep.subr.mxu1 %v983_v62 }
  0x54   : > { %1828 = vmatpush3.msra.mxu1 %v983_v62 }
  0x55   : > { %1829 = vmatprep.subr.mxu1 %v982_v0 }
  0x56   : > { %1830 = vmatpush3.msra.mxu1 %v982_v0  ;;  %v1371_v0 = vlaneseq }
  0x57   : > { %1832 = vmatmul.mubr.f32.vlgmr.msra.gmra.mxu1 %v2220_v43  ;;  %1869 = vmatprep.subr.mxu1 %v1192_v42 }
  0x58   : > { %1870 = vmatpush3.msra.mxu1 %v1192_v42  ;;  %v1372_v5 = vshrl.u32 %v1371_v0, 7 }
  0x5a   : > { %v1387_v6 = vadd.s32 8, %v1372_v5 }
  0x91   : > { %v875_v8 = vpop.permute.xlu0 %874 }
  0x95   : > { %v880_v13 = vpop.permute.xlu0 %879 }
  0xe3   : > { %v2299_v9 = vpop.f32.mrf.mxu0 }
  0xe5   : > { %v747_v10 = vpop.f32.mrf.mxu0 }
  0xe6   : > { %v882_v11 = vmul.f32 %v875_v8, %v747_v10  ;;  %v1075_v19 = vadd.f32 %v747_v10, %v2141_v17  ;;  %v1088_v17 = vld [vmem:[%s2496_s11 + $0x58] sm:$0xff]  ;;  %v1390_v8 = vadd.s32 %v1388_v7, %v1387_v6  ;;  %v1384_v10 = vand.u32 127, %v1371_v0 }
  0xe7   : > { %v2301_v12 = vpop.f32.mrf.mxu0 }
  0xe8   : > { %1796 = vmatprep.mubr.f32.mxu0 %v882_v11  ;;  %v1389_v11 = vadd.s32 %v1388_v7, %v1372_v5  ;;  %vm1394_vm2 = vcmp.eq.s32.totalorder %v1384_v10, %v1390_v8 }
  0xe9   : > { %v751_v16 = vpop.f32.mrf.mxu0  ;;  %vm1396_vm5 = vmpackc.low %vm1394_vm2, %vm1394_vm2 }
  0xea   : > { %v883_v18 = vmul.f32 %v880_v13, %v751_v16  ;;  %v1076_v35 = vadd.f32 %v751_v16, %v2220_v43  ;;  %v1191_v43 = vld [vmem:[%s2498_s13 + $0x70] sm:$0xff]  ;;  %vm1393_vm3 = vcmp.eq.s32.totalorder %v1384_v10, %v1389_v11  ;;  %vm1398_vm8 = vmor %vm1392_vm4, %vm1396_vm5  ;;  %v1302_v13 = vpop.xlane.xlu1 %1301  ;;  %v1373_v16 = vsub.s32 0, %v1372_v5 }
  0xeb   : > { %1871 = vmatprep.subr.mxu1 %v1191_v43  ;;  %vm1395_vm7 = vmpackc.low %vm1393_vm3, %vm1393_vm3 }
  0xec   : > { %1797 = vmatmul.mubr.f32.vlgmr.msra.gmra.mxu0 %v883_v18  ;;  %1872 = vmatpush3.msra.mxu1 %v1191_v43  ;;  %vm1397_vm9 = vmor %vm1391_vm6, %vm1395_vm7  ;;  %v1400_v18 = vsel %vm1398_vm8, 65537, %v1974_v2 }
  0xed   : > { %1835 = vmatpush3.msra.mxu0 %v1092_v63  ;;  %1866 = vmatprep.mubr.f32.mxu0 %v1075_v19  ;;  %v1399_v19 = vsel %vm1397_vm9, 65537, %v1974_v2 }
  0xee   : > { %1836 = vmatprep.subr.mxu0 %v1091_v20  ;;  %1873 = vmatprep.subr.mxu1 %v1190_v44 }
  0xef   : > { %1837 = vmatpush3.msra.mxu0 %v1091_v20  ;;  %1874 = vmatpush3.msra.mxu1 %v1190_v44  ;;  %v652_v44 = vld [vmem:[%s631_s23] sm:$0xff] }
  0xf0   : > { %1838 = vmatprep.subr.mxu0 %v1090_v21  ;;  %1875 = vmatprep.subr.mxu1 %v1189_v45 }
  0xf1   : > { %1839 = vmatpush3.msra.mxu0 %v1090_v21  ;;  %1876 = vmatpush3.msra.mxu1 %v1189_v45  ;;  %v1304_v21 = vpop.xlane.xlu1 %1303  ;;  %v653_v45 = vld [vmem:[%s631_s23 + $0x8] sm:$0xff] }
  0xf2   : > { %1840 = vmatprep.subr.mxu0 %v1089_v22  ;;  %1877 = vmatprep.subr.mxu1 %v1188_v46 }
  0xf3   : > { %1841 = vmatpush3.msra.mxu0 %v1089_v22  ;;  %1878 = vmatpush3.msra.mxu1 %v1188_v46  ;;  %v1402_v22 = vunpack.c.l.b16 %v1400_v18  ;;  %v1621_v18 = vld [vmem:[%s2518_s30] ss:$0 sm:$0xff] }
  0xf4   : > { %1842 = vmatprep.subr.mxu0 %v1088_v17  ;;  %1879 = vmatprep.subr.mxu1 %v1187_v47 }
  0xf5   : > { %1843 = vmatpush3.msra.mxu0 %v1088_v17  ;;  %1880 = vmatpush3.msra.mxu1 %v1187_v47  ;;  %v1401_v17 = vunpack.c.l.b16 %v1399_v19  ;;  %vm1404_vm10 = vcmp.ne.s32.totalorder %v1402_v22, 0 }
  0xf6   : > { %1844 = vmatprep.subr.mxu0 %v1087_v23  ;;  %1881 = vmatprep.subr.mxu1 %v1186_v48 }
  0xf7   : > { %1845 = vmatpush3.msra.mxu0 %v1087_v23  ;;  %1882 = vmatpush3.msra.mxu1 %v1186_v48  ;;  %vm1403_vm11 = vcmp.ne.s32.totalorder %v1401_v17, 0 }
  0xf8   : > { %1846 = vmatprep.subr.mxu0 %v1086_v24  ;;  %1883 = vmatprep.subr.mxu1 %v1185_v49 }
  0xf9   : > { %1847 = vmatpush3.msra.mxu0 %v1086_v24  ;;  %1884 = vmatpush3.msra.mxu1 %v1185_v49 }
  0xfa   : > { %1848 = vmatprep.subr.mxu0 %v1085_v25  ;;  %1885 = vmatprep.subr.mxu1 %v1184_v50 }
  0xfb   : > { %1849 = vmatpush3.msra.mxu0 %v1085_v25  ;;  %1886 = vmatpush3.msra.mxu1 %v1184_v50 }
  0xfc   : > { %1850 = vmatprep.subr.mxu0 %v1084_v26  ;;  %1887 = vmatprep.subr.mxu1 %v1183_v51 }
  0xfd   : > { %1851 = vmatpush3.msra.mxu0 %v1084_v26  ;;  %1888 = vmatpush3.msra.mxu1 %v1183_v51 }
  0xfe   : > { %1852 = vmatprep.subr.mxu0 %v1083_v27  ;;  %1889 = vmatprep.subr.mxu1 %v1182_v52 }
  0xff   : > { %1853 = vmatpush3.msra.mxu0 %v1083_v27  ;;  %1890 = vmatpush3.msra.mxu1 %v1182_v52 }
 0x100   : > { %1854 = vmatprep.subr.mxu0 %v1082_v28  ;;  %1891 = vmatprep.subr.mxu1 %v1181_v53 }
 0x101   : > { %1855 = vmatpush3.msra.mxu0 %v1082_v28  ;;  %1892 = vmatpush3.msra.mxu1 %v1181_v53  ;;  %v1763_v53 = vpop.f32.mrf.mxu1 }
 0x102   : > { %1856 = vmatprep.subr.mxu0 %v1081_v29  ;;  %1893 = vmatprep.subr.mxu1 %v1180_v54 }
 0x103   : > { %1857 = vmatpush3.msra.mxu0 %v1081_v29  ;;  %1894 = vmatpush3.msra.mxu1 %v1180_v54 }
 0x104   : > { %1858 = vmatprep.subr.mxu0 %v1080_v30  ;;  %1895 = vmatprep.subr.mxu1 %v1179_v55 }
 0x105   : > { %1859 = vmatpush3.msra.mxu0 %v1080_v30  ;;  %1896 = vmatpush3.msra.mxu1 %v1179_v55  ;;  %v836_v55 = vpop.f32.mrf.mxu1 }
 0x106   : > { %1860 = vmatprep.subr.mxu0 %v1079_v31  ;;  %1897 = vmatprep.subr.mxu1 %v1178_v56 }
 0x107   : > { %1861 = vmatpush3.msra.mxu0 %v1079_v31  ;;  %1898 = vmatpush3.msra.mxu1 %v1178_v56 }
 0x108   : > { %1862 = vmatprep.subr.mxu0 %v1078_v32  ;;  %1899 = vmatprep.subr.mxu1 %v1177_v57 }
 0x109   : > { %1863 = vmatpush3.msra.mxu0 %v1078_v32  ;;  %1900 = vmatpush3.msra.mxu1 %v1177_v57 }
 0x10a   : > { %1864 = vmatprep.subr.mxu0 %v1077_v33  ;;  %1916 = vmatprep.subr.bf16.mxu1 %v1975_v36 }
 0x10b   : > { %1865 = vmatpush3.msra.mxu0 %v1077_v33 }
 0x10c   : > { %1867 = vmatmul.mubr.f32.vlgmr.msra.gmra.mxu0 %v1076_v35  ;;  %1904 = vmatprep.subr.bf16.mxu0 %v1975_v36 }
 0x10d   : > { %1905 = vmatpush3.bf16.xpose.msra.mxu0 %v2352_v34  ;;  %1912 = vmatprep.mubr.msk.bf16.mxu0 %vm1976_vm1, %v1975_v36 }
 0x10e   : > { %1906 = vmatprep.subr.bf16.mxu0 %v1975_v36 }
 0x115   : > { %1907 = vmatpush3.bf16.xpose.msra.mxu0 %v2363_v37 }
 0x116   : > { %1908 = vmatprep.subr.bf16.mxu0 %v1975_v36 }
 0x11d   : > { %1909 = vmatpush3.bf16.xpose.msra.mxu0 %v2370_v38 }
 0x11e   : > { %1910 = vmatprep.subr.bf16.mxu0 %v1975_v36 }
 0x125   : > { %1911 = vmatpush3.bf16.xpose.msra.mxu0 %v2377_v39 }
 0x12c   : > { %1913 = vmatmul.mubr.bf16.vlgmr.msra.gmra.mxu0 %v1306_v41 }
 0x1ac   : > { %v2432_v58 = vpop.f32.mrf.mxu0 }
 0x1ae   : > { %v2434_v59 = vpop.f32.mrf.mxu0 }
 0x1cc   : > { %v1868_v61 = vpop.f32.mrf.mxu0 }
 0x1cd   : > { %v1172_v62 = vadd.f32 %v1868_v61, %v1612_v60 }
 0x1ce   : > { %v1166_v63 = vpop.f32.mrf.mxu0 }
 0x1cf   : > { %v1167_v1 = vadd.f32 %v1612_v60, %v1166_v63  ;;  %v1176_v4 = vmax.f32 %v1172_v62, 0.0  ;;  %v1833_v62 = vpop.f32.mrf.mxu1 }
 0x1d1   : > { %v1175_v3 = vmax.f32 %v1167_v1, 0.0  ;;  %v1611_v1 = vld [vmem:[%s2494_s9] ss:$0 sm:$0xff] }
 0x1d2   : > { %v974_v5 = vadd.f32 %v1611_v1, %v2434_v59 }
 0x1d3   : > { %1901 = vmatprep.mubr.f32.mxu1 %v1175_v3  ;;  %v1064_v3 = vpop.f32.mrf.mxu1 }
 0x1d4   : > { %1902 = vmatmul.mubr.f32.vlgmr.msra.gmra.mxu1 %v1176_v4  ;;  %v1610_v4 = vld [vmem:[%s2492_s7] ss:$0 sm:$0xff]  ;;  %v1073_v10 = vadd.f32 %v1064_v3, %v974_v5 }
 0x1d5   : > { %1917 = vmatpush3.bf16.msra.mxu1 %v2352_v34  ;;  %1924 = vmatprep.mubr.msk.bf16.mxu1 %vm1976_vm1, %v1975_v36 }
 0x1d6   : > { %1918 = vmatprep.subr.bf16.mxu1 %v1975_v36 }
 0x1d9   : > { %1919 = vmatpush3.bf16.msra.mxu1 %v2363_v37 }
 0x1da   : > { %1920 = vmatprep.subr.bf16.mxu1 %v1975_v36 }
 0x1dd   : > { %1921 = vmatpush3.bf16.msra.mxu1 %v2370_v38 }
 0x1de   : > { %1922 = vmatprep.subr.bf16.mxu1 %v1975_v36 }
 0x1e1   : > { %1923 = vmatpush3.bf16.msra.mxu1 %v2377_v39 }
 0x1ec   : > { %v1365_v20 = vpop.f32.mrf.mxu0 }
 0x1ed   : > { %v1374_v23 = vrot.slane %v1365_v20, %v1373_v16  ;;  %v1613_v16 = vld [vmem:[%s2499_s14] ss:$0 sm:$0xff] }
 0x1ee   : > { %v1914_v24 = vpop.f32.mrf.mxu0 }
 0x1ef   : > { %v1375_v25 = vadd.f32 %v1374_v23, %v1302_v13  ;;  %v1376_v15 = vadd.f32 %v1374_v23, %v1304_v21 }
 0x1f0   : > { %v1368_v26 = vpop.f32.mrf.mxu0 }
 0x1f1   : > { %v1380_v14 = vmul.f32 0.2, %v1376_v15  ;;  %vm1378_vm12 = vcmp.gt.f32.partialorder %v1376_v15, 0.0  ;;  %vm1377_vm13 = vcmp.gt.f32.partialorder %v1375_v25, 0.0  ;;  %v1379_v27 = vmul.f32 0.2, %v1375_v25 }
 0x1f2   : > { %v1915_v28 = vpop.f32.mrf.mxu0 }
 0x1f3   : > { %v1382_v29 = vsel %vm1378_vm12, %v1376_v15, %v1380_v14  ;;  %v1381_v30 = vsel %vm1377_vm13, %v1375_v25, %v1379_v27 }
 0x1f4   : > { %v1406_v31 = vsel %vm1404_vm10, %v1382_v29, -1e+30  ;;  %v1405_v2 = vsel %vm1403_vm11, %v1381_v30, -1e+30 }
 0x1f5   : > { %v1410_v32 = vsel %vm707_vm0, %v1406_v31, -inf  ;;  %v1407_v33 = vsel %vm707_vm0, %v1405_v2, -inf }
 0x1f6   : > { %1411 = vmax.xlane.f32.xlu1 %v1410_v32  ;;  %1408 = vmax.xlane.f32.xlu0 %v1407_v33 }
 0x27f   : > { %v1412_v34 = vpop.xlane.xlu1 %1411  ;;  %v1409_v35 = vpop.xlane.xlu0 %1408 }
 0x280   : > { %v1414_v36 = vsub.f32 %v1406_v31, %v1412_v34  ;;  %v1413_v37 = vsub.f32 %v1405_v2, %v1409_v35 }
 0x282   : > { %v1415_v38 = vmul.f32 1.442695, %v1413_v37  ;;  %v1417_v39 = vmul.f32 1.442695, %v1414_v36 }
 0x284   : > { %1958 = vpow2.f32 %v1415_v38 }
 0x285   : > { %1960 = vpow2.f32 %v1417_v39 }
 0x291   : > { %v1959_v40 = vpop.eup %1958 }
 0x292   : > { %v1419_v41 = vsel %vm707_vm0, %v1959_v40, 0.0  ;;  %v1961_v42 = vpop.eup %1960 }
 0x293   : > { %1420 = vadd.xlane.f32.xlu1 %v1419_v41  ;;  %v1422_v43 = vsel %vm707_vm0, %v1961_v42, 0.0 }
 0x294   : > { %v1903_v6 = vpop.f32.mrf.mxu1 }
 0x295   : > { %v1272_v23 = vadd.f32 %v1903_v6, %v1613_v16 }
 0x296   : > { %v1266_v11 = vpop.f32.mrf.mxu1 }
 0x297   : > { %1423 = vadd.xlane.f32.xlu1 %v1422_v43  ;;  %v1267_v59 = vadd.f32 %v1613_v16, %v1266_v11 }
 0x2a8   : > { %847 = vperm.xlu1 %1940, %v652_v44  }
 0x2ac   : > { %852 = vperm.xlu1 %1940, %v653_v45  }
 0x31c   : > { %v1421_v46 = vpop.xlane.xlu1 %1420 }
 0x31d   : > { %1962 = vrcp.f32 %v1421_v46 }
 0x320   : > { %v1424_v47 = vpop.xlane.xlu1 %1423 }
 0x321   : > { %1964 = vrcp.f32 %v1424_v47 }
 0x324   : > { %v848_v54 = vpop.permute.xlu1 %847 }
 0x325   : > { %v855_v56 = vmul.f32 %v848_v54, %v836_v55 }
 0x327   : > { %v857_v60 = vadd.f32 %v855_v56, %v2299_v9  ;;  %v979_v9 = vadd.f32 %v2432_v58, %v1611_v1 }
 0x328   : > { %v853_v57 = vpop.permute.xlu1 %852 }
 0x329   : > { %v856_v61 = vmul.f32 %v1763_v53, %v853_v57  ;;  %v859_v63 = vmul.f32 %v857_v60, %v848_v54  ;;  %v1074_v19 = vadd.f32 %v1833_v62, %v979_v9 }
 0x32a   : > { %v1963_v48 = vpop.eup %1962 }
 0x32b   : > { %v1427_v50 = vmul.f32 %v1963_v48, %v1959_v40  ;;  %v858_v0 = vadd.f32 %v856_v61, %v2301_v12  ;;  %v868_v7 = vadd.f32 %v1610_v4, %v859_v63 }
 0x32d   : > { %v860_v8 = vmul.f32 %v858_v0, %v853_v57  ;;  %v1481_v13 = vadd.f32 %v1073_v10, %v868_v7 }
 0x32e   : > { %v1965_v49 = vpop.eup %1964 }
 0x32f   : > { %v1428_v51 = vmul.f32 %v1965_v49, %v1961_v42  ;;  %v869_v12 = vadd.f32 %v1610_v4, %v860_v8  ;;  %v1483_v17 = vadd.f32 %v1481_v13, %v1267_v59 }
 0x331   : > { %v1429_v52 = vpack.c.bf16 %v1428_v51, %v1427_v50  ;;  %v1482_v21 = vadd.f32 %v1074_v19, %v869_v12 }
 0x333   : > { %1925 = vmatmul.mubr.msk.bf16.vlgmr.msra.gmra.mxu1 %vm707_vm0, %v1429_v52  ;;  %v1484_v14 = vadd.f32 %v1482_v21, %v1272_v23 }
 0x3f3   : > { %v1474_v20 = vpop.f32.mrf.mxu1 }
 0x3f4   : > { %v1475_v22 = vadd.f32 %v1621_v18, %v1474_v20 }
 0x3f5   : > { %v1926_v58 = vpop.f32.mrf.mxu1 }
 0x3f6   : > { %v1485_v24 = vadd.f32 %v1483_v17, %v1475_v22 }
 0x3f7   : > { %v1477_v25 = vpop.f32.mrf.mxu1 }
 0x3f8   : > { %v1487_v15 = vmax.f32 %v1485_v24, 0.0  ;;  %v1478_v26 = vadd.f32 %v1621_v18, %v1477_v25 }
 0x3f9   : > { %v1927_v27 = vpop.f32.mrf.mxu1 }
 0x3fa   : > { %1489 = vst [vmem:[%s643_s21] sm:$0xff] %v1487_v15  ;;  %v1486_v28 = vadd.f32 %v1484_v14, %v1478_v26 }
 0x3fc   : > { %v1488_v29 = vmax.f32 %v1486_v28, 0.0 }
 0x3fe   : > { %1490 = vst [vmem:[%s643_s21 + $0x8] sm:$0xff] %v1488_v29 }
 0x3ff PF: > { %s28_s27 = sadd.s32 1, %s1972_s27  }
 0x400   : > { %p25_p4 = scmp.ge.s32.totalorder %s28_s27, 6  }
 0x402   :  { %27 = sbr.rel (!%p25_p4) target bundleno = 7 (0x7), region = 132 }

// kernel: neognn_forward.14
= control target key start
LH: loop header
LB: loop body
LE: loop exit
PB: predicated region body
PF: predicated region fallthrough
CT: control target
= control target key end

     0   :  { %s364_s9 = smov 0   ;;  %s393_s0 = inlined_call_operand.vmem [shape: bf16[64,64], index: 0, kind: input, shape index: {}]   ;;  %s394_s1 = inlined_call_operand.vmem [shape: bf16[64,128], index: 1, kind: input, shape index: {}]   ;;  %s395_s2 = inlined_call_operand.vmem [shape: f32[64,128], index: 2, kind: output, shape index: {}]  }
   0x1 LB: > { %s290_s10 = sadd.s32 4294967295, %s345_s9   ;;  %p294_p0 = scmp.ge.s32.totalorder %s345_s9, 1  ;;  %s345_s9 = sphi %s364_s9, %s12_s9  }
   0x2   : > { %p113_p1 = scmp.lt.s32.totalorder %s345_s9, 5 }
   0x4   : > { %p114_p2 = pnand %p294_p0, %p113_p1 }
   0x5   : > { %s295_s15 = sshll.u32 (!%p114_p2), %s290_s10, 1 }
   0x6   : > { %117 = sbr.rel (%p114_p2) target bundleno = 227 (0xe3), region = 28  ;;  %p136_p3 = scmp.lt.s32.totalorder (!%p114_p2), %s295_s15, 7 }
   0xb   : > { %v334_v0 = vld [vmem:[%s394_s1 + $0x18] sm:$0xff]   ;;  %v347_v1 = vmov 0.0   ;;  %v335_v2 = vld [vmem:[%s394_s1 + $0x10] sm:$0xff]   ;;  %vm348_vm0 = vmmov 0   ;;  %s397_s15 = smov (!%p136_p3, %s295_s15), 7  ;;  %v336_v3 = vld [vmem:[%s394_s1 + $0x8] sm:$0xff]  }
   0xc   : > { %312 = vmatprep.subr.bf16.mxu0 %v347_v1  ;;  %320 = vmatprep.mubr.msk.bf16.mxu0 %vm348_vm0, %v347_v1  ;;  %s296_s18 = sshll.u32 %s397_s15, 2  ;;  %v337_v4 = vld [vmem:[%s394_s1] sm:$0xff]   ;;  %vm187_vm1 = vcmask 523264   ;;  %s298_s24 = sshll.u32 %s397_s15, 3 }
   0xd   : > { %313 = vmatpush3.bf16.msra.mxu0 %v334_v0  ;;  %s139_s21 = scalar_lea.vmem %s393_s0, %s296_s18  ;;  %s145_s27 = scalar_lea.vmem %s395_s2, %s298_s24 }
   0xe   : > { %314 = vmatprep.subr.bf16.mxu0 %v347_v1  ;;  %v338_v5 = vld [vmem:[%s139_s21] sm:$0xff]  }
  0x11   : > { %315 = vmatpush3.bf16.msra.mxu0 %v335_v2 }
  0x12   : > { %316 = vmatprep.subr.bf16.mxu0 %v347_v1 }
  0x15   : > { %317 = vmatpush3.bf16.msra.mxu0 %v336_v3 }
  0x16   : > { %318 = vmatprep.subr.bf16.mxu0 %v347_v1 }
  0x19   : > { %319 = vmatpush3.bf16.msra.mxu0 %v337_v4 }
  0x1c   : > { %321 = vmatmul.mubr.msk.bf16.vlgmr.msra.gmra.mxu0 %vm187_vm1, %v338_v5 }
  0xdc   : > { %v225_v6 = vpop.f32.mrf.mxu0 }
  0xdd   : > { %232 = vst [vmem:[%s145_s27] sm:$0xff] %v225_v6 }
  0xde   : > { %v322_v7 = vpop.f32.mrf.mxu0 }
  0xe0   : > { %v228_v8 = vpop.f32.mrf.mxu0 }
  0xe1   : > { %233 = vst [vmem:[%s145_s27 + $0x8] sm:$0xff] %v228_v8 }
  0xe2   : > { %v323_v9 = vpop.f32.mrf.mxu0 }
  0xe3 PF: > { %s12_s9 = sadd.s32 1, %s345_s9  }
  0xe4   : > { %p9_p4 = scmp.ge.s32.totalorder %s12_s9, 6  }
  0xe6   :  { %11 = sbr.rel (!%p9_p4) target bundleno = 1 (0x1), region = 58 }

// kernel: neognn_forward.15
= control target key start
LH: loop header
LB: loop body
LE: loop exit
PB: predicated region body
PF: predicated region fallthrough
CT: control target
= control target key end

     0   :  { %v709_v59 = vmov 0   ;;  %s1009_s4 = inlined_call_operand.vmem [shape: f32[128,1], index: 4, kind: input, shape index: {}]   ;;  %s1010_s5 = inlined_call_operand.<no memory space> [shape: f32[1,1], index: 5, kind: input, shape index: {}]   ;;  %s1011_s2 = inlined_call_operand.vmem [shape: f32[16,128], index: 2, kind: input, shape index: {}]   ;;  %s1012_s3 = inlined_call_operand.vmem [shape: f32[16,128], index: 3, kind: input, shape index: {}]   ;;  %s1013_s7 = inlined_call_operand.vmem [shape: f32[128,128], index: 7, kind: input, shape index: {}]   ;;  %s1014_s6 = inlined_call_operand.vmem [shape: f32[128,128], index: 6, kind: input, shape index: {}]   ;;  %s1015_s1 = inlined_call_operand.vmem [shape: f32[16,128], index: 1, kind: input, shape index: {}]   ;;  %s1016_s0 = inlined_call_operand.vmem [shape: f32[16,128], index: 0, kind: input, shape index: {}]   ;;  %s1017_s10 = inlined_call_operand.vmem [shape: f32[128,128], index: 10, kind: input, shape index: {}]   ;;  %s1018_s8 = inlined_call_operand.vmem [shape: f32[1,128], index: 8, kind: input, shape index: {}]   ;;  %s1019_s9 = inlined_call_operand.vmem [shape: f32[1,128], index: 9, kind: input, shape index: {}]   ;;  %s1020_s11 = inlined_call_operand.vmem [shape: f32[1,128], index: 11, kind: input, shape index: {}]   ;;  %s1021_s12 = inlined_call_operand.vmem [shape: f32[16,128], index: 12, kind: output, shape index: {}]  }
   0x1   :  { %v64_v0 = vld [vmem:[%s1009_s4 + $0x78] sm:$0xff]  ;;  %v63_v1 = vld [vmem:[%s1009_s4 + $0x70] sm:$0xff]  ;;  %v17_v2 = vstv %s1010_s5  ;;  %v62_v3 = vld [vmem:[%s1009_s4 + $0x68] sm:$0xff]  ;;  %700 = vset.pattern.permute.xlu0 %v709_v59 }
   0x2   :  { %559 = vmatprep.subr.mxu0 %v64_v0  ;;  %18 = vst [vmem:[#allocation2] sm:$0x1] %v17_v2  ;;  %v61_v4 = vld [vmem:[%s1009_s4 + $0x60] sm:$0xff]  ;;  %v60_v6 = vld [vmem:[%s1009_s4 + $0x58] sm:$0xff]  ;;  %v193_v10 = vld [vmem:[%s1013_s7 + $0x70] sm:$0xff] }
   0x3   :  { %560 = vmatpush3.msra.mxu0 %v64_v0  ;;  %v43_v5 = vld [vmem:[%s1011_s2] sm:$0xff]  ;;  %v194_v8 = vld [vmem:[%s1013_s7 + $0x78] sm:$0xff]  ;;  %v59_v11 = vld [vmem:[%s1009_s4 + $0x50] sm:$0xff] }
   0x4   :  { %561 = vmatprep.subr.mxu0 %v63_v1  ;;  %v45_v7 = vld [vmem:[%s1012_s3] sm:$0xff]  ;;  %594 = vmatprep.subr.mxu1 %v194_v8  ;;  %v192_v12 = vld [vmem:[%s1013_s7 + $0x68] sm:$0xff]  ;;  %v190_v16 = vld [vmem:[%s1013_s7 + $0x58] sm:$0xff] }
   0x5   :  { %562 = vmatpush3.msra.mxu0 %v63_v1  ;;  %v47_v9 = vmul.f32 %v45_v7, %v43_v5  ;;  %595 = vmatpush3.msra.mxu1 %v194_v8  ;;  %v58_v13 = vld [vmem:[%s1009_s4 + $0x48] sm:$0xff]  ;;  %v191_v14 = vld [vmem:[%s1013_s7 + $0x60] sm:$0xff]  ;;  %v56_v17 = vld [vmem:[%s1009_s4 + $0x38] sm:$0xff] }
   0x6   :  { %563 = vmatprep.subr.mxu0 %v62_v3  ;;  %596 = vmatprep.subr.mxu1 %v193_v10  ;;  %v57_v15 = vld [vmem:[%s1009_s4 + $0x40] sm:$0xff]  ;;  %v189_v18 = vld [vmem:[%s1013_s7 + $0x50] sm:$0xff]  ;;  %v188_v20 = vld [vmem:[%s1013_s7 + $0x48] sm:$0xff] }
   0x7   :  { %564 = vmatpush3.msra.mxu0 %v62_v3  ;;  %591 = vmatprep.mubr.f32.mxu0 %v47_v9  ;;  %v55_v19 = vld [vmem:[%s1009_s4 + $0x30] sm:$0xff]  ;;  %v54_v21 = vld [vmem:[%s1009_s4 + $0x28] sm:$0xff]  ;;  %v187_v22 = vld [vmem:[%s1013_s7 + $0x40] sm:$0xff] }
   0x8   :  { %565 = vmatprep.subr.mxu0 %v61_v4  ;;  %597 = vmatpush3.msra.mxu1 %v193_v10  ;;  %v53_v23 = vld [vmem:[%s1009_s4 + $0x20] sm:$0xff]  ;;  %v186_v24 = vld [vmem:[%s1013_s7 + $0x38] sm:$0xff]  ;;  %v185_v26 = vld [vmem:[%s1013_s7 + $0x30] sm:$0xff] }
   0x9   :  { %566 = vmatpush3.msra.mxu0 %v61_v4  ;;  %598 = vmatprep.subr.mxu1 %v192_v12  ;;  %v52_v25 = vld [vmem:[%s1009_s4 + $0x18] sm:$0xff]  ;;  %v51_v27 = vld [vmem:[%s1009_s4 + $0x10] sm:$0xff]  ;;  %v184_v28 = vld [vmem:[%s1013_s7 + $0x28] sm:$0xff] }
   0xa   :  { %567 = vmatprep.subr.mxu0 %v60_v6  ;;  %599 = vmatpush3.msra.mxu1 %v192_v12  ;;  %v50_v29 = vld [vmem:[%s1009_s4 + $0x8] sm:$0xff]  ;;  %v183_v32 = vld [vmem:[%s1013_s7 + $0x20] sm:$0xff]  ;;  %v182_v35 = vld [vmem:[%s1013_s7 + $0x18] sm:$0xff] }
   0xb   :  { %568 = vmatpush3.msra.mxu0 %v60_v6  ;;  %600 = vmatprep.subr.mxu1 %v191_v14  ;;  %v44_v30 = vld [vmem:[%s1011_s2 + $0x8] sm:$0xff]  ;;  %v49_v33 = vld [vmem:[%s1009_s4] sm:$0xff]  ;;  %v176_v36 = vld [vmem:[%s1014_s6 + $0x78] sm:$0xff] }
   0xc   :  { %569 = vmatprep.subr.mxu0 %v59_v11  ;;  %601 = vmatpush3.msra.mxu1 %v191_v14  ;;  %v46_v31 = vld [vmem:[%s1012_s3 + $0x8] sm:$0xff]  ;;  %v175_v37 = vld [vmem:[%s1014_s6 + $0x70] sm:$0xff]  ;;  %v173_v41 = vld [vmem:[%s1014_s6 + $0x60] sm:$0xff] }
   0xd   :  { %570 = vmatpush3.msra.mxu0 %v59_v11  ;;  %602 = vmatprep.subr.mxu1 %v190_v16  ;;  %v48_v34 = vmul.f32 %v46_v31, %v44_v30  ;;  %v181_v38 = vld [vmem:[%s1013_s7 + $0x10] sm:$0xff]  ;;  %v174_v39 = vld [vmem:[%s1014_s6 + $0x68] sm:$0xff]  ;;  %v179_v42 = vld [vmem:[%s1013_s7] sm:$0xff] }
   0xe   :  { %571 = vmatprep.subr.mxu0 %v58_v13  ;;  %603 = vmatpush3.msra.mxu1 %v190_v16  ;;  %v180_v40 = vld [vmem:[%s1013_s7 + $0x8] sm:$0xff]  ;;  %v172_v43 = vld [vmem:[%s1014_s6 + $0x58] sm:$0xff]  ;;  %v177_v44 = vld [vmem:[%s1015_s1] sm:$0xff] }
   0xf   :  { %572 = vmatpush3.msra.mxu0 %v58_v13  ;;  %604 = vmatprep.subr.mxu1 %v189_v18  ;;  %v159_v45 = vld [vmem:[%s1016_s0] sm:$0xff]  ;;  %v171_v46 = vld [vmem:[%s1014_s6 + $0x50] sm:$0xff]  ;;  %v178_v47 = vld [vmem:[%s1015_s1 + $0x8] sm:$0xff] }
  0x10   :  { %573 = vmatprep.subr.mxu0 %v57_v15  ;;  %605 = vmatpush3.msra.mxu1 %v189_v18  ;;  %v170_v48 = vld [vmem:[%s1014_s6 + $0x48] sm:$0xff]  ;;  %v169_v49 = vld [vmem:[%s1014_s6 + $0x40] sm:$0xff]  ;;  %v168_v50 = vld [vmem:[%s1014_s6 + $0x38] sm:$0xff] }
  0x11   :  { %574 = vmatpush3.msra.mxu0 %v57_v15  ;;  %606 = vmatprep.subr.mxu1 %v188_v20  ;;  %v167_v51 = vld [vmem:[%s1014_s6 + $0x30] sm:$0xff]  ;;  %v166_v52 = vld [vmem:[%s1014_s6 + $0x28] sm:$0xff]  ;;  %v165_v53 = vld [vmem:[%s1014_s6 + $0x20] sm:$0xff] }
  0x12   :  { %575 = vmatprep.subr.mxu0 %v56_v17  ;;  %607 = vmatpush3.msra.mxu1 %v188_v20  ;;  %v164_v54 = vld [vmem:[%s1014_s6 + $0x18] sm:$0xff]  ;;  %v163_v55 = vld [vmem:[%s1014_s6 + $0x10] sm:$0xff]  ;;  %v162_v56 = vld [vmem:[%s1014_s6 + $0x8] sm:$0xff] }
  0x13   :  { %576 = vmatpush3.msra.mxu0 %v56_v17  ;;  %608 = vmatprep.subr.mxu1 %v187_v22  ;;  %v161_v57 = vld [vmem:[%s1014_s6] sm:$0xff]  ;;  %v160_v58 = vld [vmem:[%s1016_s0 + $0x8] sm:$0xff]  ;;  %v392_v60 = vld [vmem:[%s1017_s10 + $0x78] sm:$0xff] }
  0x14   :  { %577 = vmatprep.subr.mxu0 %v55_v19  ;;  %609 = vmatpush3.msra.mxu1 %v187_v22  ;;  %v391_v61 = vld [vmem:[%s1017_s10 + $0x70] sm:$0xff]  ;;  %v390_v62 = vld [vmem:[%s1017_s10 + $0x68] sm:$0xff]  ;;  %v389_v63 = vld [vmem:[%s1017_s10 + $0x60] sm:$0xff] }
  0x15   :  { %578 = vmatpush3.msra.mxu0 %v55_v19  ;;  %610 = vmatprep.subr.mxu1 %v186_v24  ;;  %v388_v0 = vld [vmem:[%s1017_s10 + $0x58] sm:$0xff]  ;;  %v387_v1 = vld [vmem:[%s1017_s10 + $0x50] sm:$0xff]  ;;  %v386_v2 = vld [vmem:[%s1017_s10 + $0x48] sm:$0xff] }
  0x16   :  { %579 = vmatprep.subr.mxu0 %v54_v21  ;;  %611 = vmatpush3.msra.mxu1 %v186_v24  ;;  %v385_v3 = vld [vmem:[%s1017_s10 + $0x40] sm:$0xff]  ;;  %v384_v4 = vld [vmem:[%s1017_s10 + $0x38] sm:$0xff]  ;;  %v383_v5 = vld [vmem:[%s1017_s10 + $0x30] sm:$0xff] }
  0x17   :  { %580 = vmatpush3.msra.mxu0 %v54_v21  ;;  %612 = vmatprep.subr.mxu1 %v185_v26  ;;  %v481_v6 = vld [vmem:[#allocation2] ss:$0 sm:$0xff]  ;;  %v382_v17 = vld [vmem:[%s1017_s10 + $0x28] sm:$0xff]  ;;  %v380_v20 = vld [vmem:[%s1017_s10 + $0x18] sm:$0xff] }
  0x18   :  { %581 = vmatprep.subr.mxu0 %v53_v23  ;;  %613 = vmatpush3.msra.mxu1 %v185_v26  ;;  %v381_v18 = vld [vmem:[%s1017_s10 + $0x20] sm:$0xff]  ;;  %v379_v21 = vld [vmem:[%s1017_s10 + $0x10] sm:$0xff] }
  0x19   :  { %582 = vmatpush3.msra.mxu0 %v53_v23  ;;  %614 = vmatprep.subr.mxu1 %v184_v28  ;;  %v378_v23 = vld [vmem:[%s1017_s10 + $0x8] sm:$0xff]  ;;  %v377_v24 = vld [vmem:[%s1017_s10] sm:$0xff] }
  0x1a   :  { %583 = vmatprep.subr.mxu0 %v52_v25  ;;  %615 = vmatpush3.msra.mxu1 %v184_v28 }
  0x1b   :  { %584 = vmatpush3.msra.mxu0 %v52_v25  ;;  %616 = vmatprep.subr.mxu1 %v183_v32 }
  0x1c   :  { %585 = vmatprep.subr.mxu0 %v51_v27  ;;  %617 = vmatpush3.msra.mxu1 %v183_v32 }
  0x1d   :  { %586 = vmatpush3.msra.mxu0 %v51_v27  ;;  %618 = vmatprep.subr.mxu1 %v182_v35 }
  0x1e   :  { %587 = vmatprep.subr.mxu0 %v50_v29  ;;  %619 = vmatpush3.msra.mxu1 %v182_v35 }
  0x1f   :  { %588 = vmatpush3.msra.mxu0 %v50_v29  ;;  %620 = vmatprep.subr.mxu1 %v181_v38  ;;  %v484_v29 = vld [vmem:[%s1018_s8] ss:$0 sm:$0xff] }
  0x20   :  { %589 = vmatprep.subr.mxu0 %v49_v33  ;;  %621 = vmatpush3.msra.mxu1 %v181_v38 }
  0x21   :  { %590 = vmatpush3.msra.mxu0 %v49_v33  ;;  %622 = vmatprep.subr.mxu1 %v180_v40  ;;  %v485_v33 = vld [vmem:[%s1019_s9] ss:$0 sm:$0xff] }
  0x22   :  { %592 = vmatmul.mubr.f32.vlgmr.msra.gmra.mxu0 %v48_v34  ;;  %629 = vmatprep.subr.mxu0 %v176_v36 }
  0x23   :  { %630 = vmatpush3.msra.mxu0 %v176_v36  ;;  %623 = vmatpush3.msra.mxu1 %v180_v40 }
  0x24   :  { %631 = vmatprep.subr.mxu0 %v175_v37  ;;  %624 = vmatprep.subr.mxu1 %v179_v42 }
  0x25   :  { %632 = vmatpush3.msra.mxu0 %v175_v37  ;;  %625 = vmatpush3.msra.mxu1 %v179_v42 }
  0x26   :  { %633 = vmatprep.subr.mxu0 %v174_v39  ;;  %626 = vmatprep.mubr.f32.mxu1 %v177_v44 }
  0x27   :  { %634 = vmatpush3.msra.mxu0 %v174_v39  ;;  %661 = vmatprep.mubr.f32.mxu0 %v159_v45 }
  0x28   :  { %635 = vmatprep.subr.mxu0 %v173_v41  ;;  %627 = vmatmul.mubr.f32.vlgmr.msra.gmra.mxu1 %v178_v47 }
  0x29   :  { %636 = vmatpush3.msra.mxu0 %v173_v41  ;;  %664 = vmatprep.subr.mxu1 %v392_v60 }
  0x2a   :  { %637 = vmatprep.subr.mxu0 %v172_v43  ;;  %665 = vmatpush3.msra.mxu1 %v392_v60 }
  0x2b   :  { %638 = vmatpush3.msra.mxu0 %v172_v43  ;;  %666 = vmatprep.subr.mxu1 %v391_v61  ;;  %v486_v43 = vld [vmem:[%s1020_s11] ss:$0 sm:$0xff] }
  0x2c   :  { %639 = vmatprep.subr.mxu0 %v171_v46  ;;  %667 = vmatpush3.msra.mxu1 %v391_v61 }
  0x2d   :  { %640 = vmatpush3.msra.mxu0 %v171_v46  ;;  %668 = vmatprep.subr.mxu1 %v390_v62 }
  0x2e   :  { %641 = vmatprep.subr.mxu0 %v170_v48  ;;  %669 = vmatpush3.msra.mxu1 %v390_v62 }
  0x2f   :  { %642 = vmatpush3.msra.mxu0 %v170_v48  ;;  %670 = vmatprep.subr.mxu1 %v389_v63 }
  0x30   :  { %643 = vmatprep.subr.mxu0 %v169_v49  ;;  %671 = vmatpush3.msra.mxu1 %v389_v63 }
  0x31   :  { %644 = vmatpush3.msra.mxu0 %v169_v49  ;;  %672 = vmatprep.subr.mxu1 %v388_v0 }
  0x32   :  { %645 = vmatprep.subr.mxu0 %v168_v50  ;;  %673 = vmatpush3.msra.mxu1 %v388_v0 }
  0x33   :  { %646 = vmatpush3.msra.mxu0 %v168_v50  ;;  %674 = vmatprep.subr.mxu1 %v387_v1 }
  0x34   :  { %647 = vmatprep.subr.mxu0 %v167_v51  ;;  %675 = vmatpush3.msra.mxu1 %v387_v1 }
  0x35   :  { %648 = vmatpush3.msra.mxu0 %v167_v51  ;;  %676 = vmatprep.subr.mxu1 %v386_v2 }
  0x36   :  { %649 = vmatprep.subr.mxu0 %v166_v52  ;;  %677 = vmatpush3.msra.mxu1 %v386_v2 }
  0x37   :  { %650 = vmatpush3.msra.mxu0 %v166_v52  ;;  %678 = vmatprep.subr.mxu1 %v385_v3 }
  0x38   :  { %651 = vmatprep.subr.mxu0 %v165_v53  ;;  %679 = vmatpush3.msra.mxu1 %v385_v3 }
  0x39   :  { %652 = vmatpush3.msra.mxu0 %v165_v53  ;;  %680 = vmatprep.subr.mxu1 %v384_v4 }
  0x3a   :  { %653 = vmatprep.subr.mxu0 %v164_v54  ;;  %681 = vmatpush3.msra.mxu1 %v384_v4 }
  0x3b   :  { %654 = vmatpush3.msra.mxu0 %v164_v54  ;;  %682 = vmatprep.subr.mxu1 %v383_v5 }
  0x3c   :  { %655 = vmatprep.subr.mxu0 %v163_v55  ;;  %683 = vmatpush3.msra.mxu1 %v383_v5 }
  0x3d   :  { %656 = vmatpush3.msra.mxu0 %v163_v55  ;;  %684 = vmatprep.subr.mxu1 %v382_v17 }
  0x3e   :  { %657 = vmatprep.subr.mxu0 %v162_v56  ;;  %685 = vmatpush3.msra.mxu1 %v382_v17 }
  0x3f   :  { %658 = vmatpush3.msra.mxu0 %v162_v56  ;;  %686 = vmatprep.subr.mxu1 %v381_v18 }
  0x40   :  { %659 = vmatprep.subr.mxu0 %v161_v57  ;;  %687 = vmatpush3.msra.mxu1 %v381_v18 }
  0x41   :  { %660 = vmatpush3.msra.mxu0 %v161_v57  ;;  %688 = vmatprep.subr.mxu1 %v380_v20 }
  0x42   :  { %662 = vmatmul.mubr.f32.vlgmr.msra.gmra.mxu0 %v160_v58  ;;  %689 = vmatpush3.msra.mxu1 %v380_v20 }
  0x43   :  { %690 = vmatprep.subr.mxu1 %v379_v21 }
  0x44   :  { %691 = vmatpush3.msra.mxu1 %v379_v21 }
  0x45   :  { %692 = vmatprep.subr.mxu1 %v378_v23 }
  0x46   :  { %693 = vmatpush3.msra.mxu1 %v378_v23 }
  0x47   :  { %694 = vmatprep.subr.mxu1 %v377_v24 }
  0x48   :  { %695 = vmatpush3.msra.mxu1 %v377_v24 }
  0xe2   :  { %v593_v7 = vpop.f32.mrf.mxu0 }
  0xe3   :  { %v144_v8 = vadd.f32 %v593_v7, %v481_v6 }
  0xe4   :  { %v138_v9 = vpop.f32.mrf.mxu0 }
  0xe5   :  { %v483_v10 = vmul.f32 -1.442695, %v144_v8  ;;  %v139_v11 = vadd.f32 %v481_v6, %v138_v9 }
  0xe7   :  { %v482_v12 = vmul.f32 -1.442695, %v139_v11  ;;  %701 = vpow2.f32 %v483_v10 }
  0xe8   :  { %v628_v25 = vpop.f32.mrf.mxu1 }
  0xe9   :  { %703 = vpow2.f32 %v482_v12 }
  0xea   :  { %v261_v27 = vpop.f32.mrf.mxu1 }
  0xf4   :  { %v702_v13 = vpop.eup %701 }
  0xf5   :  { %v154_v16 = vadd.f32 1.0, %v702_v13 }
  0xf6   :  { %v704_v14 = vpop.eup %703 }
  0xf7   :  { %v153_v15 = vadd.f32 1.0, %v704_v14 }
  0xf9   :  { %705 = vrcp.f32 %v153_v15 }
  0xfa   :  { %707 = vrcp.f32 %v154_v16 }
 0x102   :  { %v663_v26 = vpop.f32.mrf.mxu0 }
 0x103   :  { %v342_v36 = vadd.f32 %v663_v26, %v628_v25 }
 0x104   :  { %v336_v28 = vpop.f32.mrf.mxu0 }
 0x105   :  { %v337_v30 = vadd.f32 %v336_v28, %v261_v27 }
 0x106   :  { %v706_v19 = vpop.eup %705 }
 0x107   :  { %348 = vperm.xlu0 %700, %v706_v19   ;;  %v708_v22 = vpop.eup %707 }
 0x10b   :  { %353 = vperm.xlu0 %700, %v708_v22  }
 0x182   :  { %v349_v31 = vpop.permute.xlu0 %348 }
 0x183   :  { %v362_v32 = vmul.f32 %v484_v29, %v349_v31 }
 0x185   :  { %v364_v34 = vadd.f32 %v362_v32, %v337_v30 }
 0x186   :  { %v354_v35 = vpop.permute.xlu0 %353 }
 0x187   :  { %v363_v37 = vmul.f32 %v484_v29, %v354_v35  ;;  %v373_v38 = vadd.f32 %v485_v33, %v364_v34 }
 0x189   :  { %v365_v39 = vadd.f32 %v363_v37, %v342_v36  ;;  %v375_v40 = vmax.f32 %v373_v38, 0.0 }
 0x18b   :  { %v374_v41 = vadd.f32 %v485_v33, %v365_v39  ;;  %696 = vmatprep.mubr.f32.mxu1 %v375_v40 }
 0x18d   :  { %v376_v42 = vmax.f32 %v374_v41, 0.0 }
 0x18f   :  { %697 = vmatmul.mubr.f32.vlgmr.msra.gmra.mxu1 %v376_v42 }
 0x24f   :  { %v698_v44 = vpop.f32.mrf.mxu1 }
 0x250   :  { %v472_v45 = vadd.f32 %v698_v44, %v486_v43 }
 0x251   :  { %v466_v46 = vpop.f32.mrf.mxu1 }
 0x252   :  { %476 = vst [vmem:[%s1021_s12 + $0x8] sm:$0xff] %v472_v45  ;;  %v467_v47 = vadd.f32 %v486_v43, %v466_v46 }
 0x254   :  { %475 = vst [vmem:[%s1021_s12] sm:$0xff] %v467_v47 }

</bundles_post_ra>
